<compile_context>
chip_gen: v5e
topology: v5e:2x2
jax: 0.10.0
libtpu: 0.0.40
codegen_flags: <defaults>
</compile_context>

<pallas_src>
import math
import functools

import jax
import jax.numpy as jnp
from jax.experimental import pallas as pl
from jax.experimental.pallas import tpu as pltpu


def _vmem_limit_bytes():
    # ~half of physical VMEM: ~32 MiB on v7x (64 MiB VMEM), ~64 MiB on
    # v5e / v6e (128 MiB VMEM).
    try:
        cap = pltpu.get_tpu_info().vmem_capacity_bytes
    except Exception:
        cap = 128 * 1024 * 1024
    return int(min(64 * 1024 * 1024, cap // 2))


_VMEM_LIMIT = _vmem_limit_bytes()


# ----------------------------- in-kernel helpers ----------------------------

def _bf16(x):
    return x.astype(jnp.bfloat16)


def _layernorm(x, gamma, beta, eps=1e-5):
    mu = jnp.mean(x, axis=-1, keepdims=True)
    var = jnp.mean((x - mu) ** 2, axis=-1, keepdims=True)
    return (x - mu) * jax.lax.rsqrt(var + eps) * gamma + beta


def _encoder_layer_block(x, pe, wqkv, bqkv, wo, bo, ln1w, ln1b,
                         w1, b1, w2, b2, ln2w, ln2b, *, nhead, emb_scale):
    """One fused post-norm encoder layer on a (Bblk, S, D) activation block.

    wqkv / wo / w1 / w2 arrive pre-cast to bf16; sm_scale is pre-folded into
    the Q columns of wqkv / bqkv.  Matmuls run on the MXU with f32
    accumulation; softmax / LayerNorm / residual math stays f32.
    """
    Bb, S, D = x.shape
    Dh = D // nhead

    if emb_scale is not None:
        # layer-0 prologue: x = emb * sqrt(d_model) + positional encoding
        # (dropout == identity in eval forward)
        x = x * emb_scale + pe[None, :, :]

    xf = x.reshape(Bb * S, D)

    # Fused QKV in-projection over the whole (Bblk*S, D) slab (big MXU M-dim).
    qkv = jnp.dot(_bf16(xf), wqkv, preferred_element_type=jnp.float32) + bqkv
    qkv = qkv.reshape(Bb, S, 3 * D)

    # Per-head attention; the out-projection is ACCUMULATED over heads so a
    # lane-narrow (S, D) head concatenate is never materialized.
    # TODO(synk): for long sequences switch to flash-style online-softmax KV
    #             tiling instead of the full (S, S) score matrix.
    proj = None
    for h in range(nhead):
        q = _bf16(qkv[:, :, h * Dh:(h + 1) * Dh])                # pre-scaled Q
        k = _bf16(qkv[:, :, D + h * Dh:D + (h + 1) * Dh])
        v = _bf16(qkv[:, :, 2 * D + h * Dh:2 * D + (h + 1) * Dh])
        s = jnp.einsum('bqd,bkd->bqk', q, k,
                       preferred_element_type=jnp.float32)       # (Bb, S, S)
        m = jnp.max(s, axis=-1, keepdims=True)
        p = jnp.exp(s - m)
        p = p * pl.reciprocal(jnp.sum(p, axis=-1, keepdims=True), approx=True)
        o = jnp.einsum('bqk,bkd->bqd', _bf16(p), v,
                       preferred_element_type=jnp.float32)       # (Bb, S, Dh)
        contrib = jnp.dot(_bf16(o.reshape(Bb * S, Dh)),
                          wo[h * Dh:(h + 1) * Dh, :],
                          preferred_element_type=jnp.float32)    # (Bb*S, D)
        proj = contrib if proj is None else proj + contrib

    y = _layernorm(xf + proj + bo, ln1w, ln1b)                   # (Bb*S, D)

    # Fused FFN + residual + LayerNorm2 (no HBM round trip between halves).
    h1 = jnp.dot(_bf16(y), w1, preferred_element_type=jnp.float32) + b1
    h1 = _bf16(jnp.maximum(h1, 0.0))        # relu output kept bf16 into matmul 2
    ff = jnp.dot(h1, w2, preferred_element_type=jnp.float32) + b2
    out = _layernorm(y + ff, ln2w, ln2b)
    return out.reshape(Bb, S, D)


# ------------------------------- Pallas kernels ------------------------------

def encoder_layer_kernel(x_ref, wqkv_ref, bqkv_ref, wo_ref, bo_ref,
                         ln1w_ref, ln1b_ref, w1_ref, b1_ref, w2_ref, b2_ref,
                         ln2w_ref, ln2b_ref, o_ref, *, nhead):
    o_ref[...] = _encoder_layer_block(
        x_ref[...], None, wqkv_ref[...], bqkv_ref[...], wo_ref[...],
        bo_ref[...], ln1w_ref[...], ln1b_ref[...], w1_ref[...], b1_ref[...],
        w2_ref[...], b2_ref[...], ln2w_ref[...], ln2b_ref[...],
        nhead=nhead, emb_scale=None)


def encoder_layer0_kernel(x_ref, pe_ref, wqkv_ref, bqkv_ref, wo_ref, bo_ref,
                          ln1w_ref, ln1b_ref, w1_ref, b1_ref, w2_ref, b2_ref,
                          ln2w_ref, ln2b_ref, o_ref, *, nhead, emb_scale):
    o_ref[...] = _encoder_layer_block(
        x_ref[...], pe_ref[...], wqkv_ref[...], bqkv_ref[...], wo_ref[...],
        bo_ref[...], ln1w_ref[...], ln1b_ref[...], w1_ref[...], b1_ref[...],
        w2_ref[...], b2_ref[...], ln2w_ref[...], ln2b_ref[...],
        nhead=nhead, emb_scale=emb_scale)


def mean_cls_kernel(y_ref, w_ref, b_ref, o_ref, acc_ref, *, inv_b):
    # Accumulate sum over the batch axis in VMEM scratch; finalize with the
    # mean + Linear(D, 1) head on the last grid step.  The (S, 1) masked
    # store is a negligible one-off.
    i = pl.program_id(0)

    @pl.when(i == 0)
    def _():
        acc_ref[...] = jnp.zeros_like(acc_ref)

    acc_ref[...] += jnp.sum(y_ref[...], axis=0)                  # (S, D)

    @pl.when(i == pl.num_programs(0) - 1)
    def _():
        ym = acc_ref[...] * inv_b                                # mean over batch
        o_ref[...] = jnp.sum(ym * w_ref[...], axis=-1, keepdims=True) + b_ref[...]


# ------------------------------ pallas_call glue ------------------------------

def _const_spec(arr):
    # Whole-array block, same block index every grid step (fetched once /
    # stays resident across the grid).
    zeros = (0,) * arr.ndim
    return pl.BlockSpec(arr.shape, lambda i: zeros)


def _pick_batch_block(batch, seq_len, *, rows_target=512, min_steps=4):
    """Largest per-step batch block such that block rows <= rows_target, the
    batch axis divides evenly, and there are still >= min(batch, min_steps)
    grid steps (so v7x's two TensorCores and the DMA pipeline stay fed)."""
    need = min(batch, min_steps)
    best = 1
    for bb in range(1, batch + 1):
        if batch % bb:
            continue
        if bb * seq_len > rows_target:
            break
        if batch // bb < need:
            continue
        best = bb
    return best


def _encoder_layer_call(x, layer, *, nhead, bblk, pe=None, emb_scale=None):
    B, S, D = x.shape
    x_spec = pl.BlockSpec((bblk, S, D), lambda i: (i, 0, 0))
    w_args = (layer["wqkv"], layer["bqkv"], layer["wo"], layer["bo"],
              layer["ln1_w"], layer["ln1_b"], layer["w1"], layer["b1"],
              layer["w2"], layer["b2"], layer["ln2_w"], layer["ln2_b"])
    if pe is None:
        kernel = functools.partial(encoder_layer_kernel, nhead=nhead)
        args = (x,) + w_args
        in_specs = [x_spec] + [_const_spec(a) for a in w_args]
    else:
        kernel = functools.partial(encoder_layer0_kernel, nhead=nhead,
                                   emb_scale=emb_scale)
        args = (x, pe) + w_args
        in_specs = [x_spec, _const_spec(pe)] + [_const_spec(a) for a in w_args]
    return pl.pallas_call(
        kernel,
        out_shape=jax.ShapeDtypeStruct((B, S, D), jnp.float32),
        grid=(B // bblk,),
        in_specs=in_specs,
        out_specs=x_spec,
        compiler_params=pltpu.CompilerParams(
            dimension_semantics=("parallel",),
            vmem_limit_bytes=_VMEM_LIMIT),
    )(*args)


def _mean_cls_call(y, cls_w, cls_b, *, bblk):
    B, S, D = y.shape
    out = pl.pallas_call(
        functools.partial(mean_cls_kernel, inv_b=1.0 / B),
        out_shape=jax.ShapeDtypeStruct((S, 1), jnp.float32),
        grid=(B // bblk,),
        in_specs=[pl.BlockSpec((bblk, S, D), lambda i: (i, 0, 0)),
                  _const_spec(cls_w), _const_spec(cls_b)],
        out_specs=pl.BlockSpec((S, 1), lambda i: (0, 0)),
        scratch_shapes=[pltpu.VMEM((S, D), jnp.float32)],
        compiler_params=pltpu.CompilerParams(
            dimension_semantics=("arbitrary",),
            vmem_limit_bytes=_VMEM_LIMIT),
    )(y, cls_w, cls_b)
    return out[:, 0]


# ------------------------------ parameters / PE --------------------------------

def make_positional_encoding(max_len, d_model):
    position = jnp.arange(max_len, dtype=jnp.float32)[:, None]
    div_term = jnp.exp(jnp.arange(0, d_model, 2, dtype=jnp.float32)
                       * (-math.log(10000.0) / d_model))
    pe = jnp.zeros((max_len, d_model), jnp.float32)
    pe = pe.at[:, 0::2].set(jnp.sin(position * div_term))
    pe = pe.at[:, 1::2].set(jnp.cos(position * div_term))
    return pe  # (max_len, d_model)


def init_params(key, *, vocab_size, d_model, nhead, num_layers, d_ff, max_len=5000):
    keys = jax.random.split(key, 2 + num_layers)
    std = 0.02
    params = {
        "emb": jax.random.uniform(keys[0], (vocab_size, d_model),
                                  jnp.float32, -0.1, 0.1),
        "pe": make_positional_encoding(max_len, d_model),
        "cls_w": std * jax.random.normal(keys[1], (1, d_model), jnp.float32),
        "cls_b": jnp.full((1, 1), 0.01, jnp.float32),
    }
    layers = []
    for l in range(num_layers):
        ks = jax.random.split(keys[2 + l], 8)
        layers.append(dict(
            wqkv=std * jax.random.normal(ks[0], (d_model, 3 * d_model), jnp.float32),
            bqkv=std * jax.random.normal(ks[1], (1, 3 * d_model), jnp.float32),
            wo=std * jax.random.normal(ks[2], (d_model, d_model), jnp.float32),
            bo=std * jax.random.normal(ks[3], (1, d_model), jnp.float32),
            w1=std * jax.random.normal(ks[4], (d_model, d_ff), jnp.float32),
            b1=std * jax.random.normal(ks[5], (1, d_ff), jnp.float32),
            w2=std * jax.random.normal(ks[6], (d_ff, d_model), jnp.float32),
            b2=std * jax.random.normal(ks[7], (1, d_model), jnp.float32),
            ln1_w=jnp.ones((1, d_model), jnp.float32),
            ln1_b=jnp.zeros((1, d_model), jnp.float32),
            ln2_w=jnp.ones((1, d_model), jnp.float32),
            ln2_b=jnp.zeros((1, d_model), jnp.float32),
        ))
    params["layers"] = layers
    return params


def prepare_params(params, *, nhead):
    """Kernel-ready params: sm_scale folded into the Q columns of the packed
    in-projection (one-time), matmul weights pre-cast to bf16 (halves weight
    DMA bytes and resident VMEM -- important on v7x's 64 MiB), biases and
    LayerNorm params kept f32."""
    d_model = params["emb"].shape[1]
    sm_scale = 1.0 / math.sqrt(d_model // nhead)
    out = {"emb": params["emb"], "pe": params["pe"],
           "cls_w": params["cls_w"], "cls_b": params["cls_b"]}
    layers = []
    for lyr in params["layers"]:
        wqkv = lyr["wqkv"].at[:, :d_model].multiply(sm_scale)
        bqkv = lyr["bqkv"].at[:, :d_model].multiply(sm_scale)
        layers.append(dict(
            wqkv=wqkv.astype(jnp.bfloat16), bqkv=bqkv,
            wo=lyr["wo"].astype(jnp.bfloat16), bo=lyr["bo"],
            w1=lyr["w1"].astype(jnp.bfloat16), b1=lyr["b1"],
            w2=lyr["w2"].astype(jnp.bfloat16), b2=lyr["b2"],
            ln1_w=lyr["ln1_w"], ln1_b=lyr["ln1_b"],
            ln2_w=lyr["ln2_w"], ln2_b=lyr["ln2_b"]))
    out["layers"] = layers
    return out


# --------------------------------- forward ------------------------------------

@functools.partial(jax.jit, static_argnames=("d_model", "nhead"))
def transformer_forward(kparams, src, *, d_model, nhead):
    S, B = src.shape
    D = d_model
    bblk = _pick_batch_block(B, S)

    # Embedding lookup (data-dependent gather) kept in plain-JAX glue, laid
    # out batch-first as (B, S, D).
    # TODO(synk): could become a scalar-prefetch pl.Element row-gather kernel.
    x = jnp.take(kparams["emb"], src.T.reshape(-1), axis=0).reshape(B, S, D)
    pe = kparams["pe"][:S]                                        # (S, D)

    for li, layer in enumerate(kparams["layers"]):
        if li == 0:
            # embedding scale + positional encoding fused into the first
            # fused attention+FFN layer kernel
            x = _encoder_layer_call(x, layer, nhead=nhead, bblk=bblk,
                                    pe=pe, emb_scale=math.sqrt(D))
        else:
            x = _encoder_layer_call(x, layer, nhead=nhead, bblk=bblk)

    return _mean_cls_call(x, kparams["cls_w"], kparams["cls_b"], bblk=bblk)  # (S,)


# --------------------------- pure-JAX reference (check) ------------------------

def reference_forward(params, src, *, d_model, nhead):
    S, B = src.shape
    D, H = d_model, nhead
    Dh = D // H
    x = jnp.take(params["emb"], src.reshape(-1), axis=0).reshape(S, B, D) * math.sqrt(D)
    x = x + params["pe"][:S][:, None, :]
    for layer in params["layers"]:
        xf = x.reshape(S * B, D)
        qkv = xf @ layer["wqkv"] + layer["bqkv"]
        q, k, v = jnp.split(qkv, 3, axis=-1)

        def heads(t):
            return t.reshape(S, B, H, Dh).transpose(1, 2, 0, 3)
        s = jnp.einsum("bhqd,bhkd->bhqk", heads(q), heads(k)) / math.sqrt(Dh)
        p = jax.nn.softmax(s, axis=-1)
        o = jnp.einsum("bhqk,bhkd->bhqd", p, heads(v))
        attn = o.transpose(2, 0, 1, 3).reshape(S * B, D)
        y = _layernorm(xf + attn @ layer["wo"] + layer["bo"],
                       layer["ln1_w"], layer["ln1_b"])
        f = jnp.maximum(y @ layer["w1"] + layer["b1"], 0.0) @ layer["w2"] + layer["b2"]
        x = _layernorm(y + f, layer["ln2_w"], layer["ln2_b"]).reshape(S, B, D)
    out = x.mean(axis=1)                                          # (S, D)
    return (out @ params["cls_w"].T + params["cls_b"])[:, 0]      # (S,)


# ------------------------------------ main -------------------------------------

if __name__ == "__main__":
    VOCAB = 100
    D_MODEL = 128
    NHEAD = 4
    NUM_LAYERS = 2
    D_FF = 256        # PyTorch default dim_feedforward is 2048; shrunk for the demo
    S, B = 8, 2

    key = jax.random.PRNGKey(0)
    pkey, dkey = jax.random.split(key)
    params = init_params(pkey, vocab_size=VOCAB, d_model=D_MODEL, nhead=NHEAD,
                         num_layers=NUM_LAYERS, d_ff=D_FF)
    kparams = prepare_params(params, nhead=NHEAD)
    src = jax.random.randint(dkey, (S, B), 0, VOCAB, dtype=jnp.int32)

    out = transformer_forward(kparams, src, d_model=D_MODEL, nhead=NHEAD)
    out = jax.block_until_ready(out)

    with jax.default_matmul_precision("highest"):
        ref = jax.block_until_ready(
            reference_forward(params, src, d_model=D_MODEL, nhead=NHEAD))

    assert out.shape == (S,), out.shape
    assert jnp.allclose(out, ref, rtol=2e-2, atol=2e-2), (out, ref)
    print("KERNEL_OK")
</pallas_src>

<mosaic_0001>
module attributes {stable_mosaic.version = 11 : i64} {
  func.func @encoder_layer_kernel(%arg0: i32, %arg1: memref<1x8x128xf32, #tpu.memory_space<vmem>>, %arg2: memref<128x384xbf16, #tpu.memory_space<vmem>>, %arg3: memref<1x384xf32, #tpu.memory_space<vmem>>, %arg4: memref<128x128xbf16, #tpu.memory_space<vmem>>, %arg5: memref<1x128xf32, #tpu.memory_space<vmem>>, %arg6: memref<1x128xf32, #tpu.memory_space<vmem>>, %arg7: memref<1x128xf32, #tpu.memory_space<vmem>>, %arg8: memref<128x256xbf16, #tpu.memory_space<vmem>>, %arg9: memref<1x256xf32, #tpu.memory_space<vmem>>, %arg10: memref<256x128xbf16, #tpu.memory_space<vmem>>, %arg11: memref<1x128xf32, #tpu.memory_space<vmem>>, %arg12: memref<1x128xf32, #tpu.memory_space<vmem>>, %arg13: memref<1x128xf32, #tpu.memory_space<vmem>>, %arg14: memref<1x8x128xf32, #tpu.memory_space<vmem>>) attributes {dimension_semantics = [#tpu.dimension_semantics<parallel>], iteration_bounds = array<i64: 2>, scalar_prefetch = 0 : i64, scratch_operands = 0 : i64, tpu.core_type = #tpu.core_type<tc>, window_params = [{transform_indices = @transform_0, window_bounds = array<i64: 1, 8, 128>}, {pipeline_mode = #tpu.pipeline_mode<synchronous>, transform_indices = @transform_1, window_bounds = array<i64: 128, 384>}, {pipeline_mode = #tpu.pipeline_mode<synchronous>, transform_indices = @transform_2, window_bounds = array<i64: 1, 384>}, {pipeline_mode = #tpu.pipeline_mode<synchronous>, transform_indices = @transform_3, window_bounds = array<i64: 128, 128>}, {pipeline_mode = #tpu.pipeline_mode<synchronous>, transform_indices = @transform_4, window_bounds = array<i64: 1, 128>}, {pipeline_mode = #tpu.pipeline_mode<synchronous>, transform_indices = @transform_5, window_bounds = array<i64: 1, 128>}, {pipeline_mode = #tpu.pipeline_mode<synchronous>, transform_indices = @transform_6, window_bounds = array<i64: 1, 128>}, {pipeline_mode = #tpu.pipeline_mode<synchronous>, transform_indices = @transform_7, window_bounds = array<i64: 128, 256>}, {pipeline_mode = #tpu.pipeline_mode<synchronous>, transform_indices = @transform_8, window_bounds = array<i64: 1, 256>}, {pipeline_mode = #tpu.pipeline_mode<synchronous>, transform_indices = @transform_9, window_bounds = array<i64: 256, 128>}, {pipeline_mode = #tpu.pipeline_mode<synchronous>, transform_indices = @transform_10, window_bounds = array<i64: 1, 128>}, {pipeline_mode = #tpu.pipeline_mode<synchronous>, transform_indices = @transform_11, window_bounds = array<i64: 1, 128>}, {pipeline_mode = #tpu.pipeline_mode<synchronous>, transform_indices = @transform_12, window_bounds = array<i64: 1, 128>}, {transform_indices = @transform_13, window_bounds = array<i64: 1, 8, 128>}]} {
    %c0 = arith.constant 0 : index
    %c0_0 = arith.constant 0 : index
    %c0_1 = arith.constant 0 : index
    %0 = vector.load %arg1[%c0, %c0_0, %c0_1] : memref<1x8x128xf32, #tpu.memory_space<vmem>>, vector<1x8x128xf32>
    %c0_2 = arith.constant 0 : index
    %c0_3 = arith.constant 0 : index
    %1 = vector.load %arg2[%c0_2, %c0_3] : memref<128x384xbf16, #tpu.memory_space<vmem>>, vector<128x384xbf16>
    %c0_4 = arith.constant 0 : index
    %c0_5 = arith.constant 0 : index
    %2 = vector.load %arg3[%c0_4, %c0_5] : memref<1x384xf32, #tpu.memory_space<vmem>>, vector<1x384xf32>
    %c0_6 = arith.constant 0 : index
    %c0_7 = arith.constant 0 : index
    %3 = vector.load %arg4[%c0_6, %c0_7] : memref<128x128xbf16, #tpu.memory_space<vmem>>, vector<128x128xbf16>
    %c0_8 = arith.constant 0 : index
    %c0_9 = arith.constant 0 : index
    %4 = vector.load %arg5[%c0_8, %c0_9] : memref<1x128xf32, #tpu.memory_space<vmem>>, vector<1x128xf32>
    %c0_10 = arith.constant 0 : index
    %c0_11 = arith.constant 0 : index
    %5 = vector.load %arg6[%c0_10, %c0_11] : memref<1x128xf32, #tpu.memory_space<vmem>>, vector<1x128xf32>
    %c0_12 = arith.constant 0 : index
    %c0_13 = arith.constant 0 : index
    %6 = vector.load %arg7[%c0_12, %c0_13] : memref<1x128xf32, #tpu.memory_space<vmem>>, vector<1x128xf32>
    %c0_14 = arith.constant 0 : index
    %c0_15 = arith.constant 0 : index
    %7 = vector.load %arg8[%c0_14, %c0_15] : memref<128x256xbf16, #tpu.memory_space<vmem>>, vector<128x256xbf16>
    %c0_16 = arith.constant 0 : index
    %c0_17 = arith.constant 0 : index
    %8 = vector.load %arg9[%c0_16, %c0_17] : memref<1x256xf32, #tpu.memory_space<vmem>>, vector<1x256xf32>
    %c0_18 = arith.constant 0 : index
    %c0_19 = arith.constant 0 : index
    %9 = vector.load %arg10[%c0_18, %c0_19] : memref<256x128xbf16, #tpu.memory_space<vmem>>, vector<256x128xbf16>
    %c0_20 = arith.constant 0 : index
    %c0_21 = arith.constant 0 : index
    %10 = vector.load %arg11[%c0_20, %c0_21] : memref<1x128xf32, #tpu.memory_space<vmem>>, vector<1x128xf32>
    %c0_22 = arith.constant 0 : index
    %c0_23 = arith.constant 0 : index
    %11 = vector.load %arg12[%c0_22, %c0_23] : memref<1x128xf32, #tpu.memory_space<vmem>>, vector<1x128xf32>
    %c0_24 = arith.constant 0 : index
    %c0_25 = arith.constant 0 : index
    %12 = vector.load %arg13[%c0_24, %c0_25] : memref<1x128xf32, #tpu.memory_space<vmem>>, vector<1x128xf32>
    %13 = vector.shape_cast %0 : vector<1x8x128xf32> to vector<8x128xf32>
    %14 = arith.truncf %13 : vector<8x128xf32> to vector<8x128xbf16>
    %cst = arith.constant dense<0.000000e+00> : vector<8x384xf32>
    %15 = tpu.matmul %14, %1, %cst {dimension_numbers = #tpu.dot_dimension_numbers<[1], [0], [0], [1], [0, 0, 1, 1], [], []>} : vector<8x128xbf16>, vector<128x384xbf16>, vector<8x384xf32> -> vector<8x384xf32>
    %16 = vector.broadcast %2 : vector<1x384xf32> to vector<8x384xf32>
    %17 = arith.addf %15, %16 : vector<8x384xf32>
    %18 = vector.shape_cast %17 : vector<8x384xf32> to vector<1x8x384xf32>
    %19 = vector.extract_strided_slice %18 {offsets = [0, 0, 0], sizes = [1, 8, 32], strides = [1, 1, 1]} : vector<1x8x384xf32> to vector<1x8x32xf32>
    %20 = arith.truncf %19 : vector<1x8x32xf32> to vector<1x8x32xbf16>
    %21 = vector.extract_strided_slice %18 {offsets = [0, 0, 128], sizes = [1, 8, 32], strides = [1, 1, 1]} : vector<1x8x384xf32> to vector<1x8x32xf32>
    %22 = arith.truncf %21 : vector<1x8x32xf32> to vector<1x8x32xbf16>
    %23 = vector.extract_strided_slice %18 {offsets = [0, 0, 256], sizes = [1, 8, 32], strides = [1, 1, 1]} : vector<1x8x384xf32> to vector<1x8x32xf32>
    %24 = arith.truncf %23 : vector<1x8x32xf32> to vector<1x8x32xbf16>
    "tpu.trace_start"() <{level = 10 : i32, message = "bqd,bkd->bqk"}> : () -> ()
    %cst_26 = arith.constant dense<0.000000e+00> : vector<1x8x8xf32>
    %25 = tpu.matmul %20, %22, %cst_26 {dimension_numbers = #tpu.dot_dimension_numbers<[2], [2], [1], [1], [0, 0, 0, 1, 1, 1], [0], [0]>} : vector<1x8x32xbf16>, vector<1x8x32xbf16>, vector<1x8x8xf32> -> vector<1x8x8xf32>
    "tpu.trace_stop"() : () -> ()
    %cst_27 = arith.constant dense<0xFF800000> : vector<1x8xf32>
    %26 = vector.multi_reduction <maximumf>, %25, %cst_27 [2] : vector<1x8x8xf32> to vector<1x8xf32>
    %27 = vector.shape_cast %26 : vector<1x8xf32> to vector<1x8x1xf32>
    %28 = vector.broadcast %27 : vector<1x8x1xf32> to vector<1x8x8xf32>
    %29 = arith.subf %25, %28 : vector<1x8x8xf32>
    %30 = math.exp %29 : vector<1x8x8xf32>
    %cst_28 = arith.constant dense<0.000000e+00> : vector<1x8xf32>
    %31 = vector.multi_reduction <add>, %30, %cst_28 [2] : vector<1x8x8xf32> to vector<1x8xf32>
    %32 = vector.shape_cast %31 : vector<1x8xf32> to vector<1x8x1xf32>
    %33 = tpu.reciprocal %32 {approx = true} : vector<1x8x1xf32> -> vector<1x8x1xf32>
    %34 = vector.broadcast %33 : vector<1x8x1xf32> to vector<1x8x8xf32>
    %35 = arith.mulf %30, %34 : vector<1x8x8xf32>
    %36 = arith.truncf %35 : vector<1x8x8xf32> to vector<1x8x8xbf16>
    "tpu.trace_start"() <{level = 10 : i32, message = "bqk,bkd->bqd"}> : () -> ()
    %cst_29 = arith.constant dense<0.000000e+00> : vector<1x8x32xf32>
    %37 = tpu.matmul %36, %24, %cst_29 {dimension_numbers = #tpu.dot_dimension_numbers<[2], [1], [1], [2], [0, 0, 0, 1, 1, 2], [0], [0]>} : vector<1x8x8xbf16>, vector<1x8x32xbf16>, vector<1x8x32xf32> -> vector<1x8x32xf32>
    "tpu.trace_stop"() : () -> ()
    %38 = vector.shape_cast %37 : vector<1x8x32xf32> to vector<8x32xf32>
    %39 = arith.truncf %38 : vector<8x32xf32> to vector<8x32xbf16>
    %40 = vector.extract_strided_slice %3 {offsets = [0, 0], sizes = [32, 128], strides = [1, 1]} : vector<128x128xbf16> to vector<32x128xbf16>
    %cst_30 = arith.constant dense<0.000000e+00> : vector<8x128xf32>
    %41 = tpu.matmul %39, %40, %cst_30 {dimension_numbers = #tpu.dot_dimension_numbers<[1], [0], [0], [1], [0, 0, 1, 1], [], []>} : vector<8x32xbf16>, vector<32x128xbf16>, vector<8x128xf32> -> vector<8x128xf32>
    %42 = vector.extract_strided_slice %18 {offsets = [0, 0, 32], sizes = [1, 8, 32], strides = [1, 1, 1]} : vector<1x8x384xf32> to vector<1x8x32xf32>
    %43 = arith.truncf %42 : vector<1x8x32xf32> to vector<1x8x32xbf16>
    %44 = vector.extract_strided_slice %18 {offsets = [0, 0, 160], sizes = [1, 8, 32], strides = [1, 1, 1]} : vector<1x8x384xf32> to vector<1x8x32xf32>
    %45 = arith.truncf %44 : vector<1x8x32xf32> to vector<1x8x32xbf16>
    %46 = vector.extract_strided_slice %18 {offsets = [0, 0, 288], sizes = [1, 8, 32], strides = [1, 1, 1]} : vector<1x8x384xf32> to vector<1x8x32xf32>
    %47 = arith.truncf %46 : vector<1x8x32xf32> to vector<1x8x32xbf16>
    "tpu.trace_start"() <{level = 10 : i32, message = "bqd,bkd->bqk"}> : () -> ()
    %cst_31 = arith.constant dense<0.000000e+00> : vector<1x8x8xf32>
    %48 = tpu.matmul %43, %45, %cst_31 {dimension_numbers = #tpu.dot_dimension_numbers<[2], [2], [1], [1], [0, 0, 0, 1, 1, 1], [0], [0]>} : vector<1x8x32xbf16>, vector<1x8x32xbf16>, vector<1x8x8xf32> -> vector<1x8x8xf32>
    "tpu.trace_stop"() : () -> ()
    %cst_32 = arith.constant dense<0xFF800000> : vector<1x8xf32>
    %49 = vector.multi_reduction <maximumf>, %48, %cst_32 [2] : vector<1x8x8xf32> to vector<1x8xf32>
    %50 = vector.shape_cast %49 : vector<1x8xf32> to vector<1x8x1xf32>
    %51 = vector.broadcast %50 : vector<1x8x1xf32> to vector<1x8x8xf32>
    %52 = arith.subf %48, %51 : vector<1x8x8xf32>
    %53 = math.exp %52 : vector<1x8x8xf32>
    %cst_33 = arith.constant dense<0.000000e+00> : vector<1x8xf32>
    %54 = vector.multi_reduction <add>, %53, %cst_33 [2] : vector<1x8x8xf32> to vector<1x8xf32>
    %55 = vector.shape_cast %54 : vector<1x8xf32> to vector<1x8x1xf32>
    %56 = tpu.reciprocal %55 {approx = true} : vector<1x8x1xf32> -> vector<1x8x1xf32>
    %57 = vector.broadcast %56 : vector<1x8x1xf32> to vector<1x8x8xf32>
    %58 = arith.mulf %53, %57 : vector<1x8x8xf32>
    %59 = arith.truncf %58 : vector<1x8x8xf32> to vector<1x8x8xbf16>
    "tpu.trace_start"() <{level = 10 : i32, message = "bqk,bkd->bqd"}> : () -> ()
    %cst_34 = arith.constant dense<0.000000e+00> : vector<1x8x32xf32>
    %60 = tpu.matmul %59, %47, %cst_34 {dimension_numbers = #tpu.dot_dimension_numbers<[2], [1], [1], [2], [0, 0, 0, 1, 1, 2], [0], [0]>} : vector<1x8x8xbf16>, vector<1x8x32xbf16>, vector<1x8x32xf32> -> vector<1x8x32xf32>
    "tpu.trace_stop"() : () -> ()
    %61 = vector.shape_cast %60 : vector<1x8x32xf32> to vector<8x32xf32>
    %62 = arith.truncf %61 : vector<8x32xf32> to vector<8x32xbf16>
    %63 = vector.extract_strided_slice %3 {offsets = [32, 0], sizes = [32, 128], strides = [1, 1]} : vector<128x128xbf16> to vector<32x128xbf16>
    %cst_35 = arith.constant dense<0.000000e+00> : vector<8x128xf32>
    %64 = tpu.matmul %62, %63, %cst_35 {dimension_numbers = #tpu.dot_dimension_numbers<[1], [0], [0], [1], [0, 0, 1, 1], [], []>} : vector<8x32xbf16>, vector<32x128xbf16>, vector<8x128xf32> -> vector<8x128xf32>
    %65 = arith.addf %41, %64 : vector<8x128xf32>
    %66 = vector.extract_strided_slice %18 {offsets = [0, 0, 64], sizes = [1, 8, 32], strides = [1, 1, 1]} : vector<1x8x384xf32> to vector<1x8x32xf32>
    %67 = arith.truncf %66 : vector<1x8x32xf32> to vector<1x8x32xbf16>
    %68 = vector.extract_strided_slice %18 {offsets = [0, 0, 192], sizes = [1, 8, 32], strides = [1, 1, 1]} : vector<1x8x384xf32> to vector<1x8x32xf32>
    %69 = arith.truncf %68 : vector<1x8x32xf32> to vector<1x8x32xbf16>
    %70 = vector.extract_strided_slice %18 {offsets = [0, 0, 320], sizes = [1, 8, 32], strides = [1, 1, 1]} : vector<1x8x384xf32> to vector<1x8x32xf32>
    %71 = arith.truncf %70 : vector<1x8x32xf32> to vector<1x8x32xbf16>
    "tpu.trace_start"() <{level = 10 : i32, message = "bqd,bkd->bqk"}> : () -> ()
    %cst_36 = arith.constant dense<0.000000e+00> : vector<1x8x8xf32>
    %72 = tpu.matmul %67, %69, %cst_36 {dimension_numbers = #tpu.dot_dimension_numbers<[2], [2], [1], [1], [0, 0, 0, 1, 1, 1], [0], [0]>} : vector<1x8x32xbf16>, vector<1x8x32xbf16>, vector<1x8x8xf32> -> vector<1x8x8xf32>
    "tpu.trace_stop"() : () -> ()
    %cst_37 = arith.constant dense<0xFF800000> : vector<1x8xf32>
    %73 = vector.multi_reduction <maximumf>, %72, %cst_37 [2] : vector<1x8x8xf32> to vector<1x8xf32>
    %74 = vector.shape_cast %73 : vector<1x8xf32> to vector<1x8x1xf32>
    %75 = vector.broadcast %74 : vector<1x8x1xf32> to vector<1x8x8xf32>
    %76 = arith.subf %72, %75 : vector<1x8x8xf32>
    %77 = math.exp %76 : vector<1x8x8xf32>
    %cst_38 = arith.constant dense<0.000000e+00> : vector<1x8xf32>
    %78 = vector.multi_reduction <add>, %77, %cst_38 [2] : vector<1x8x8xf32> to vector<1x8xf32>
    %79 = vector.shape_cast %78 : vector<1x8xf32> to vector<1x8x1xf32>
    %80 = tpu.reciprocal %79 {approx = true} : vector<1x8x1xf32> -> vector<1x8x1xf32>
    %81 = vector.broadcast %80 : vector<1x8x1xf32> to vector<1x8x8xf32>
    %82 = arith.mulf %77, %81 : vector<1x8x8xf32>
    %83 = arith.truncf %82 : vector<1x8x8xf32> to vector<1x8x8xbf16>
    "tpu.trace_start"() <{level = 10 : i32, message = "bqk,bkd->bqd"}> : () -> ()
    %cst_39 = arith.constant dense<0.000000e+00> : vector<1x8x32xf32>
    %84 = tpu.matmul %83, %71, %cst_39 {dimension_numbers = #tpu.dot_dimension_numbers<[2], [1], [1], [2], [0, 0, 0, 1, 1, 2], [0], [0]>} : vector<1x8x8xbf16>, vector<1x8x32xbf16>, vector<1x8x32xf32> -> vector<1x8x32xf32>
    "tpu.trace_stop"() : () -> ()
    %85 = vector.shape_cast %84 : vector<1x8x32xf32> to vector<8x32xf32>
    %86 = arith.truncf %85 : vector<8x32xf32> to vector<8x32xbf16>
    %87 = vector.extract_strided_slice %3 {offsets = [64, 0], sizes = [32, 128], strides = [1, 1]} : vector<128x128xbf16> to vector<32x128xbf16>
    %cst_40 = arith.constant dense<0.000000e+00> : vector<8x128xf32>
    %88 = tpu.matmul %86, %87, %cst_40 {dimension_numbers = #tpu.dot_dimension_numbers<[1], [0], [0], [1], [0, 0, 1, 1], [], []>} : vector<8x32xbf16>, vector<32x128xbf16>, vector<8x128xf32> -> vector<8x128xf32>
    %89 = arith.addf %65, %88 : vector<8x128xf32>
    %90 = vector.extract_strided_slice %18 {offsets = [0, 0, 96], sizes = [1, 8, 32], strides = [1, 1, 1]} : vector<1x8x384xf32> to vector<1x8x32xf32>
    %91 = arith.truncf %90 : vector<1x8x32xf32> to vector<1x8x32xbf16>
    %92 = vector.extract_strided_slice %18 {offsets = [0, 0, 224], sizes = [1, 8, 32], strides = [1, 1, 1]} : vector<1x8x384xf32> to vector<1x8x32xf32>
    %93 = arith.truncf %92 : vector<1x8x32xf32> to vector<1x8x32xbf16>
    %94 = vector.extract_strided_slice %18 {offsets = [0, 0, 352], sizes = [1, 8, 32], strides = [1, 1, 1]} : vector<1x8x384xf32> to vector<1x8x32xf32>
    %95 = arith.truncf %94 : vector<1x8x32xf32> to vector<1x8x32xbf16>
    "tpu.trace_start"() <{level = 10 : i32, message = "bqd,bkd->bqk"}> : () -> ()
    %cst_41 = arith.constant dense<0.000000e+00> : vector<1x8x8xf32>
    %96 = tpu.matmul %91, %93, %cst_41 {dimension_numbers = #tpu.dot_dimension_numbers<[2], [2], [1], [1], [0, 0, 0, 1, 1, 1], [0], [0]>} : vector<1x8x32xbf16>, vector<1x8x32xbf16>, vector<1x8x8xf32> -> vector<1x8x8xf32>
    "tpu.trace_stop"() : () -> ()
    %cst_42 = arith.constant dense<0xFF800000> : vector<1x8xf32>
    %97 = vector.multi_reduction <maximumf>, %96, %cst_42 [2] : vector<1x8x8xf32> to vector<1x8xf32>
    %98 = vector.shape_cast %97 : vector<1x8xf32> to vector<1x8x1xf32>
    %99 = vector.broadcast %98 : vector<1x8x1xf32> to vector<1x8x8xf32>
    %100 = arith.subf %96, %99 : vector<1x8x8xf32>
    %101 = math.exp %100 : vector<1x8x8xf32>
    %cst_43 = arith.constant dense<0.000000e+00> : vector<1x8xf32>
    %102 = vector.multi_reduction <add>, %101, %cst_43 [2] : vector<1x8x8xf32> to vector<1x8xf32>
    %103 = vector.shape_cast %102 : vector<1x8xf32> to vector<1x8x1xf32>
    %104 = tpu.reciprocal %103 {approx = true} : vector<1x8x1xf32> -> vector<1x8x1xf32>
    %105 = vector.broadcast %104 : vector<1x8x1xf32> to vector<1x8x8xf32>
    %106 = arith.mulf %101, %105 : vector<1x8x8xf32>
    %107 = arith.truncf %106 : vector<1x8x8xf32> to vector<1x8x8xbf16>
    "tpu.trace_start"() <{level = 10 : i32, message = "bqk,bkd->bqd"}> : () -> ()
    %cst_44 = arith.constant dense<0.000000e+00> : vector<1x8x32xf32>
    %108 = tpu.matmul %107, %95, %cst_44 {dimension_numbers = #tpu.dot_dimension_numbers<[2], [1], [1], [2], [0, 0, 0, 1, 1, 2], [0], [0]>} : vector<1x8x8xbf16>, vector<1x8x32xbf16>, vector<1x8x32xf32> -> vector<1x8x32xf32>
    "tpu.trace_stop"() : () -> ()
    %109 = vector.shape_cast %108 : vector<1x8x32xf32> to vector<8x32xf32>
    %110 = arith.truncf %109 : vector<8x32xf32> to vector<8x32xbf16>
    %111 = vector.extract_strided_slice %3 {offsets = [96, 0], sizes = [32, 128], strides = [1, 1]} : vector<128x128xbf16> to vector<32x128xbf16>
    %cst_45 = arith.constant dense<0.000000e+00> : vector<8x128xf32>
    %112 = tpu.matmul %110, %111, %cst_45 {dimension_numbers = #tpu.dot_dimension_numbers<[1], [0], [0], [1], [0, 0, 1, 1], [], []>} : vector<8x32xbf16>, vector<32x128xbf16>, vector<8x128xf32> -> vector<8x128xf32>
    %113 = arith.addf %89, %112 : vector<8x128xf32>
    %114 = arith.addf %13, %113 : vector<8x128xf32>
    %115 = vector.broadcast %4 : vector<1x128xf32> to vector<8x128xf32>
    %116 = arith.addf %114, %115 : vector<8x128xf32>
    %cst_46 = arith.constant dense<0.000000e+00> : vector<8xf32>
    %117 = vector.multi_reduction <add>, %116, %cst_46 [1] : vector<8x128xf32> to vector<8xf32>
    %118 = vector.shape_cast %117 : vector<8xf32> to vector<8x1xf32>
    %cst_47 = arith.constant 1.280000e+02 : f32
    %119 = vector.broadcast %cst_47 : f32 to vector<8x1xf32>
    %120 = arith.divf %118, %119 : vector<8x1xf32>
    %121 = vector.broadcast %120 : vector<8x1xf32> to vector<8x128xf32>
    %122 = arith.subf %116, %121 : vector<8x128xf32>
    %123 = arith.mulf %122, %122 : vector<8x128xf32>
    %cst_48 = arith.constant dense<0.000000e+00> : vector<8xf32>
    %124 = vector.multi_reduction <add>, %123, %cst_48 [1] : vector<8x128xf32> to vector<8xf32>
    %125 = vector.shape_cast %124 : vector<8xf32> to vector<8x1xf32>
    %cst_49 = arith.constant 1.280000e+02 : f32
    %126 = vector.broadcast %cst_49 : f32 to vector<8x1xf32>
    %127 = arith.divf %125, %126 : vector<8x1xf32>
    %128 = vector.broadcast %120 : vector<8x1xf32> to vector<8x128xf32>
    %129 = arith.subf %116, %128 : vector<8x128xf32>
    %cst_50 = arith.constant 9.99999974E-6 : f32
    %130 = vector.broadcast %cst_50 : f32 to vector<8x1xf32>
    %131 = arith.addf %127, %130 : vector<8x1xf32>
    %132 = math.rsqrt %131 : vector<8x1xf32>
    %133 = vector.broadcast %132 : vector<8x1xf32> to vector<8x128xf32>
    %134 = arith.mulf %129, %133 : vector<8x128xf32>
    %135 = vector.broadcast %5 : vector<1x128xf32> to vector<8x128xf32>
    %136 = arith.mulf %134, %135 : vector<8x128xf32>
    %137 = vector.broadcast %6 : vector<1x128xf32> to vector<8x128xf32>
    %138 = arith.addf %136, %137 : vector<8x128xf32>
    %139 = arith.truncf %138 : vector<8x128xf32> to vector<8x128xbf16>
    %cst_51 = arith.constant dense<0.000000e+00> : vector<8x256xf32>
    %140 = tpu.matmul %139, %7, %cst_51 {dimension_numbers = #tpu.dot_dimension_numbers<[1], [0], [0], [1], [0, 0, 1, 1], [], []>} : vector<8x128xbf16>, vector<128x256xbf16>, vector<8x256xf32> -> vector<8x256xf32>
    %141 = vector.broadcast %8 : vector<1x256xf32> to vector<8x256xf32>
    %142 = arith.addf %140, %141 : vector<8x256xf32>
    %cst_52 = arith.constant 0.000000e+00 : f32
    %143 = vector.broadcast %cst_52 : f32 to vector<8x256xf32>
    %144 = arith.maximumf %142, %143 : vector<8x256xf32>
    %145 = arith.truncf %144 : vector<8x256xf32> to vector<8x256xbf16>
    %cst_53 = arith.constant dense<0.000000e+00> : vector<8x128xf32>
    %146 = tpu.matmul %145, %9, %cst_53 {dimension_numbers = #tpu.dot_dimension_numbers<[1], [0], [0], [1], [0, 0, 1, 1], [], []>} : vector<8x256xbf16>, vector<256x128xbf16>, vector<8x128xf32> -> vector<8x128xf32>
    %147 = vector.broadcast %10 : vector<1x128xf32> to vector<8x128xf32>
    %148 = arith.addf %146, %147 : vector<8x128xf32>
    %149 = arith.addf %138, %148 : vector<8x128xf32>
    %cst_54 = arith.constant dense<0.000000e+00> : vector<8xf32>
    %150 = vector.multi_reduction <add>, %149, %cst_54 [1] : vector<8x128xf32> to vector<8xf32>
    %151 = vector.shape_cast %150 : vector<8xf32> to vector<8x1xf32>
    %cst_55 = arith.constant 1.280000e+02 : f32
    %152 = vector.broadcast %cst_55 : f32 to vector<8x1xf32>
    %153 = arith.divf %151, %152 : vector<8x1xf32>
    %154 = vector.broadcast %153 : vector<8x1xf32> to vector<8x128xf32>
    %155 = arith.subf %149, %154 : vector<8x128xf32>
    %156 = arith.mulf %155, %155 : vector<8x128xf32>
    %cst_56 = arith.constant dense<0.000000e+00> : vector<8xf32>
    %157 = vector.multi_reduction <add>, %156, %cst_56 [1] : vector<8x128xf32> to vector<8xf32>
    %158 = vector.shape_cast %157 : vector<8xf32> to vector<8x1xf32>
    %cst_57 = arith.constant 1.280000e+02 : f32
    %159 = vector.broadcast %cst_57 : f32 to vector<8x1xf32>
    %160 = arith.divf %158, %159 : vector<8x1xf32>
    %161 = vector.broadcast %153 : vector<8x1xf32> to vector<8x128xf32>
    %162 = arith.subf %149, %161 : vector<8x128xf32>
    %cst_58 = arith.constant 9.99999974E-6 : f32
    %163 = vector.broadcast %cst_58 : f32 to vector<8x1xf32>
    %164 = arith.addf %160, %163 : vector<8x1xf32>
    %165 = math.rsqrt %164 : vector<8x1xf32>
    %166 = vector.broadcast %165 : vector<8x1xf32> to vector<8x128xf32>
    %167 = arith.mulf %162, %166 : vector<8x128xf32>
    %168 = vector.broadcast %11 : vector<1x128xf32> to vector<8x128xf32>
    %169 = arith.mulf %167, %168 : vector<8x128xf32>
    %170 = vector.broadcast %12 : vector<1x128xf32> to vector<8x128xf32>
    %171 = arith.addf %169, %170 : vector<8x128xf32>
    %172 = vector.shape_cast %171 : vector<8x128xf32> to vector<1x8x128xf32>
    %c0_59 = arith.constant 0 : index
    %c0_60 = arith.constant 0 : index
    %c0_61 = arith.constant 0 : index
    %173 = vector.load %arg14[%c0_59, %c0_60, %c0_61] : memref<1x8x128xf32, #tpu.memory_space<vmem>>, vector<1x8x128xf32>
    tpu.vector_store %arg14[%c0_59, %c0_60, %c0_61], %172 {strides = array<i32>} : memref<1x8x128xf32, #tpu.memory_space<vmem>>, vector<1x8x128xf32>,
    return
  }
  func.func @transform_0(%arg0: i32) -> (i32, i32, i32) {
    %c0_i32 = arith.constant 0 : i32
    %c0_i32_0 = arith.constant 0 : i32
    %c0_i32_1 = arith.constant 0 : i32
    return %arg0, %c0_i32, %c0_i32_0 : i32, i32, i32
  }
  func.func @transform_1(%arg0: i32) -> (i32, i32) {
    %c0_i32 = arith.constant 0 : i32
    %c0_i32_0 = arith.constant 0 : i32
    %c0_i32_1 = arith.constant 0 : i32
    return %c0_i32, %c0_i32_0 : i32, i32
  }
  func.func @transform_2(%arg0: i32) -> (i32, i32) {
    %c0_i32 = arith.constant 0 : i32
    %c0_i32_0 = arith.constant 0 : i32
    %c0_i32_1 = arith.constant 0 : i32
    return %c0_i32, %c0_i32_0 : i32, i32
  }
  func.func @transform_3(%arg0: i32) -> (i32, i32) {
    %c0_i32 = arith.constant 0 : i32
    %c0_i32_0 = arith.constant 0 : i32
    %c0_i32_1 = arith.constant 0 : i32
    return %c0_i32, %c0_i32_0 : i32, i32
  }
  func.func @transform_4(%arg0: i32) -> (i32, i32) {
    %c0_i32 = arith.constant 0 : i32
    %c0_i32_0 = arith.constant 0 : i32
    %c0_i32_1 = arith.constant 0 : i32
    return %c0_i32, %c0_i32_0 : i32, i32
  }
  func.func @transform_5(%arg0: i32) -> (i32, i32) {
    %c0_i32 = arith.constant 0 : i32
    %c0_i32_0 = arith.constant 0 : i32
    %c0_i32_1 = arith.constant 0 : i32
    return %c0_i32, %c0_i32_0 : i32, i32
  }
  func.func @transform_6(%arg0: i32) -> (i32, i32) {
    %c0_i32 = arith.constant 0 : i32
    %c0_i32_0 = arith.constant 0 : i32
    %c0_i32_1 = arith.constant 0 : i32
    return %c0_i32, %c0_i32_0 : i32, i32
  }
  func.func @transform_7(%arg0: i32) -> (i32, i32) {
    %c0_i32 = arith.constant 0 : i32
    %c0_i32_0 = arith.constant 0 : i32
    %c0_i32_1 = arith.constant 0 : i32
    return %c0_i32, %c0_i32_0 : i32, i32
  }
  func.func @transform_8(%arg0: i32) -> (i32, i32) {
    %c0_i32 = arith.constant 0 : i32
    %c0_i32_0 = arith.constant 0 : i32
    %c0_i32_1 = arith.constant 0 : i32
    return %c0_i32, %c0_i32_0 : i32, i32
  }
  func.func @transform_9(%arg0: i32) -> (i32, i32) {
    %c0_i32 = arith.constant 0 : i32
    %c0_i32_0 = arith.constant 0 : i32
    %c0_i32_1 = arith.constant 0 : i32
    return %c0_i32, %c0_i32_0 : i32, i32
  }
  func.func @transform_10(%arg0: i32) -> (i32, i32) {
    %c0_i32 = arith.constant 0 : i32
    %c0_i32_0 = arith.constant 0 : i32
    %c0_i32_1 = arith.constant 0 : i32
    return %c0_i32, %c0_i32_0 : i32, i32
  }
  func.func @transform_11(%arg0: i32) -> (i32, i32) {
    %c0_i32 = arith.constant 0 : i32
    %c0_i32_0 = arith.constant 0 : i32
    %c0_i32_1 = arith.constant 0 : i32
    return %c0_i32, %c0_i32_0 : i32, i32
  }
  func.func @transform_12(%arg0: i32) -> (i32, i32) {
    %c0_i32 = arith.constant 0 : i32
    %c0_i32_0 = arith.constant 0 : i32
    %c0_i32_1 = arith.constant 0 : i32
    return %c0_i32, %c0_i32_0 : i32, i32
  }
  func.func @transform_13(%arg0: i32) -> (i32, i32, i32) {
    %c0_i32 = arith.constant 0 : i32
    %c0_i32_0 = arith.constant 0 : i32
    %c0_i32_1 = arith.constant 0 : i32
    return %arg0, %c0_i32, %c0_i32_0 : i32, i32, i32
  }
}

module attributes {stable_mosaic.version = 11 : i64} {
  func.func @mean_cls_kernel(%arg0: i32, %arg1: memref<1x8x128xf32, #tpu.memory_space<vmem>>, %arg2: memref<1x128xf32, #tpu.memory_space<vmem>>, %arg3: memref<1x1xf32, #tpu.memory_space<vmem>>, %arg4: memref<8x1xf32, #tpu.memory_space<vmem>>, %arg5: memref<8x128xf32, #tpu.memory_space<vmem>>) attributes {dimension_semantics = [#tpu.dimension_semantics<arbitrary>], iteration_bounds = array<i64: 2>, scalar_prefetch = 0 : i64, scratch_operands = 1 : i64, tpu.core_type = #tpu.core_type<tc>, window_params = [{transform_indices = @transform_0, window_bounds = array<i64: 1, 8, 128>}, {pipeline_mode = #tpu.pipeline_mode<synchronous>, transform_indices = @transform_1, window_bounds = array<i64: 1, 128>}, {pipeline_mode = #tpu.pipeline_mode<synchronous>, transform_indices = @transform_2, window_bounds = array<i64: 1, 1>}, {pipeline_mode = #tpu.pipeline_mode<synchronous>, transform_indices = @transform_3, window_bounds = array<i64: 8, 1>}]} {
    %c0_i32 = arith.constant 0 : i32
    %0 = arith.cmpi eq, %arg0, %c0_i32 : i32
    %1 = arith.extui %0 : i1 to i32
    %c0_i32_0 = arith.constant 0 : i32
    %2 = arith.cmpi ne, %1, %c0_i32_0 : i32
    scf.if %2 {
      %cst_8 = arith.constant 0.000000e+00 : f32
      %11 = vector.broadcast %cst_8 : f32 to vector<8x128xf32>
      %c0_9 = arith.constant 0 : index
      %c0_10 = arith.constant 0 : index
      %12 = vector.load %arg5[%c0_9, %c0_10] : memref<8x128xf32, #tpu.memory_space<vmem>>, vector<8x128xf32>
      tpu.vector_store %arg5[%c0_9, %c0_10], %11 {strides = array<i32>} : memref<8x128xf32, #tpu.memory_space<vmem>>, vector<8x128xf32>,
    } else {
    }
    %c0 = arith.constant 0 : index
    %c0_1 = arith.constant 0 : index
    %3 = vector.load %arg5[%c0, %c0_1] : memref<8x128xf32, #tpu.memory_space<vmem>>, vector<8x128xf32>
    %c0_2 = arith.constant 0 : index
    %c0_3 = arith.constant 0 : index
    %c0_4 = arith.constant 0 : index
    %4 = vector.load %arg1[%c0_2, %c0_3, %c0_4] : memref<1x8x128xf32, #tpu.memory_space<vmem>>, vector<1x8x128xf32>
    %cst = arith.constant dense<0.000000e+00> : vector<8x128xf32>
    %5 = vector.multi_reduction <add>, %4, %cst [0] : vector<1x8x128xf32> to vector<8x128xf32>
    %6 = arith.addf %3, %5 : vector<8x128xf32>
    %c0_5 = arith.constant 0 : index
    %c0_6 = arith.constant 0 : index
    %7 = vector.load %arg5[%c0_5, %c0_6] : memref<8x128xf32, #tpu.memory_space<vmem>>, vector<8x128xf32>
    tpu.vector_store %arg5[%c0_5, %c0_6], %6 {strides = array<i32>} : memref<8x128xf32, #tpu.memory_space<vmem>>, vector<8x128xf32>,
    %c1_i32 = arith.constant 1 : i32
    %8 = arith.cmpi eq, %arg0, %c1_i32 : i32
    %9 = arith.extui %8 : i1 to i32
    %c0_i32_7 = arith.constant 0 : i32
    %10 = arith.cmpi ne, %9, %c0_i32_7 : i32
    scf.if %10 {
      %c0_8 = arith.constant 0 : index
      %c0_9 = arith.constant 0 : index
      %11 = vector.load %arg5[%c0_8, %c0_9] : memref<8x128xf32, #tpu.memory_space<vmem>>, vector<8x128xf32>
      %cst_10 = arith.constant 5.000000e-01 : f32
      %12 = vector.broadcast %cst_10 : f32 to vector<8x128xf32>
      %13 = arith.mulf %11, %12 : vector<8x128xf32>
      %c0_11 = arith.constant 0 : index
      %c0_12 = arith.constant 0 : index
      %14 = vector.load %arg2[%c0_11, %c0_12] : memref<1x128xf32, #tpu.memory_space<vmem>>, vector<1x128xf32>
      %15 = vector.broadcast %14 : vector<1x128xf32> to vector<8x128xf32>
      %16 = arith.mulf %13, %15 : vector<8x128xf32>
      %cst_13 = arith.constant dense<0.000000e+00> : vector<8xf32>
      %17 = vector.multi_reduction <add>, %16, %cst_13 [1] : vector<8x128xf32> to vector<8xf32>
      %18 = vector.shape_cast %17 : vector<8xf32> to vector<8x1xf32>
      %c0_14 = arith.constant 0 : index
      %c0_15 = arith.constant 0 : index
      %19 = vector.load %arg3[%c0_14, %c0_15] : memref<1x1xf32, #tpu.memory_space<vmem>>, vector<1x1xf32>
      %20 = vector.broadcast %19 : vector<1x1xf32> to vector<8x1xf32>
      %21 = arith.addf %18, %20 : vector<8x1xf32>
      %c0_16 = arith.constant 0 : index
      %c0_17 = arith.constant 0 : index
      %22 = vector.load %arg4[%c0_16, %c0_17] : memref<8x1xf32, #tpu.memory_space<vmem>>, vector<8x1xf32>
      tpu.vector_store %arg4[%c0_16, %c0_17], %21 {strides = array<i32>} : memref<8x1xf32, #tpu.memory_space<vmem>>, vector<8x1xf32>,
    } else {
    }
    return
  }
  func.func @transform_0(%arg0: i32) -> (i32, i32, i32) {
    %c0_i32 = arith.constant 0 : i32
    %c0_i32_0 = arith.constant 0 : i32
    %c0_i32_1 = arith.constant 0 : i32
    return %arg0, %c0_i32, %c0_i32_0 : i32, i32, i32
  }
  func.func @transform_1(%arg0: i32) -> (i32, i32) {
    %c0_i32 = arith.constant 0 : i32
    %c0_i32_0 = arith.constant 0 : i32
    %c0_i32_1 = arith.constant 0 : i32
    return %c0_i32, %c0_i32_0 : i32, i32
  }
  func.func @transform_2(%arg0: i32) -> (i32, i32) {
    %c0_i32 = arith.constant 0 : i32
    %c0_i32_0 = arith.constant 0 : i32
    %c0_i32_1 = arith.constant 0 : i32
    return %c0_i32, %c0_i32_0 : i32, i32
  }
  func.func @transform_3(%arg0: i32) -> (i32, i32) {
    %c0_i32 = arith.constant 0 : i32
    %c0_i32_0 = arith.constant 0 : i32
    %c0_i32_1 = arith.constant 0 : i32
    return %c0_i32, %c0_i32_0 : i32, i32
  }
}

module attributes {stable_mosaic.version = 11 : i64} {
  func.func @encoder_layer0_kernel(%arg0: i32, %arg1: memref<1x8x128xf32, #tpu.memory_space<vmem>>, %arg2: memref<8x128xf32, #tpu.memory_space<vmem>>, %arg3: memref<128x384xbf16, #tpu.memory_space<vmem>>, %arg4: memref<1x384xf32, #tpu.memory_space<vmem>>, %arg5: memref<128x128xbf16, #tpu.memory_space<vmem>>, %arg6: memref<1x128xf32, #tpu.memory_space<vmem>>, %arg7: memref<1x128xf32, #tpu.memory_space<vmem>>, %arg8: memref<1x128xf32, #tpu.memory_space<vmem>>, %arg9: memref<128x256xbf16, #tpu.memory_space<vmem>>, %arg10: memref<1x256xf32, #tpu.memory_space<vmem>>, %arg11: memref<256x128xbf16, #tpu.memory_space<vmem>>, %arg12: memref<1x128xf32, #tpu.memory_space<vmem>>, %arg13: memref<1x128xf32, #tpu.memory_space<vmem>>, %arg14: memref<1x128xf32, #tpu.memory_space<vmem>>, %arg15: memref<1x8x128xf32, #tpu.memory_space<vmem>>) attributes {dimension_semantics = [#tpu.dimension_semantics<parallel>], iteration_bounds = array<i64: 2>, scalar_prefetch = 0 : i64, scratch_operands = 0 : i64, tpu.core_type = #tpu.core_type<tc>, window_params = [{transform_indices = @transform_0, window_bounds = array<i64: 1, 8, 128>}, {pipeline_mode = #tpu.pipeline_mode<synchronous>, transform_indices = @transform_1, window_bounds = array<i64: 8, 128>}, {pipeline_mode = #tpu.pipeline_mode<synchronous>, transform_indices = @transform_2, window_bounds = array<i64: 128, 384>}, {pipeline_mode = #tpu.pipeline_mode<synchronous>, transform_indices = @transform_3, window_bounds = array<i64: 1, 384>}, {pipeline_mode = #tpu.pipeline_mode<synchronous>, transform_indices = @transform_4, window_bounds = array<i64: 128, 128>}, {pipeline_mode = #tpu.pipeline_mode<synchronous>, transform_indices = @transform_5, window_bounds = array<i64: 1, 128>}, {pipeline_mode = #tpu.pipeline_mode<synchronous>, transform_indices = @transform_6, window_bounds = array<i64: 1, 128>}, {pipeline_mode = #tpu.pipeline_mode<synchronous>, transform_indices = @transform_7, window_bounds = array<i64: 1, 128>}, {pipeline_mode = #tpu.pipeline_mode<synchronous>, transform_indices = @transform_8, window_bounds = array<i64: 128, 256>}, {pipeline_mode = #tpu.pipeline_mode<synchronous>, transform_indices = @transform_9, window_bounds = array<i64: 1, 256>}, {pipeline_mode = #tpu.pipeline_mode<synchronous>, transform_indices = @transform_10, window_bounds = array<i64: 256, 128>}, {pipeline_mode = #tpu.pipeline_mode<synchronous>, transform_indices = @transform_11, window_bounds = array<i64: 1, 128>}, {pipeline_mode = #tpu.pipeline_mode<synchronous>, transform_indices = @transform_12, window_bounds = array<i64: 1, 128>}, {pipeline_mode = #tpu.pipeline_mode<synchronous>, transform_indices = @transform_13, window_bounds = array<i64: 1, 128>}, {transform_indices = @transform_14, window_bounds = array<i64: 1, 8, 128>}]} {
    %c0 = arith.constant 0 : index
    %c0_0 = arith.constant 0 : index
    %c0_1 = arith.constant 0 : index
    %0 = vector.load %arg1[%c0, %c0_0, %c0_1] : memref<1x8x128xf32, #tpu.memory_space<vmem>>, vector<1x8x128xf32>
    %c0_2 = arith.constant 0 : index
    %c0_3 = arith.constant 0 : index
    %1 = vector.load %arg2[%c0_2, %c0_3] : memref<8x128xf32, #tpu.memory_space<vmem>>, vector<8x128xf32>
    %c0_4 = arith.constant 0 : index
    %c0_5 = arith.constant 0 : index
    %2 = vector.load %arg3[%c0_4, %c0_5] : memref<128x384xbf16, #tpu.memory_space<vmem>>, vector<128x384xbf16>
    %c0_6 = arith.constant 0 : index
    %c0_7 = arith.constant 0 : index
    %3 = vector.load %arg4[%c0_6, %c0_7] : memref<1x384xf32, #tpu.memory_space<vmem>>, vector<1x384xf32>
    %c0_8 = arith.constant 0 : index
    %c0_9 = arith.constant 0 : index
    %4 = vector.load %arg5[%c0_8, %c0_9] : memref<128x128xbf16, #tpu.memory_space<vmem>>, vector<128x128xbf16>
    %c0_10 = arith.constant 0 : index
    %c0_11 = arith.constant 0 : index
    %5 = vector.load %arg6[%c0_10, %c0_11] : memref<1x128xf32, #tpu.memory_space<vmem>>, vector<1x128xf32>
    %c0_12 = arith.constant 0 : index
    %c0_13 = arith.constant 0 : index
    %6 = vector.load %arg7[%c0_12, %c0_13] : memref<1x128xf32, #tpu.memory_space<vmem>>, vector<1x128xf32>
    %c0_14 = arith.constant 0 : index
    %c0_15 = arith.constant 0 : index
    %7 = vector.load %arg8[%c0_14, %c0_15] : memref<1x128xf32, #tpu.memory_space<vmem>>, vector<1x128xf32>
    %c0_16 = arith.constant 0 : index
    %c0_17 = arith.constant 0 : index
    %8 = vector.load %arg9[%c0_16, %c0_17] : memref<128x256xbf16, #tpu.memory_space<vmem>>, vector<128x256xbf16>
    %c0_18 = arith.constant 0 : index
    %c0_19 = arith.constant 0 : index
    %9 = vector.load %arg10[%c0_18, %c0_19] : memref<1x256xf32, #tpu.memory_space<vmem>>, vector<1x256xf32>
    %c0_20 = arith.constant 0 : index
    %c0_21 = arith.constant 0 : index
    %10 = vector.load %arg11[%c0_20, %c0_21] : memref<256x128xbf16, #tpu.memory_space<vmem>>, vector<256x128xbf16>
    %c0_22 = arith.constant 0 : index
    %c0_23 = arith.constant 0 : index
    %11 = vector.load %arg12[%c0_22, %c0_23] : memref<1x128xf32, #tpu.memory_space<vmem>>, vector<1x128xf32>
    %c0_24 = arith.constant 0 : index
    %c0_25 = arith.constant 0 : index
    %12 = vector.load %arg13[%c0_24, %c0_25] : memref<1x128xf32, #tpu.memory_space<vmem>>, vector<1x128xf32>
    %c0_26 = arith.constant 0 : index
    %c0_27 = arith.constant 0 : index
    %13 = vector.load %arg14[%c0_26, %c0_27] : memref<1x128xf32, #tpu.memory_space<vmem>>, vector<1x128xf32>
    %cst = arith.constant 11.3137083 : f32
    %14 = vector.broadcast %cst : f32 to vector<1x8x128xf32>
    %15 = arith.mulf %0, %14 : vector<1x8x128xf32>
    %16 = vector.shape_cast %1 : vector<8x128xf32> to vector<1x8x128xf32>
    %17 = arith.addf %15, %16 : vector<1x8x128xf32>
    %18 = vector.shape_cast %17 : vector<1x8x128xf32> to vector<8x128xf32>
    %19 = arith.truncf %18 : vector<8x128xf32> to vector<8x128xbf16>
    %cst_28 = arith.constant dense<0.000000e+00> : vector<8x384xf32>
    %20 = tpu.matmul %19, %2, %cst_28 {dimension_numbers = #tpu.dot_dimension_numbers<[1], [0], [0], [1], [0, 0, 1, 1], [], []>} : vector<8x128xbf16>, vector<128x384xbf16>, vector<8x384xf32> -> vector<8x384xf32>
    %21 = vector.broadcast %3 : vector<1x384xf32> to vector<8x384xf32>
    %22 = arith.addf %20, %21 : vector<8x384xf32>
    %23 = vector.shape_cast %22 : vector<8x384xf32> to vector<1x8x384xf32>
    %24 = vector.extract_strided_slice %23 {offsets = [0, 0, 0], sizes = [1, 8, 32], strides = [1, 1, 1]} : vector<1x8x384xf32> to vector<1x8x32xf32>
    %25 = arith.truncf %24 : vector<1x8x32xf32> to vector<1x8x32xbf16>
    %26 = vector.extract_strided_slice %23 {offsets = [0, 0, 128], sizes = [1, 8, 32], strides = [1, 1, 1]} : vector<1x8x384xf32> to vector<1x8x32xf32>
    %27 = arith.truncf %26 : vector<1x8x32xf32> to vector<1x8x32xbf16>
    %28 = vector.extract_strided_slice %23 {offsets = [0, 0, 256], sizes = [1, 8, 32], strides = [1, 1, 1]} : vector<1x8x384xf32> to vector<1x8x32xf32>
    %29 = arith.truncf %28 : vector<1x8x32xf32> to vector<1x8x32xbf16>
    "tpu.trace_start"() <{level = 10 : i32, message = "bqd,bkd->bqk"}> : () -> ()
    %cst_29 = arith.constant dense<0.000000e+00> : vector<1x8x8xf32>
    %30 = tpu.matmul %25, %27, %cst_29 {dimension_numbers = #tpu.dot_dimension_numbers<[2], [2], [1], [1], [0, 0, 0, 1, 1, 1], [0], [0]>} : vector<1x8x32xbf16>, vector<1x8x32xbf16>, vector<1x8x8xf32> -> vector<1x8x8xf32>
    "tpu.trace_stop"() : () -> ()
    %cst_30 = arith.constant dense<0xFF800000> : vector<1x8xf32>
    %31 = vector.multi_reduction <maximumf>, %30, %cst_30 [2] : vector<1x8x8xf32> to vector<1x8xf32>
    %32 = vector.shape_cast %31 : vector<1x8xf32> to vector<1x8x1xf32>
    %33 = vector.broadcast %32 : vector<1x8x1xf32> to vector<1x8x8xf32>
    %34 = arith.subf %30, %33 : vector<1x8x8xf32>
    %35 = math.exp %34 : vector<1x8x8xf32>
    %cst_31 = arith.constant dense<0.000000e+00> : vector<1x8xf32>
    %36 = vector.multi_reduction <add>, %35, %cst_31 [2] : vector<1x8x8xf32> to vector<1x8xf32>
    %37 = vector.shape_cast %36 : vector<1x8xf32> to vector<1x8x1xf32>
    %38 = tpu.reciprocal %37 {approx = true} : vector<1x8x1xf32> -> vector<1x8x1xf32>
    %39 = vector.broadcast %38 : vector<1x8x1xf32> to vector<1x8x8xf32>
    %40 = arith.mulf %35, %39 : vector<1x8x8xf32>
    %41 = arith.truncf %40 : vector<1x8x8xf32> to vector<1x8x8xbf16>
    "tpu.trace_start"() <{level = 10 : i32, message = "bqk,bkd->bqd"}> : () -> ()
    %cst_32 = arith.constant dense<0.000000e+00> : vector<1x8x32xf32>
    %42 = tpu.matmul %41, %29, %cst_32 {dimension_numbers = #tpu.dot_dimension_numbers<[2], [1], [1], [2], [0, 0, 0, 1, 1, 2], [0], [0]>} : vector<1x8x8xbf16>, vector<1x8x32xbf16>, vector<1x8x32xf32> -> vector<1x8x32xf32>
    "tpu.trace_stop"() : () -> ()
    %43 = vector.shape_cast %42 : vector<1x8x32xf32> to vector<8x32xf32>
    %44 = arith.truncf %43 : vector<8x32xf32> to vector<8x32xbf16>
    %45 = vector.extract_strided_slice %4 {offsets = [0, 0], sizes = [32, 128], strides = [1, 1]} : vector<128x128xbf16> to vector<32x128xbf16>
    %cst_33 = arith.constant dense<0.000000e+00> : vector<8x128xf32>
    %46 = tpu.matmul %44, %45, %cst_33 {dimension_numbers = #tpu.dot_dimension_numbers<[1], [0], [0], [1], [0, 0, 1, 1], [], []>} : vector<8x32xbf16>, vector<32x128xbf16>, vector<8x128xf32> -> vector<8x128xf32>
    %47 = vector.extract_strided_slice %23 {offsets = [0, 0, 32], sizes = [1, 8, 32], strides = [1, 1, 1]} : vector<1x8x384xf32> to vector<1x8x32xf32>
    %48 = arith.truncf %47 : vector<1x8x32xf32> to vector<1x8x32xbf16>
    %49 = vector.extract_strided_slice %23 {offsets = [0, 0, 160], sizes = [1, 8, 32], strides = [1, 1, 1]} : vector<1x8x384xf32> to vector<1x8x32xf32>
    %50 = arith.truncf %49 : vector<1x8x32xf32> to vector<1x8x32xbf16>
    %51 = vector.extract_strided_slice %23 {offsets = [0, 0, 288], sizes = [1, 8, 32], strides = [1, 1, 1]} : vector<1x8x384xf32> to vector<1x8x32xf32>
    %52 = arith.truncf %51 : vector<1x8x32xf32> to vector<1x8x32xbf16>
    "tpu.trace_start"() <{level = 10 : i32, message = "bqd,bkd->bqk"}> : () -> ()
    %cst_34 = arith.constant dense<0.000000e+00> : vector<1x8x8xf32>
    %53 = tpu.matmul %48, %50, %cst_34 {dimension_numbers = #tpu.dot_dimension_numbers<[2], [2], [1], [1], [0, 0, 0, 1, 1, 1], [0], [0]>} : vector<1x8x32xbf16>, vector<1x8x32xbf16>, vector<1x8x8xf32> -> vector<1x8x8xf32>
    "tpu.trace_stop"() : () -> ()
    %cst_35 = arith.constant dense<0xFF800000> : vector<1x8xf32>
    %54 = vector.multi_reduction <maximumf>, %53, %cst_35 [2] : vector<1x8x8xf32> to vector<1x8xf32>
    %55 = vector.shape_cast %54 : vector<1x8xf32> to vector<1x8x1xf32>
    %56 = vector.broadcast %55 : vector<1x8x1xf32> to vector<1x8x8xf32>
    %57 = arith.subf %53, %56 : vector<1x8x8xf32>
    %58 = math.exp %57 : vector<1x8x8xf32>
    %cst_36 = arith.constant dense<0.000000e+00> : vector<1x8xf32>
    %59 = vector.multi_reduction <add>, %58, %cst_36 [2] : vector<1x8x8xf32> to vector<1x8xf32>
    %60 = vector.shape_cast %59 : vector<1x8xf32> to vector<1x8x1xf32>
    %61 = tpu.reciprocal %60 {approx = true} : vector<1x8x1xf32> -> vector<1x8x1xf32>
    %62 = vector.broadcast %61 : vector<1x8x1xf32> to vector<1x8x8xf32>
    %63 = arith.mulf %58, %62 : vector<1x8x8xf32>
    %64 = arith.truncf %63 : vector<1x8x8xf32> to vector<1x8x8xbf16>
    "tpu.trace_start"() <{level = 10 : i32, message = "bqk,bkd->bqd"}> : () -> ()
    %cst_37 = arith.constant dense<0.000000e+00> : vector<1x8x32xf32>
    %65 = tpu.matmul %64, %52, %cst_37 {dimension_numbers = #tpu.dot_dimension_numbers<[2], [1], [1], [2], [0, 0, 0, 1, 1, 2], [0], [0]>} : vector<1x8x8xbf16>, vector<1x8x32xbf16>, vector<1x8x32xf32> -> vector<1x8x32xf32>
    "tpu.trace_stop"() : () -> ()
    %66 = vector.shape_cast %65 : vector<1x8x32xf32> to vector<8x32xf32>
    %67 = arith.truncf %66 : vector<8x32xf32> to vector<8x32xbf16>
    %68 = vector.extract_strided_slice %4 {offsets = [32, 0], sizes = [32, 128], strides = [1, 1]} : vector<128x128xbf16> to vector<32x128xbf16>
    %cst_38 = arith.constant dense<0.000000e+00> : vector<8x128xf32>
    %69 = tpu.matmul %67, %68, %cst_38 {dimension_numbers = #tpu.dot_dimension_numbers<[1], [0], [0], [1], [0, 0, 1, 1], [], []>} : vector<8x32xbf16>, vector<32x128xbf16>, vector<8x128xf32> -> vector<8x128xf32>
    %70 = arith.addf %46, %69 : vector<8x128xf32>
    %71 = vector.extract_strided_slice %23 {offsets = [0, 0, 64], sizes = [1, 8, 32], strides = [1, 1, 1]} : vector<1x8x384xf32> to vector<1x8x32xf32>
    %72 = arith.truncf %71 : vector<1x8x32xf32> to vector<1x8x32xbf16>
    %73 = vector.extract_strided_slice %23 {offsets = [0, 0, 192], sizes = [1, 8, 32], strides = [1, 1, 1]} : vector<1x8x384xf32> to vector<1x8x32xf32>
    %74 = arith.truncf %73 : vector<1x8x32xf32> to vector<1x8x32xbf16>
    %75 = vector.extract_strided_slice %23 {offsets = [0, 0, 320], sizes = [1, 8, 32], strides = [1, 1, 1]} : vector<1x8x384xf32> to vector<1x8x32xf32>
    %76 = arith.truncf %75 : vector<1x8x32xf32> to vector<1x8x32xbf16>
    "tpu.trace_start"() <{level = 10 : i32, message = "bqd,bkd->bqk"}> : () -> ()
    %cst_39 = arith.constant dense<0.000000e+00> : vector<1x8x8xf32>
    %77 = tpu.matmul %72, %74, %cst_39 {dimension_numbers = #tpu.dot_dimension_numbers<[2], [2], [1], [1], [0, 0, 0, 1, 1, 1], [0], [0]>} : vector<1x8x32xbf16>, vector<1x8x32xbf16>, vector<1x8x8xf32> -> vector<1x8x8xf32>
    "tpu.trace_stop"() : () -> ()
    %cst_40 = arith.constant dense<0xFF800000> : vector<1x8xf32>
    %78 = vector.multi_reduction <maximumf>, %77, %cst_40 [2] : vector<1x8x8xf32> to vector<1x8xf32>
    %79 = vector.shape_cast %78 : vector<1x8xf32> to vector<1x8x1xf32>
    %80 = vector.broadcast %79 : vector<1x8x1xf32> to vector<1x8x8xf32>
    %81 = arith.subf %77, %80 : vector<1x8x8xf32>
    %82 = math.exp %81 : vector<1x8x8xf32>
    %cst_41 = arith.constant dense<0.000000e+00> : vector<1x8xf32>
    %83 = vector.multi_reduction <add>, %82, %cst_41 [2] : vector<1x8x8xf32> to vector<1x8xf32>
    %84 = vector.shape_cast %83 : vector<1x8xf32> to vector<1x8x1xf32>
    %85 = tpu.reciprocal %84 {approx = true} : vector<1x8x1xf32> -> vector<1x8x1xf32>
    %86 = vector.broadcast %85 : vector<1x8x1xf32> to vector<1x8x8xf32>
    %87 = arith.mulf %82, %86 : vector<1x8x8xf32>
    %88 = arith.truncf %87 : vector<1x8x8xf32> to vector<1x8x8xbf16>
    "tpu.trace_start"() <{level = 10 : i32, message = "bqk,bkd->bqd"}> : () -> ()
    %cst_42 = arith.constant dense<0.000000e+00> : vector<1x8x32xf32>
    %89 = tpu.matmul %88, %76, %cst_42 {dimension_numbers = #tpu.dot_dimension_numbers<[2], [1], [1], [2], [0, 0, 0, 1, 1, 2], [0], [0]>} : vector<1x8x8xbf16>, vector<1x8x32xbf16>, vector<1x8x32xf32> -> vector<1x8x32xf32>
    "tpu.trace_stop"() : () -> ()
    %90 = vector.shape_cast %89 : vector<1x8x32xf32> to vector<8x32xf32>
    %91 = arith.truncf %90 : vector<8x32xf32> to vector<8x32xbf16>
    %92 = vector.extract_strided_slice %4 {offsets = [64, 0], sizes = [32, 128], strides = [1, 1]} : vector<128x128xbf16> to vector<32x128xbf16>
    %cst_43 = arith.constant dense<0.000000e+00> : vector<8x128xf32>
    %93 = tpu.matmul %91, %92, %cst_43 {dimension_numbers = #tpu.dot_dimension_numbers<[1], [0], [0], [1], [0, 0, 1, 1], [], []>} : vector<8x32xbf16>, vector<32x128xbf16>, vector<8x128xf32> -> vector<8x128xf32>
    %94 = arith.addf %70, %93 : vector<8x128xf32>
    %95 = vector.extract_strided_slice %23 {offsets = [0, 0, 96], sizes = [1, 8, 32], strides = [1, 1, 1]} : vector<1x8x384xf32> to vector<1x8x32xf32>
    %96 = arith.truncf %95 : vector<1x8x32xf32> to vector<1x8x32xbf16>
    %97 = vector.extract_strided_slice %23 {offsets = [0, 0, 224], sizes = [1, 8, 32], strides = [1, 1, 1]} : vector<1x8x384xf32> to vector<1x8x32xf32>
    %98 = arith.truncf %97 : vector<1x8x32xf32> to vector<1x8x32xbf16>
    %99 = vector.extract_strided_slice %23 {offsets = [0, 0, 352], sizes = [1, 8, 32], strides = [1, 1, 1]} : vector<1x8x384xf32> to vector<1x8x32xf32>
    %100 = arith.truncf %99 : vector<1x8x32xf32> to vector<1x8x32xbf16>
    "tpu.trace_start"() <{level = 10 : i32, message = "bqd,bkd->bqk"}> : () -> ()
    %cst_44 = arith.constant dense<0.000000e+00> : vector<1x8x8xf32>
    %101 = tpu.matmul %96, %98, %cst_44 {dimension_numbers = #tpu.dot_dimension_numbers<[2], [2], [1], [1], [0, 0, 0, 1, 1, 1], [0], [0]>} : vector<1x8x32xbf16>, vector<1x8x32xbf16>, vector<1x8x8xf32> -> vector<1x8x8xf32>
    "tpu.trace_stop"() : () -> ()
    %cst_45 = arith.constant dense<0xFF800000> : vector<1x8xf32>
    %102 = vector.multi_reduction <maximumf>, %101, %cst_45 [2] : vector<1x8x8xf32> to vector<1x8xf32>
    %103 = vector.shape_cast %102 : vector<1x8xf32> to vector<1x8x1xf32>
    %104 = vector.broadcast %103 : vector<1x8x1xf32> to vector<1x8x8xf32>
    %105 = arith.subf %101, %104 : vector<1x8x8xf32>
    %106 = math.exp %105 : vector<1x8x8xf32>
    %cst_46 = arith.constant dense<0.000000e+00> : vector<1x8xf32>
    %107 = vector.multi_reduction <add>, %106, %cst_46 [2] : vector<1x8x8xf32> to vector<1x8xf32>
    %108 = vector.shape_cast %107 : vector<1x8xf32> to vector<1x8x1xf32>
    %109 = tpu.reciprocal %108 {approx = true} : vector<1x8x1xf32> -> vector<1x8x1xf32>
    %110 = vector.broadcast %109 : vector<1x8x1xf32> to vector<1x8x8xf32>
    %111 = arith.mulf %106, %110 : vector<1x8x8xf32>
    %112 = arith.truncf %111 : vector<1x8x8xf32> to vector<1x8x8xbf16>
    "tpu.trace_start"() <{level = 10 : i32, message = "bqk,bkd->bqd"}> : () -> ()
    %cst_47 = arith.constant dense<0.000000e+00> : vector<1x8x32xf32>
    %113 = tpu.matmul %112, %100, %cst_47 {dimension_numbers = #tpu.dot_dimension_numbers<[2], [1], [1], [2], [0, 0, 0, 1, 1, 2], [0], [0]>} : vector<1x8x8xbf16>, vector<1x8x32xbf16>, vector<1x8x32xf32> -> vector<1x8x32xf32>
    "tpu.trace_stop"() : () -> ()
    %114 = vector.shape_cast %113 : vector<1x8x32xf32> to vector<8x32xf32>
    %115 = arith.truncf %114 : vector<8x32xf32> to vector<8x32xbf16>
    %116 = vector.extract_strided_slice %4 {offsets = [96, 0], sizes = [32, 128], strides = [1, 1]} : vector<128x128xbf16> to vector<32x128xbf16>
    %cst_48 = arith.constant dense<0.000000e+00> : vector<8x128xf32>
    %117 = tpu.matmul %115, %116, %cst_48 {dimension_numbers = #tpu.dot_dimension_numbers<[1], [0], [0], [1], [0, 0, 1, 1], [], []>} : vector<8x32xbf16>, vector<32x128xbf16>, vector<8x128xf32> -> vector<8x128xf32>
    %118 = arith.addf %94, %117 : vector<8x128xf32>
    %119 = arith.addf %18, %118 : vector<8x128xf32>
    %120 = vector.broadcast %5 : vector<1x128xf32> to vector<8x128xf32>
    %121 = arith.addf %119, %120 : vector<8x128xf32>
    %cst_49 = arith.constant dense<0.000000e+00> : vector<8xf32>
    %122 = vector.multi_reduction <add>, %121, %cst_49 [1] : vector<8x128xf32> to vector<8xf32>
    %123 = vector.shape_cast %122 : vector<8xf32> to vector<8x1xf32>
    %cst_50 = arith.constant 1.280000e+02 : f32
    %124 = vector.broadcast %cst_50 : f32 to vector<8x1xf32>
    %125 = arith.divf %123, %124 : vector<8x1xf32>
    %126 = vector.broadcast %125 : vector<8x1xf32> to vector<8x128xf32>
    %127 = arith.subf %121, %126 : vector<8x128xf32>
    %128 = arith.mulf %127, %127 : vector<8x128xf32>
    %cst_51 = arith.constant dense<0.000000e+00> : vector<8xf32>
    %129 = vector.multi_reduction <add>, %128, %cst_51 [1] : vector<8x128xf32> to vector<8xf32>
    %130 = vector.shape_cast %129 : vector<8xf32> to vector<8x1xf32>
    %cst_52 = arith.constant 1.280000e+02 : f32
    %131 = vector.broadcast %cst_52 : f32 to vector<8x1xf32>
    %132 = arith.divf %130, %131 : vector<8x1xf32>
    %133 = vector.broadcast %125 : vector<8x1xf32> to vector<8x128xf32>
    %134 = arith.subf %121, %133 : vector<8x128xf32>
    %cst_53 = arith.constant 9.99999974E-6 : f32
    %135 = vector.broadcast %cst_53 : f32 to vector<8x1xf32>
    %136 = arith.addf %132, %135 : vector<8x1xf32>
    %137 = math.rsqrt %136 : vector<8x1xf32>
    %138 = vector.broadcast %137 : vector<8x1xf32> to vector<8x128xf32>
    %139 = arith.mulf %134, %138 : vector<8x128xf32>
    %140 = vector.broadcast %6 : vector<1x128xf32> to vector<8x128xf32>
    %141 = arith.mulf %139, %140 : vector<8x128xf32>
    %142 = vector.broadcast %7 : vector<1x128xf32> to vector<8x128xf32>
    %143 = arith.addf %141, %142 : vector<8x128xf32>
    %144 = arith.truncf %143 : vector<8x128xf32> to vector<8x128xbf16>
    %cst_54 = arith.constant dense<0.000000e+00> : vector<8x256xf32>
    %145 = tpu.matmul %144, %8, %cst_54 {dimension_numbers = #tpu.dot_dimension_numbers<[1], [0], [0], [1], [0, 0, 1, 1], [], []>} : vector<8x128xbf16>, vector<128x256xbf16>, vector<8x256xf32> -> vector<8x256xf32>
    %146 = vector.broadcast %9 : vector<1x256xf32> to vector<8x256xf32>
    %147 = arith.addf %145, %146 : vector<8x256xf32>
    %cst_55 = arith.constant 0.000000e+00 : f32
    %148 = vector.broadcast %cst_55 : f32 to vector<8x256xf32>
    %149 = arith.maximumf %147, %148 : vector<8x256xf32>
    %150 = arith.truncf %149 : vector<8x256xf32> to vector<8x256xbf16>
    %cst_56 = arith.constant dense<0.000000e+00> : vector<8x128xf32>
    %151 = tpu.matmul %150, %10, %cst_56 {dimension_numbers = #tpu.dot_dimension_numbers<[1], [0], [0], [1], [0, 0, 1, 1], [], []>} : vector<8x256xbf16>, vector<256x128xbf16>, vector<8x128xf32> -> vector<8x128xf32>
    %152 = vector.broadcast %11 : vector<1x128xf32> to vector<8x128xf32>
    %153 = arith.addf %151, %152 : vector<8x128xf32>
    %154 = arith.addf %143, %153 : vector<8x128xf32>
    %cst_57 = arith.constant dense<0.000000e+00> : vector<8xf32>
    %155 = vector.multi_reduction <add>, %154, %cst_57 [1] : vector<8x128xf32> to vector<8xf32>
    %156 = vector.shape_cast %155 : vector<8xf32> to vector<8x1xf32>
    %cst_58 = arith.constant 1.280000e+02 : f32
    %157 = vector.broadcast %cst_58 : f32 to vector<8x1xf32>
    %158 = arith.divf %156, %157 : vector<8x1xf32>
    %159 = vector.broadcast %158 : vector<8x1xf32> to vector<8x128xf32>
    %160 = arith.subf %154, %159 : vector<8x128xf32>
    %161 = arith.mulf %160, %160 : vector<8x128xf32>
    %cst_59 = arith.constant dense<0.000000e+00> : vector<8xf32>
    %162 = vector.multi_reduction <add>, %161, %cst_59 [1] : vector<8x128xf32> to vector<8xf32>
    %163 = vector.shape_cast %162 : vector<8xf32> to vector<8x1xf32>
    %cst_60 = arith.constant 1.280000e+02 : f32
    %164 = vector.broadcast %cst_60 : f32 to vector<8x1xf32>
    %165 = arith.divf %163, %164 : vector<8x1xf32>
    %166 = vector.broadcast %158 : vector<8x1xf32> to vector<8x128xf32>
    %167 = arith.subf %154, %166 : vector<8x128xf32>
    %cst_61 = arith.constant 9.99999974E-6 : f32
    %168 = vector.broadcast %cst_61 : f32 to vector<8x1xf32>
    %169 = arith.addf %165, %168 : vector<8x1xf32>
    %170 = math.rsqrt %169 : vector<8x1xf32>
    %171 = vector.broadcast %170 : vector<8x1xf32> to vector<8x128xf32>
    %172 = arith.mulf %167, %171 : vector<8x128xf32>
    %173 = vector.broadcast %12 : vector<1x128xf32> to vector<8x128xf32>
    %174 = arith.mulf %172, %173 : vector<8x128xf32>
    %175 = vector.broadcast %13 : vector<1x128xf32> to vector<8x128xf32>
    %176 = arith.addf %174, %175 : vector<8x128xf32>
    %177 = vector.shape_cast %176 : vector<8x128xf32> to vector<1x8x128xf32>
    %c0_62 = arith.constant 0 : index
    %c0_63 = arith.constant 0 : index
    %c0_64 = arith.constant 0 : index
    %178 = vector.load %arg15[%c0_62, %c0_63, %c0_64] : memref<1x8x128xf32, #tpu.memory_space<vmem>>, vector<1x8x128xf32>
    tpu.vector_store %arg15[%c0_62, %c0_63, %c0_64], %177 {strides = array<i32>} : memref<1x8x128xf32, #tpu.memory_space<vmem>>, vector<1x8x128xf32>,
    return
  }
  func.func @transform_0(%arg0: i32) -> (i32, i32, i32) {
    %c0_i32 = arith.constant 0 : i32
    %c0_i32_0 = arith.constant 0 : i32
    %c0_i32_1 = arith.constant 0 : i32
    return %arg0, %c0_i32, %c0_i32_0 : i32, i32, i32
  }
  func.func @transform_1(%arg0: i32) -> (i32, i32) {
    %c0_i32 = arith.constant 0 : i32
    %c0_i32_0 = arith.constant 0 : i32
    %c0_i32_1 = arith.constant 0 : i32
    return %c0_i32, %c0_i32_0 : i32, i32
  }
  func.func @transform_2(%arg0: i32) -> (i32, i32) {
    %c0_i32 = arith.constant 0 : i32
    %c0_i32_0 = arith.constant 0 : i32
    %c0_i32_1 = arith.constant 0 : i32
    return %c0_i32, %c0_i32_0 : i32, i32
  }
  func.func @transform_3(%arg0: i32) -> (i32, i32) {
    %c0_i32 = arith.constant 0 : i32
    %c0_i32_0 = arith.constant 0 : i32
    %c0_i32_1 = arith.constant 0 : i32
    return %c0_i32, %c0_i32_0 : i32, i32
  }
  func.func @transform_4(%arg0: i32) -> (i32, i32) {
    %c0_i32 = arith.constant 0 : i32
    %c0_i32_0 = arith.constant 0 : i32
    %c0_i32_1 = arith.constant 0 : i32
    return %c0_i32, %c0_i32_0 : i32, i32
  }
  func.func @transform_5(%arg0: i32) -> (i32, i32) {
    %c0_i32 = arith.constant 0 : i32
    %c0_i32_0 = arith.constant 0 : i32
    %c0_i32_1 = arith.constant 0 : i32
    return %c0_i32, %c0_i32_0 : i32, i32
  }
  func.func @transform_6(%arg0: i32) -> (i32, i32) {
    %c0_i32 = arith.constant 0 : i32
    %c0_i32_0 = arith.constant 0 : i32
    %c0_i32_1 = arith.constant 0 : i32
    return %c0_i32, %c0_i32_0 : i32, i32
  }
  func.func @transform_7(%arg0: i32) -> (i32, i32) {
    %c0_i32 = arith.constant 0 : i32
    %c0_i32_0 = arith.constant 0 : i32
    %c0_i32_1 = arith.constant 0 : i32
    return %c0_i32, %c0_i32_0 : i32, i32
  }
  func.func @transform_8(%arg0: i32) -> (i32, i32) {
    %c0_i32 = arith.constant 0 : i32
    %c0_i32_0 = arith.constant 0 : i32
    %c0_i32_1 = arith.constant 0 : i32
    return %c0_i32, %c0_i32_0 : i32, i32
  }
  func.func @transform_9(%arg0: i32) -> (i32, i32) {
    %c0_i32 = arith.constant 0 : i32
    %c0_i32_0 = arith.constant 0 : i32
    %c0_i32_1 = arith.constant 0 : i32
    return %c0_i32, %c0_i32_0 : i32, i32
  }
  func.func @transform_10(%arg0: i32) -> (i32, i32) {
    %c0_i32 = arith.constant 0 : i32
    %c0_i32_0 = arith.constant 0 : i32
    %c0_i32_1 = arith.constant 0 : i32
    return %c0_i32, %c0_i32_0 : i32, i32
  }
  func.func @transform_11(%arg0: i32) -> (i32, i32) {
    %c0_i32 = arith.constant 0 : i32
    %c0_i32_0 = arith.constant 0 : i32
    %c0_i32_1 = arith.constant 0 : i32
    return %c0_i32, %c0_i32_0 : i32, i32
  }
  func.func @transform_12(%arg0: i32) -> (i32, i32) {
    %c0_i32 = arith.constant 0 : i32
    %c0_i32_0 = arith.constant 0 : i32
    %c0_i32_1 = arith.constant 0 : i32
    return %c0_i32, %c0_i32_0 : i32, i32
  }
  func.func @transform_13(%arg0: i32) -> (i32, i32) {
    %c0_i32 = arith.constant 0 : i32
    %c0_i32_0 = arith.constant 0 : i32
    %c0_i32_1 = arith.constant 0 : i32
    return %c0_i32, %c0_i32_0 : i32, i32
  }
  func.func @transform_14(%arg0: i32) -> (i32, i32, i32) {
    %c0_i32 = arith.constant 0 : i32
    %c0_i32_0 = arith.constant 0 : i32
    %c0_i32_1 = arith.constant 0 : i32
    return %arg0, %c0_i32, %c0_i32_0 : i32, i32, i32
  }
}

</mosaic_0001>

<bundles_post_ra>
// kernel: transformer_forward.5
= control target key start
LH: loop header
LB: loop body
LE: loop exit
PB: predicated region body
PF: predicated region fallthrough
CT: control target
= control target key end

     0   :  { %s369_s0 = inlined_call_operand.vmem [shape: f32[2,8,128], index: 0, kind: input, shape index: {}]   ;;  %s370_s1 = inlined_call_operand.hbm [shape: f32[1,128], index: 1, kind: input, shape index: {}]   ;;  %s371_s2 = inlined_call_operand.<no memory space> [shape: f32[1,1], index: 2, kind: input, shape index: {}]   ;;  %s372_s3 = inlined_call_operand.vmem [shape: f32[8,1], index: 3, kind: output, shape index: {}]  }
   0x1   :  { %v8_v0 = vstv %s371_s2 }
   0x2   :  { %9 = vst [vmem:[#allocation3] sm:$0x1] %v8_v0 }
   0x3   :  { %10 = vsyncpa [#allocation5], 0  ;;  %s340_s14 = smov 0  }
   0x4 LB: > { %s346_s15 = sadd.s32 4294967295, %s313_s14   ;;  %p241_p0 = scmp.ge.s32.totalorder %s313_s14, 1  ;;  %s313_s14 = sphi %s340_s14, %s16_s14  }
   0x5   : > { %p110_p1 = scmp.lt.s32.totalorder %s313_s14, 3  ;;  %p242_p2 = scmp.ne.s32.totalorder %s346_s15, 0 }
   0x6   : > { %s122_s17 = sshll.u32 %s370_s1, 4  ;;  %p259_p4 = scmp.eq.s32.totalorder %s346_s15, 0  ;;  %s123_s17 = int_to_ptr.hbm [resolvable:$true] %s122_s17 }
   0x7   : > { %p111_p3 = pnand %p241_p0, %p110_p1  ;;  %s315_s18 = smov [#allocation4]  }
   0x8   : > { %s124_s19 = sshll.u32 %s315_s18, 4  ;;  %s125_s19 = int_to_ptr.vmem [resolvable:$true] %s124_s19 }
   0x9   : > { %p255_p5 = pneg %p111_p3  ;;  %147 = sbr.rel (%p111_p3) target bundleno = 163 (0xa3), region = 32 }
   0xb   : > { %p256_p6 = pnand %p259_p4, %p255_p5 }
   0xd   : > { %258 = dma.hbm_to_vmem [thread:$0]  (!%p256_p6), %s123_s17, 16, %s125_s19, [#allocation5]  }
   0xe   : > { %308 = dma.done.wait (%p259_p4), [#allocation5], 16  }
   0xf   : > { %310 = vsyncadd (%p259_p4), [#allocation5], 4294967280  ;;  %p166_p7 = scmp.lt.s32.totalorder %s346_s15, 1 }
  0x10   : > { %173 = sbr.rel (%p242_p2) target bundleno = 23 (0x17), region = 40 }
  0x11   : > { %s167_s20 = scalar_select %p166_p7, %s346_s15, 1 }
  0x13   : > { %s246_s21 = sshll.u32 %s167_s20, 3 }
  0x14   : > { %s169_s24 = scalar_lea.vmem %s369_s0, %s246_s21 }
  0x15   : > { %v316_v1 = vmov 0.0  }
  0x16   : > { %174 = vst [vmem:[#allocation2] sm:$0xff] %v316_v1 }
  0x17 PF: > { %v176_v3 = vld [vmem:[%s169_s24] sm:$0xff]  ;;  %p248_p8 = scmp.ne.s32.totalorder %s346_s15, 1 }
  0x1c   : > { %183 = sbr.rel (%p248_p8) target bundleno = 163 (0xa3), region = 44 }
  0x1d   : > { %v175_v2 = vld [vmem:[#allocation2] sm:$0xff] }
  0x1e   : > { %v178_v4 = vadd.f32 %v176_v3, %v175_v2 }
  0x20   : > { %179 = vst [vmem:[#allocation2] sm:$0xff] %v178_v4 }
  0x21   : > { %v271_v6 = vld [vmem:[#allocation4] ss:$0 sm:$0xff]  ;;  %v272_v9 = vld [vmem:[#allocation3] ss:$0 sm:$0xff]  ;;  %vm198_vm0 = vcmask 7168  }
  0x27   : > { %v184_v5 = vld [vmem:[#allocation2] sm:$0xff] }
  0x28   : > { %v185_v7 = vmul.f32 0.5, %v184_v5 }
  0x2a   : > { %v190_v8 = vmul.f32 %v271_v6, %v185_v7 }
  0x2c   : > { %191 = vadd.xlane.f32.xlu0 %v190_v8 }
  0x9f   : > { %v192_v10 = vpop.xlane.xlu0 %191 }
  0xa0   : > { %v197_v11 = vadd.f32 %v272_v9, %v192_v10 }
  0xa2   : > { %199 = vst.msk [vmem:[%s372_s3] sm:$0xff] %vm198_vm0, %v197_v11 }
  0xa3 PF: > { %s16_s14 = sadd.s32 1, %s313_s14  }
  0xa4   : > { %p13_p9 = scmp.ge.s32.totalorder %s16_s14, 4  }
  0xa6   :  { %15 = sbr.rel (!%p13_p9) target bundleno = 4 (0x4), region = 71 }
  0xab   :  { %211 = vsyncpa [#allocation5], 1 }
  0xac   :  { %213 = vsyncpa [#allocation5 + $0x1], 1 }

// kernel: transformer_forward.4
= control target key start
LH: loop header
LB: loop body
LE: loop exit
PB: predicated region body
PF: predicated region fallthrough
CT: control target
= control target key end

     0   :  { %s2941_s0 = inlined_call_operand.vmem [shape: f32[2,8,128], index: 0, kind: input, shape index: {}]   ;;  %s2942_s1 = inlined_call_operand.hbm [shape: bf16[128,384], index: 1, kind: input, shape index: {}]   ;;  %s2943_s2 = inlined_call_operand.hbm [shape: f32[1,384], index: 2, kind: input, shape index: {}]   ;;  %s2944_s3 = inlined_call_operand.hbm [shape: bf16[128,128], index: 3, kind: input, shape index: {}]   ;;  %s2945_s4 = inlined_call_operand.hbm [shape: f32[1,128], index: 4, kind: input, shape index: {}]   ;;  %s2946_s5 = inlined_call_operand.hbm [shape: f32[1,128], index: 5, kind: input, shape index: {}]   ;;  %s2947_s6 = inlined_call_operand.hbm [shape: f32[1,128], index: 6, kind: input, shape index: {}]   ;;  %s2948_s7 = inlined_call_operand.hbm [shape: bf16[128,256], index: 7, kind: input, shape index: {}]   ;;  %s2949_s8 = inlined_call_operand.hbm [shape: f32[1,256], index: 8, kind: input, shape index: {}]   ;;  %s2950_s9 = inlined_call_operand.hbm [shape: bf16[256,128], index: 9, kind: input, shape index: {}]   ;;  %s2951_s10 = inlined_call_operand.hbm [shape: f32[1,128], index: 10, kind: input, shape index: {}]   ;;  %s2952_s11 = inlined_call_operand.hbm [shape: f32[1,128], index: 11, kind: input, shape index: {}]   ;;  %s2953_s12 = inlined_call_operand.hbm [shape: f32[1,128], index: 12, kind: input, shape index: {}]   ;;  %s2954_s13 = inlined_call_operand.vmem [shape: f32[2,8,128], index: 13, kind: output, shape index: {}]  }
   0x1   :  { %2955 = sst [smem:[#allocation28_spill]] %s2942_s1 }
   0x2   :  { %2956 = sst [smem:[#allocation29_spill]] %s2943_s2 }
   0x3   :  { %2957 = sst [smem:[#allocation30_spill]] %s2944_s3 }
   0x4   :  { %2958 = sst [smem:[#allocation31_spill]] %s2945_s4 }
   0x5   :  { %18 = vsyncpa [#allocation3], 0 }
   0x6   :  { %19 = vsyncpa [#allocation5], 0 }
   0x7   :  { %20 = vsyncpa [#allocation8], 0 }
   0x8   :  { %21 = vsyncpa [#allocation11], 0 }
   0x9   :  { %22 = vsyncpa [#allocation14], 0 }
   0xa   :  { %23 = vsyncpa [#allocation17], 0 }
   0xb   :  { %24 = vsyncpa [#allocation20], 0  ;;  %s2752_s25 = smov 0  }
   0xc LB: > { %s2959_s2 = sld [smem:[#allocation29_spill]]  ;;  %s2761_s29 = sadd.s32 4294967295, %s2658_s25   ;;  %s2658_s25 = sphi %s2752_s25, %s30_s25  }
   0xd   : > { %p1734_p0 = scmp.ge.s32.totalorder %s2658_s25, 1  ;;  %p339_p1 = scmp.lt.s32.totalorder %s2658_s25, 3 }
   0xe   : > { %p2182_p2 = scmp.eq.s32.totalorder %s2761_s29, 0  ;;  %s2660_s14 = smov [#allocation4]  }
   0xf   : > { %p2766_p3 = pnand %p1734_p0, %p339_p1  ;;  %s367_s15 = sshll.u32 %s2660_s14, 4  ;;  %s368_s15 = int_to_ptr.vmem [resolvable:$true] %s367_s15 }
  0x10   : > { %s2961_s4 = sld [smem:[#allocation31_spill]]  ;;  %s415_s21 = sshll.u32 %s2947_s6, 4  ;;  %s416_s21 = int_to_ptr.hbm [resolvable:$true] %s415_s21 }
  0x11   : > { %p2145_p4 = pneg %p2766_p3  ;;  %s2661_s23 = smov [#allocation7]  }
  0x12   : > { %s365_s28 = sshll.u32 %s2959_s2, 4  ;;  %s393_s24 = sshll.u32 %s2661_s23, 4  ;;  %s366_s28 = int_to_ptr.hbm [resolvable:$true] %s365_s28  ;;  %s394_s24 = int_to_ptr.vmem [resolvable:$true] %s393_s24 }
  0x13   : > { %p2780_p5 = pnand %p2182_p2, %p2145_p4  ;;  %s2662_s26 = smov [#allocation10]  }
  0x14   : > { %s417_s27 = sshll.u32 %s2662_s26, 4  ;;  %s441_s17 = sshll.u32 %s2949_s8, 4  ;;  %s418_s27 = int_to_ptr.vmem [resolvable:$true] %s417_s27  ;;  %s442_s17 = int_to_ptr.hbm [resolvable:$true] %s441_s17 }
  0x15   : > { %2151 = dma.hbm_to_vmem [thread:$0]  (!%p2780_p5), %s366_s28, 48, %s368_s15, [#allocation5]  }
  0x16   : > { %s391_s18 = sshll.u32 %s2961_s4, 4  ;;  %s467_s23 = sshll.u32 %s2951_s10, 4  ;;  %s392_s18 = int_to_ptr.hbm [resolvable:$true] %s391_s18  ;;  %s468_s23 = int_to_ptr.hbm [resolvable:$true] %s467_s23 }
  0x17   : > { %2157 = dma.hbm_to_vmem [thread:$0]  (!%p2780_p5), %s392_s18, 16, %s394_s24, [#allocation8]  }
  0x18   : > { %2163 = dma.hbm_to_vmem [thread:$0]  (!%p2780_p5), %s416_s21, 16, %s418_s27, [#allocation11]  }
  0x19   : > { %s2663_s2 = smov [#allocation13]   ;;  %s2664_s28 = smov [#allocation16]  }
  0x1a   : > { %s443_s4 = sshll.u32 %s2663_s2, 4  ;;  %s469_s15 = sshll.u32 %s2664_s28, 4  ;;  %s444_s4 = int_to_ptr.vmem [resolvable:$true] %s443_s4  ;;  %s470_s15 = int_to_ptr.vmem [resolvable:$true] %s469_s15 }
  0x1b   : > { %2169 = dma.hbm_to_vmem [thread:$0]  (!%p2780_p5), %s442_s17, 32, %s444_s4, [#allocation14]  }
  0x1c   : > { %s2963_s1 = sld [smem:[#allocation28_spill]]  ;;  %s2665_s21 = smov [#allocation2]  }
  0x1d   : > { %2175 = dma.hbm_to_vmem [thread:$0]  (!%p2780_p5), %s468_s23, 16, %s470_s15, [#allocation17]  }
  0x1e   : > { %s352_s27 = sshll.u32 %s2665_s21, 4  ;;  %s2964_s3 = sld [smem:[#allocation30_spill]]  ;;  %s353_s27 = int_to_ptr.vmem [resolvable:$true] %s352_s27 }
  0x1f   : > { %s2666_s19 = smov 192   ;;  %s2667_s4 = smov 12  }
  0x20   : > { %s2668_s17 = smov [#allocation6]   ;;  %s2669_s28 = smov 64  }
  0x21   : > { %s378_s20 = sshll.u32 %s2668_s17, 4  ;;  %s2670_s18 = smov 4   ;;  %s379_s20 = int_to_ptr.vmem [resolvable:$true] %s378_s20 }
  0x22   : > { %s350_s26 = sshll.u32 %s2963_s1, 4  ;;  %s403_s24 = sshll.u32 %s2946_s5, 4  ;;  %s351_s26 = int_to_ptr.hbm [resolvable:$true] %s350_s26  ;;  %s404_s24 = int_to_ptr.hbm [resolvable:$true] %s403_s24 }
  0x23   : > { %2148 = dma.hbm_to_vmem [thread:$0]  (!%p2780_p5), %s351_s26, 3072, %s353_s27, [#allocation3], %s2666_s19, %s2666_s19, %s2667_s4  }
  0x24   : > { %s376_s16 = sshll.u32 %s2964_s3, 4  ;;  %s2671_s21 = smov [#allocation9]   ;;  %s377_s16 = int_to_ptr.hbm [resolvable:$true] %s376_s16 }
  0x25   : > { %2154 = dma.hbm_to_vmem [thread:$0]  (!%p2780_p5), %s377_s16, 1024, %s379_s20, [#allocation5], %s2669_s28, %s2669_s28, %s2670_s18  }
  0x26   : > { %s405_s2 = sshll.u32 %s2671_s21, 4  ;;  %s426_s26 = sshll.u32 %s2948_s7, 4  ;;  %s406_s2 = int_to_ptr.vmem [resolvable:$true] %s405_s2  ;;  %s427_s26 = int_to_ptr.hbm [resolvable:$true] %s426_s26 }
  0x27   : > { %2160 = dma.hbm_to_vmem [thread:$0]  (!%p2780_p5), %s404_s24, 16, %s406_s2, [#allocation8]  }
  0x28   : > { %s2672_s27 = smov [#allocation12]   ;;  %s2673_s16 = smov 128  }
  0x29   : > { %s428_s19 = sshll.u32 %s2672_s27, 4  ;;  %s2674_s4 = smov 8   ;;  %s429_s19 = int_to_ptr.vmem [resolvable:$true] %s428_s19 }
  0x2a   : > { %2166 = dma.hbm_to_vmem [thread:$0]  (!%p2780_p5), %s427_s26, 2048, %s429_s19, [#allocation11], %s2673_s16, %s2673_s16, %s2674_s4  }
  0x2b   : > { %s452_s23 = sshll.u32 %s2950_s9, 4  ;;  %s2675_s1 = smov [#allocation15]   ;;  %s453_s23 = int_to_ptr.hbm [resolvable:$true] %s452_s23 }
  0x2c   : > { %s454_s15 = sshll.u32 %s2675_s1, 4  ;;  %s479_s2 = sshll.u32 %s2952_s11, 4  ;;  %s455_s15 = int_to_ptr.vmem [resolvable:$true] %s454_s15  ;;  %s480_s2 = int_to_ptr.hbm [resolvable:$true] %s479_s2 }
  0x2d   : > { %2172 = dma.hbm_to_vmem [thread:$0]  (!%p2780_p5), %s453_s23, 2048, %s455_s15, [#allocation14], %s2669_s28, %s2669_s28, %s2670_s18  }
  0x2e   : > { %s2676_s14 = smov [#allocation18]   ;;  %s491_s19 = sshll.u32 %s2953_s12, 4  ;;  %s492_s19 = int_to_ptr.hbm [resolvable:$true] %s491_s19 }
  0x2f   : > { %s481_s27 = sshll.u32 %s2676_s14, 4  ;;  %s2677_s16 = smov [#allocation19]   ;;  %s482_s27 = int_to_ptr.vmem [resolvable:$true] %s481_s27 }
  0x30   : > { %2178 = dma.hbm_to_vmem [thread:$0]  (!%p2780_p5), %s480_s2, 16, %s482_s27, [#allocation17]  }
  0x31   : > { %s493_s4 = sshll.u32 %s2677_s16, 4  ;;  %513 = sbr.rel (%p2766_p3) target bundleno = 2250 (0x8ca), region = 72  ;;  %s494_s4 = int_to_ptr.vmem [resolvable:$true] %s493_s4 }
  0x32   : > { %2181 = dma.hbm_to_vmem [thread:$0]  (!%p2780_p5), %s492_s19, 16, %s494_s4, [#allocation20]  }
  0x36   : > { %2629 = dma.done.wait (%p2182_p2), [#allocation3], 3072  }
  0x37   : > { %2631 = vsyncadd (%p2182_p2), [#allocation3], 4294964224 }
  0x38   : > { %2633 = dma.done.wait (%p2182_p2), [#allocation5], 1072  }
  0x39   : > { %2635 = vsyncadd (%p2182_p2), [#allocation5], 4294966224 }
  0x3a   : > { %2637 = dma.done.wait (%p2182_p2), [#allocation8], 32  }
  0x3b   : > { %2639 = vsyncadd (%p2182_p2), [#allocation8], 4294967264 }
  0x3c   : > { %2641 = dma.done.wait (%p2182_p2), [#allocation11], 2064  }
  0x3d   : > { %2643 = vsyncadd (%p2182_p2), [#allocation11], 4294965232 }
  0x3e   : > { %2645 = dma.done.wait (%p2182_p2), [#allocation14], 2080  }
  0x3f   : > { %2647 = vsyncadd (%p2182_p2), [#allocation14], 4294965216 }
  0x40   : > { %2649 = dma.done.wait (%p2182_p2), [#allocation17], 32  }
  0x41   : > { %2651 = vsyncadd (%p2182_p2), [#allocation17], 4294967264 }
  0x42   : > { %2653 = dma.done.wait (%p2182_p2), [#allocation20], 16  }
  0x43   : > { %2655 = vsyncadd (%p2182_p2), [#allocation20], 4294967280  ;;  %v1849_v0 = vld [vmem:[#allocation2 + $0xa8] sm:$0xf]  ;;  %v2055_v1 = vld [vmem:[#allocation2 + $0xb0] sm:$0xf0] }
  0x44   : > { %v2054_v2 = vld [vmem:[#allocation2 + $0xac] sm:$0xf]  ;;  %v1850_v3 = vor.u32 %v2055_v1, %v1849_v0  ;;  %v1851_v4 = vld [vmem:[#allocation2 + $0xb4] sm:$0xf0]  ;;  %v1837_v5 = vld [vmem:[#allocation2 + $0x90] sm:$0xf] }
  0x45   : > { %v2052_v6 = vld [vmem:[#allocation2 + $0x98] sm:$0xf0]  ;;  %v1854_v7 = vor.u32 %v2054_v2, %v1851_v4  ;;  %v2051_v8 = vld [vmem:[#allocation2 + $0x94] sm:$0xf]  ;;  %v1839_v9 = vld [vmem:[#allocation2 + $0x9c] sm:$0xf0] }
  0x46   : > { %861 = vmatpush.bf16.msra.mxu0 %v1850_v3  ;;  %v1838_v10 = vor.u32 %v2052_v6, %v1837_v5  ;;  %v1842_v11 = vor.u32 %v2051_v8, %v1839_v9  ;;  %v1825_v12 = vld [vmem:[#allocation2 + $0x78] sm:$0xf]  ;;  %v2049_v13 = vld [vmem:[#allocation2 + $0x80] sm:$0xf0]  ;;  %v2048_v14 = vld [vmem:[#allocation2 + $0x7c] sm:$0xf] }
  0x47   : > { %874 = vmatpush.bf16.msra.mxu1 %v1854_v7  ;;  %v1827_v15 = vld [vmem:[#allocation2 + $0x84] sm:$0xf0]  ;;  %v1826_v16 = vor.u32 %v2049_v13, %v1825_v12  ;;  %v1813_v18 = vld [vmem:[#allocation2 + $0x60] sm:$0xf]  ;;  %v2046_v19 = vld [vmem:[#allocation2 + $0x68] sm:$0xf0] }
  0x48   : > { %v1830_v17 = vor.u32 %v2048_v14, %v1827_v15  ;;  %v2045_v20 = vld [vmem:[#allocation2 + $0x64] sm:$0xf]  ;;  %v1815_v21 = vld [vmem:[#allocation2 + $0x6c] sm:$0xf0]  ;;  %p611_p6 = scmp.lt.s32.totalorder %s2761_s29, 1  ;;  %v1814_v22 = vor.u32 %v2046_v19, %v1813_v18  ;;  %vm903_vm0 = vcmask 261120  }
  0x49   : > { %v1857_v23 = vld [vmem:[#allocation2 + $0xb0] sm:$0xf]  ;;  %v2056_v24 = vld [vmem:[#allocation2 + $0xb8] sm:$0xf0]  ;;  %v1845_v25 = vld [vmem:[#allocation2 + $0x98] sm:$0xf]  ;;  %v1818_v26 = vor.u32 %v2045_v20, %v1815_v21 }
  0x4a   : > { %862 = vmatpush.bf16.msra.mxu0 %v1838_v10  ;;  %v1801_v27 = vld [vmem:[#allocation2 + $0x48] sm:$0xf]  ;;  %v2043_v28 = vld [vmem:[#allocation2 + $0x50] sm:$0xf0]  ;;  %v1858_v29 = vor.u32 %v2056_v24, %v1857_v23  ;;  %v2053_v30 = vld [vmem:[#allocation2 + $0xa0] sm:$0xf0] }
  0x4b   : > { %875 = vmatpush.bf16.msra.mxu1 %v1842_v11  ;;  %v2042_v31 = vld [vmem:[#allocation2 + $0x4c] sm:$0xf]  ;;  %v1803_v32 = vld [vmem:[#allocation2 + $0x54] sm:$0xf0]  ;;  %s2966_s29 = smov (!%p611_p6, %s2761_s29), 1  ;;  %v1846_v33 = vor.u32 %v2053_v30, %v1845_v25  ;;  %v1802_v34 = vor.u32 %v2043_v28, %v1801_v27  ;;  %s2678_s18 = smov 32  }
  0x4c   : > { %887 = vmatpush.bf16.msra.mxu2 %v1858_v29  ;;  %v1789_v35 = vld [vmem:[#allocation2 + $0x30] sm:$0xf]  ;;  %v1833_v36 = vld [vmem:[#allocation2 + $0x80] sm:$0xf]  ;;  %v2050_v37 = vld [vmem:[#allocation2 + $0x88] sm:$0xf0]  ;;  %v1806_v38 = vor.u32 %v2042_v31, %v1803_v32 }
  0x4d   : > { %v2040_v39 = vld [vmem:[#allocation2 + $0x38] sm:$0xf0]  ;;  %v2039_v40 = vld [vmem:[#allocation2 + $0x34] sm:$0xf]  ;;  %v1791_v41 = vld [vmem:[#allocation2 + $0x3c] sm:$0xf0]  ;;  %v1834_v42 = vor.u32 %v2050_v37, %v1833_v36 }
  0x4e   : > { %863 = vmatpush.bf16.msra.mxu0 %v1826_v16  ;;  %v1790_v43 = vor.u32 %v2040_v39, %v1789_v35  ;;  %v1821_v44 = vld [vmem:[#allocation2 + $0x68] sm:$0xf]  ;;  %v2047_v45 = vld [vmem:[#allocation2 + $0x70] sm:$0xf0]  ;;  %v1794_v46 = vor.u32 %v2039_v40, %v1791_v41  ;;  %v1777_v47 = vld [vmem:[#allocation2 + $0x18] sm:$0xf] }
  0x4f   : > { %876 = vmatpush.bf16.msra.mxu1 %v1830_v17  ;;  %v2037_v48 = vld [vmem:[#allocation2 + $0x20] sm:$0xf0]  ;;  %v2036_v49 = vld [vmem:[#allocation2 + $0x1c] sm:$0xf]  ;;  %v1779_v50 = vld [vmem:[#allocation2 + $0x24] sm:$0xf0]  ;;  %v1822_v51 = vor.u32 %v2047_v45, %v1821_v44 }
  0x50   : > { %888 = vmatpush.bf16.msra.mxu2 %v1846_v33  ;;  %s1761_s3 = sshll.u32 %s2966_s29, 3  ;;  %v1778_v52 = vor.u32 %v2037_v48, %v1777_v47  ;;  %v1809_v53 = vld [vmem:[#allocation2 + $0x50] sm:$0xf]  ;;  %v2044_v54 = vld [vmem:[#allocation2 + $0x58] sm:$0xf0]  ;;  %v1782_v55 = vor.u32 %v2036_v49, %v1779_v50  ;;  %s2679_s17 = smov 96  }
  0x51   : > { %v1765_v56 = vld [vmem:[#allocation2] sm:$0xf]  ;;  %v2034_v57 = vld [vmem:[#allocation2 + $0x8] sm:$0xf0]  ;;  %s614_s28 = scalar_lea.vmem %s2941_s0, %s1761_s3  ;;  %v2033_v58 = vld [vmem:[#allocation2 + $0x4] sm:$0xf]  ;;  %v1810_v60 = vor.u32 %v2044_v54, %v1809_v53  ;;  %s618_s15 = scalar_lea.vmem %s2954_s13, %s1761_s3 }
  0x52   : > { %864 = vmatpush.bf16.msra.mxu0 %v1814_v22  ;;  %v1767_v59 = vld [vmem:[#allocation2 + $0xc] sm:$0xf0]  ;;  %v1766_v61 = vor.u32 %v2034_v57, %v1765_v56  ;;  %v2877_v62 = vld [vmem:[%s614_s28] sm:$0xff]  ;;  %v1797_v63 = vld [vmem:[#allocation2 + $0x38] sm:$0xf]  ;;  %s2680_s20 = smov 64  }
  0x53   : > { %877 = vmatpush.bf16.msra.mxu1 %v1818_v26  ;;  %v2041_v0 = vld [vmem:[#allocation2 + $0x40] sm:$0xf0]  ;;  %v1770_v1 = vor.u32 %v2033_v58, %v1767_v59  ;;  %v725_v2 = vpack.c.bf16 %v2877_v62, %v2877_v62  ;;  %v1785_v4 = vld [vmem:[#allocation2 + $0x20] sm:$0xf]  ;;  %v2038_v5 = vld [vmem:[#allocation2 + $0x28] sm:$0xf0] }
  0x54   : > { %889 = vmatpush.bf16.msra.mxu2 %v1834_v42  ;;  %v1798_v3 = vor.u32 %v2041_v0, %v1797_v63  ;;  %v1786_v6 = vor.u32 %v2038_v5, %v1785_v4  ;;  %v1773_v7 = vld [vmem:[#allocation2 + $0x8] sm:$0xf]  ;;  %v2035_v8 = vld [vmem:[#allocation2 + $0x10] sm:$0xf0]  ;;  %v2058_v10 = vld [vmem:[#allocation6 + $0x8] sm:$0xff]  ;;  %vm939_vm1 = vcmask 1043456  }
  0x55   : > { %v1774_v9 = vor.u32 %v2035_v8, %v1773_v7  ;;  %v653_v11 = vld [vmem:[#allocation4] sm:$0x7]  ;;  %v2057_v27 = vld [vmem:[#allocation6] sm:$0xff]  ;;  %vm923_vm2 = vcmask 64512  }
  0x56   : > { %865 = vmatpush.bf16.msra.mxu0 %v1802_v34  ;;  %v727_v12 = vperm.slane %v653_v11, 0  ;;  %v728_v13 = vperm.slane %v653_v11, 1  ;;  %v729_v29 = vperm.slane %v653_v11, 2 }
  0x57   : > { %878 = vmatpush.bf16.msra.mxu1 %v1806_v38 }
  0x58   : > { %890 = vmatpush.bf16.msra.mxu2 %v1822_v51 }
  0x5a   : > { %866 = vmatpush.bf16.msra.mxu0 %v1790_v43 }
  0x5b   : > { %879 = vmatpush.bf16.msra.mxu1 %v1794_v46 }
  0x5c   : > { %891 = vmatpush.bf16.msra.mxu2 %v1810_v60 }
  0x5e   : > { %867 = vmatpush.bf16.msra.mxu0 %v1778_v52 }
  0x5f   : > { %880 = vmatpush.bf16.msra.mxu1 %v1782_v55 }
  0x60   : > { %892 = vmatpush.bf16.msra.mxu2 %v1798_v3 }
  0x62   : > { %868 = vmatpush.bf16.msra.mxu0 %v1766_v61 }
  0x63   : > { %881 = vmatpush.bf16.msra.mxu1 %v1770_v1 }
  0x64   : > { %893 = vmatpush.bf16.msra.mxu2 %v1786_v6 }
  0x65   : > { %869 = vmatmul.bf16.vlgmr.msra.gmra.mxu0 %v725_v2 }
  0x66   : > { %882 = vmatmul.bf16.vlgmr.msra.gmra.mxu1 %v725_v2 }
  0x68   : > { %894 = vmatpush.bf16.msra.mxu2 %v1774_v9 }
  0x6b   : > { %895 = vmatmul.bf16.vlgmr.msra.gmra.mxu2 %v725_v2 }
  0x6c   : > { %1072 = vmatpush.bf16.msrb.mxu2 %v2058_v10 }
  0x70   : > { %1073 = vmatpush.bf16.msrb.mxu2 %v2057_v27 }
  0xe2   : > { %v870_v14 = vpop.f32.mrf.mxu0 }
  0xe3   : > { %v883_v15 = vpop.f32.mrf.mxu1  ;;  %v871_v16 = vadd.f32 %v870_v14, %v727_v12 }
  0xe4   : > { %v884_v17 = vadd.f32 %v883_v15, %v728_v13 }
  0xe5   : > { %v900_v19 = vpack.c.bf16 %v871_v16, %v871_v16 }
  0xe6   : > { %v901_v18 = vpack.c.bf16 %v884_v17, %v884_v17 }
  0xe7   : > { %v958_v25 = vunpack.c.l.b16 %v900_v19 }
  0xe8   : > { %v963_v20 = vunpack.c.l.b16 %v901_v18  ;;  %v908_v21 = vsel %vm903_vm0, %v901_v18, 0 }
  0xe9   : > { %917 = vmatpush.bf16.xpose.msra.mxu3 %v908_v21  ;;  %v959_v26 = vpack.c.b16 %v958_v25, %v958_v25 }
  0xea   : > { %v964_v22 = vpack.c.b16 %v963_v20, %v963_v20  ;;  %v872_v23 = vpop.f32.mrf.mxu0 }
  0xeb   : > { %v885_v24 = vpop.f32.mrf.mxu1 }
  0xec   : > { %1167 = vrot.lane.b32.xlu2 %v964_v22, %s2678_s18  ;;  %965 = vrot.lane.b32.xlu1 %v964_v22, %s2679_s17 }
  0xee   : > { %v896_v28 = vpop.f32.mrf.mxu2 }
  0xef   : > { %v897_v30 = vadd.f32 %v896_v28, %v729_v29  ;;  %v2060_v29 = vld [vmem:[#allocation6 + $0x18] sm:$0xff] }
  0xf0   : > { %1859 = vmatmul.msk.bf16.vlgmr.msra.gmra.mxu3 %vm903_vm0, %v900_v19  ;;  %1044 = vmatpush.bf16.msrb.mxu1 %v2060_v29  ;;  %v2075_v29 = vld [vmem:[#allocation12 + $0x54] sm:$0xf] }
  0xf1   : > { %v902_v32 = vpack.c.bf16 %v897_v30, %v897_v30 }
  0xf3   : > { %v941_v33 = vsel %vm939_vm1, %v902_v32, 0  ;;  %v999_v1 = vunpack.c.l.b16 %v902_v32  ;;  %v2059_v32 = vld [vmem:[#allocation6 + $0x10] sm:$0xff] }
  0xf4   : > { %1081 = vrot.lane.b32.xlu2 %v964_v22, %s2680_s20  ;;  %960 = vrot.lane.b32.xlu1 %v959_v26, %s2679_s17 }
  0xf5   : > { %950 = vmatpush.bf16.msrb.mxu3 %v941_v33  ;;  %v1000_v2 = vpack.c.b16 %v999_v1, %v999_v1  ;;  %1045 = vmatpush.bf16.msrb.mxu1 %v2059_v32  ;;  %v2236_v1 = vld [vmem:[#allocation7] ss:$0 sm:$0xff] }
  0xf6   : > { %v898_v31 = vpop.f32.mrf.mxu2 }
  0xfc   : > { %1079 = vrot.lane.b32.xlu1 %v959_v26, %s2680_s20 }
 0x146   : > { %v1168_v34 = vpop.permute.xlu2 %1167 }
 0x147   : > { %v1173_v35 = vsel %vm903_vm0, %v1168_v34, 0 }
 0x148   : > { %1182 = vmatpush.bf16.xpose.msra.mxu2 %v1173_v35 }
 0x14e   : > { %v1082_v49 = vpop.permute.xlu2 %1081 }
 0x14f   : > { %v1087_v51 = vsel %vm903_vm0, %v1082_v49, 0  ;;  %v2061_v49 = vld [vmem:[#allocation6 + $0x20] sm:$0xff] }
 0x15e   : > { %v966_v36 = vpop.permute.xlu1 %965 }
 0x15f   : > { %v971_v37 = vsel %vm903_vm0, %v966_v36, 0 }
 0x160   : > { %980 = vmatpush.bf16.xpose.msra.mxu3 %v971_v37 }
 0x166   : > { %v961_v52 = vpop.permute.xlu1 %960 }
 0x16e   : > { %v1080_v53 = vpop.permute.xlu1 %1079 }
 0x173   : > { %v919_v38 = vpop.f32.mrf.mxu3 }
 0x174   : > { %v924_v39 = vsel %vm923_vm2, %v919_v38, -inf }
 0x175   : > { %925 = vmax.xlane.f32.xlu0 %v924_v39 }
 0x17b   : > { %v921_v40 = vpop.f32.mrf.mxu3 }
 0x1e8   : > { %v926_v41 = vpop.xlane.xlu0 %925 }
 0x1e9   : > { %v927_v42 = vsub.f32 %v919_v38, %v926_v41 }
 0x1eb   : > { %v928_v43 = vmul.f32 1.442695, %v927_v42 }
 0x1ed   : > { %2242 = vpow2.f32 %v928_v43 }
 0x1f3   : > { %v2243_v44 = vpop.eup %2242 }
 0x1f4   : > { %v930_v45 = vsel %vm923_vm2, %v2243_v44, 0.0 }
 0x1f5   : > { %931 = vadd.xlane.f32.xlu0 %v930_v45 }
 0x209   : > { %1165 = vrot.lane.b32.xlu0 %v959_v26, %s2678_s18 }
 0x268   : > { %v932_v46 = vpop.xlane.xlu0 %931 }
 0x269   : > { %2244 = vrcp.f32 %v932_v46  ;;  %v2064_v46 = vld [vmem:[#allocation6 + $0x38] sm:$0xff] }
 0x26f   : > { %v2245_v47 = vpop.eup %2244 }
 0x270   : > { %v934_v48 = vmul.f32 %v2245_v47, %v2243_v44  ;;  %v2063_v47 = vld [vmem:[#allocation6 + $0x30] sm:$0xff] }
 0x272   : > { %v935_v50 = vpack.c.bf16 %v934_v48, %v934_v48  ;;  %v2062_v48 = vld [vmem:[#allocation6 + $0x28] sm:$0xff] }
 0x273   : > { %1157 = vmatpush.bf16.msra.mxu1 %v2062_v48 }
 0x274   : > { %1860 = vmatmul.msk.bf16.vlgmr.msrb.gmra.mxu3 %vm923_vm2, %v935_v50 }
 0x275   : > { %1096 = vmatpush.bf16.xpose.msrb.mxu3 %v1087_v51 }
 0x277   : > { %1158 = vmatpush.bf16.msra.mxu1 %v2061_v49  ;;  %v1923_v49 = vld [vmem:[#allocation12 + $0x28] sm:$0xf0] }
 0x27b   : > { %v1166_v59 = vpop.permute.xlu0 %1165 }
 0x284   : > { %1861 = vmatmul.msk.bf16.vlgmr.msra.gmra.mxu3 %vm903_vm0, %v961_v52 }
 0x294   : > { %1881 = vmatmul.msk.bf16.vlgmr.msrb.gmra.mxu3 %vm903_vm0, %v1080_v53 }
 0x2f7   : > { %v952_v54 = vpop.f32.mrf.mxu3 }
 0x2f8   : > { %v956_v55 = vpack.c.bf16 %v952_v54, %v952_v54 }
 0x2fa   : > { %1880 = vmatmul.msk.bf16.vlgmr.msrb.gmra.mxu2 %vm903_vm0, %v956_v55 }
 0x2ff   : > { %v954_v56 = vpop.f32.mrf.mxu3 }
 0x307   : > { %v982_v57 = vpop.f32.mrf.mxu3 }
 0x308   : > { %v986_v58 = vsel %vm923_vm2, %v982_v57, -inf }
 0x309   : > { %987 = vmax.xlane.f32.xlu2 %v986_v58 }
 0x30a   : > { %1892 = vmatmul.msk.bf16.vlgmr.msra.gmra.mxu2 %vm903_vm0, %v1166_v59 }
 0x30f   : > { %v984_v60 = vpop.f32.mrf.mxu3 }
 0x317   : > { %v1098_v61 = vpop.f32.mrf.mxu3 }
 0x318   : > { %v1102_v63 = vsel %vm923_vm2, %v1098_v61, -inf }
 0x319   : > { %1103 = vmax.xlane.f32.xlu0 %v1102_v63 }
 0x31f   : > { %v1100_v0 = vpop.f32.mrf.mxu3 }
 0x32d   : > { %1200 = vrot.lane.b32.xlu0 %v1000_v2, %s2678_s18 }
 0x37c   : > { %v988_v3 = vpop.xlane.xlu2 %987 }
 0x37d   : > { %v989_v4 = vsub.f32 %v982_v57, %v988_v3  ;;  %v2903_v5 = vpop.f32.mrf.mxu2 }
 0x37f   : > { %v990_v6 = vmul.f32 1.442695, %v989_v4 }
 0x381   : > { %2246 = vpow2.f32 %v990_v6  ;;  %v2681_v6 = vmov 128.0  }
 0x385   : > { %v1077_v7 = vpop.f32.mrf.mxu2 }
 0x386   : > { %v1961_v7 = vld [vmem:[#allocation12 + $0x70] sm:$0xf] }
 0x387   : > { %v2247_v8 = vpop.eup %2246 }
 0x388   : > { %v992_v9 = vsel %vm923_vm2, %v2247_v8, 0.0 }
 0x389   : > { %993 = vadd.xlane.f32.xlu2 %v992_v9  ;;  %v2079_v9 = vld [vmem:[#allocation12 + $0x74] sm:$0xf] }
 0x38c   : > { %v1104_v10 = vpop.xlane.xlu0 %1103 }
 0x38d   : > { %v1105_v11 = vsub.f32 %v1098_v61, %v1104_v10  ;;  %v1184_v12 = vpop.f32.mrf.mxu2 }
 0x38e   : > { %v1188_v13 = vsel %vm923_vm2, %v1184_v12, -inf }
 0x38f   : > { %v1106_v14 = vmul.f32 1.442695, %v1105_v11  ;;  %1189 = vmax.xlane.f32.xlu1 %v1188_v13  ;;  %v1963_v11 = vld [vmem:[#allocation12 + $0x78] sm:$0xf0] }
 0x391   : > { %2248 = vpow2.f32 %v1106_v14 }
 0x395   : > { %v1186_v15 = vpop.f32.mrf.mxu2 }
 0x397   : > { %v2249_v16 = vpop.eup %2248 }
 0x398   : > { %v1108_v17 = vsel %vm923_vm2, %v2249_v16, 0.0 }
 0x399   : > { %1109 = vadd.xlane.f32.xlu1 %v1108_v17 }
 0x39f   : > { %v1201_v18 = vpop.permute.xlu0 %1200 }
 0x3a0   : > { %v1206_v19 = vsel %vm939_vm1, %v1201_v18, 0 }
 0x3a1   : > { %1001 = vrot.lane.b32.xlu2 %v1000_v2, %s2679_s17  ;;  %1215 = vmatpush.bf16.msra.mxu3 %v1206_v19 }
 0x3fc   : > { %v994_v20 = vpop.xlane.xlu2 %993 }
 0x3fd   : > { %2250 = vrcp.f32 %v994_v20 }
 0x402   : > { %v1190_v21 = vpop.xlane.xlu1 %1189 }
 0x403   : > { %v2251_v22 = vpop.eup %2250  ;;  %v1191_v23 = vsub.f32 %v1184_v12, %v1190_v21  ;;  %v1966_v12 = vor.u32 %v2079_v9, %v1963_v11  ;;  %v1953_v21 = vld [vmem:[#allocation12 + $0x60] sm:$0xf]  ;;  %v2094_v9 = vld [vmem:[#allocation15 + $0x68] sm:$0xff] }
 0x404   : > { %v996_v24 = vmul.f32 %v2251_v22, %v2247_v8  ;;  %v1002_v25 = vpop.permute.xlu2 %1001  ;;  %v2080_v8 = vld [vmem:[#allocation12 + $0x74] sm:$0xf0]  ;;  %v2078_v22 = vld [vmem:[#allocation12 + $0x64] sm:$0xf0] }
 0x405   : > { %v1192_v26 = vmul.f32 1.442695, %v1191_v23  ;;  %v1007_v27 = vsel %vm939_vm1, %v1002_v25, 0  ;;  %v1962_v10 = vor.u32 %v2080_v8, %v1961_v7  ;;  %1390 = vmatpush.bf16.msrb.mxu2 %v1966_v12  ;;  %v2077_v23 = vld [vmem:[#allocation12 + $0x64] sm:$0xf]  ;;  %v2086_v8 = vld [vmem:[#allocation15 + $0x28] sm:$0xff] }
 0x406   : > { %1016 = vmatpush.bf16.msrb.mxu0 %v1007_v27  ;;  %v997_v28 = vpack.c.bf16 %v996_v24, %v996_v24  ;;  %v1954_v24 = vor.u32 %v2078_v22, %v1953_v21  ;;  %v1955_v25 = vld [vmem:[#allocation12 + $0x68] sm:$0xf0]  ;;  %v1945_v27 = vld [vmem:[#allocation12 + $0x50] sm:$0xf]  ;;  %v2093_v11 = vld [vmem:[#allocation15 + $0x60] sm:$0xff] }
 0x407   : > { %2252 = vpow2.f32 %v1192_v26  ;;  %v1958_v26 = vor.u32 %v2077_v23, %v1955_v25  ;;  %v2237_v21 = vld [vmem:[#allocation9] ss:$0 sm:$0xff] }
 0x409   : > { %1862 = vmatmul.msk.bf16.vlgmr.msrb.gmra.mxu0 %vm923_vm2, %v997_v28  ;;  %1391 = vmatpush.bf16.msrb.mxu2 %v1958_v26  ;;  %v2076_v28 = vld [vmem:[#allocation12 + $0x54] sm:$0xf0] }
 0x40c   : > { %v1110_v33 = vpop.xlane.xlu1 %1109 }
 0x40d   : > { %v2253_v30 = vpop.eup %2252 }
 0x40e   : > { %v1194_v31 = vsel %vm923_vm2, %v2253_v30, 0.0 }
 0x40f   : > { %1195 = vadd.xlane.f32.xlu1 %v1194_v31  ;;  %v1947_v31 = vld [vmem:[#allocation12 + $0x58] sm:$0xf0] }
 0x410   : > { %v1950_v32 = vor.u32 %v2075_v29, %v1947_v31  ;;  %v2091_v29 = vld [vmem:[#allocation15 + $0x50] sm:$0xff]  ;;  %v2090_v31 = vld [vmem:[#allocation15 + $0x48] sm:$0xff] }
 0x412   : > { %1392 = vmatpush.bf16.msrb.mxu2 %v1950_v32  ;;  %v2089_v32 = vld [vmem:[#allocation15 + $0x40] sm:$0xff] }
 0x428   : > { %1114 = vrot.lane.b32.xlu1 %v1000_v2, %s2680_s20 }
 0x482   : > { %v1196_v34 = vpop.xlane.xlu1 %1195 }
 0x483   : > { %2254 = vrcp.f32 %v1196_v34  ;;  %v2074_v34 = vld [vmem:[#allocation12 + $0x44] sm:$0xf0] }
 0x484   : > { %2256 = vrcp.f32 %v1110_v33  ;;  %v1937_v33 = vld [vmem:[#allocation12 + $0x40] sm:$0xf] }
 0x485   : > { %2258 = vrcp.f32 %v2681_v6  ;;  %v2095_v6 = vld [vmem:[#allocation15 + $0x70] sm:$0xff] }
 0x486   : > { %v1018_v35 = vpop.f32.mrf.mxu0 }
 0x487   : > { %v1022_v36 = vpack.c.bf16 %v1018_v35, %v1018_v35  ;;  %v2073_v35 = vld [vmem:[#allocation12 + $0x44] sm:$0xf] }
 0x489   : > { %v2255_v37 = vpop.eup %2254  ;;  %1871 = vmatmul.msk.bf16.vlgmr.msrb.gmra.mxu1 %vm903_vm0, %v1022_v36  ;;  %v1938_v36 = vor.u32 %v2074_v34, %v1937_v33  ;;  %v689_v33 = vld [vmem:[#allocation13] sm:$0x3] }
 0x48a   : > { %v1198_v38 = vmul.f32 %v2255_v37, %v2253_v30  ;;  %v2257_v41 = vpop.eup %2256  ;;  %1377 = vmatpush.bf16.msrb.mxu1 %v1962_v10  ;;  %v1946_v30 = vor.u32 %v2076_v28, %v1945_v27  ;;  %v1939_v37 = vld [vmem:[#allocation12 + $0x48] sm:$0xf0]  ;;  %v2085_v10 = vld [vmem:[#allocation15 + $0x20] sm:$0xff]  ;;  %v1293_v34 = vperm.slane %v689_v33, 0 }
 0x48b   : > { %v1112_v42 = vmul.f32 %v2257_v41, %v2249_v16  ;;  %v2259_v13 = vpop.eup %2258  ;;  %v2071_v41 = vld [vmem:[#allocation12 + $0x34] sm:$0xf]  ;;  %v2082_v28 = vld [vmem:[#allocation15 + $0x8] sm:$0xff] }
 0x48c   : > { %v1199_v39 = vpack.c.bf16 %v1198_v38, %v1198_v38  ;;  %vm1263_vm3 = vweird.f32 %v2259_v13  ;;  %v1942_v38 = vor.u32 %v2073_v35, %v1939_v37  ;;  %v1294_v37 = vperm.slane %v689_v33, 1 }
 0x48d   : > { %v1113_v45 = vpack.c.bf16 %v1112_v42, %v1112_v42 }
 0x48e   : > { %v1020_v40 = vpop.f32.mrf.mxu0  ;;  %1893 = vmatmul.msk.bf16.vlgmr.msra.gmra.mxu3 %vm923_vm2, %v1199_v39  ;;  %1378 = vmatpush.bf16.msrb.mxu1 %v1954_v24  ;;  %v1929_v39 = vld [vmem:[#allocation12 + $0x30] sm:$0xf]  ;;  %v2238_v24 = vld [vmem:[#allocation10] ss:$0 sm:$0xff] }
 0x48f   : > { %1393 = vmatpush.bf16.msrb.mxu2 %v1942_v38  ;;  %v2072_v40 = vld [vmem:[#allocation12 + $0x34] sm:$0xf0] }
 0x490   : > { %v1930_v42 = vor.u32 %v2072_v40, %v1929_v39 }
 0x492   : > { %1379 = vmatpush.bf16.msrb.mxu1 %v1946_v30  ;;  %v2081_v30 = vld [vmem:[#allocation15] sm:$0xff] }
 0x496   : > { %1380 = vmatpush.bf16.msrb.mxu1 %v1938_v36 }
 0x49a   : > { %v1115_v43 = vpop.permute.xlu1 %1114  ;;  %1381 = vmatpush.bf16.msrb.mxu1 %v1930_v42 }
 0x49b   : > { %v1120_v44 = vsel %vm939_vm1, %v1115_v43, 0  ;;  %v1931_v43 = vld [vmem:[#allocation12 + $0x38] sm:$0xf0] }
 0x49c   : > { %1129 = vmatpush.bf16.msra.mxu0 %v1120_v44  ;;  %v1934_v44 = vor.u32 %v2071_v41, %v1931_v43 }
 0x49e   : > { %1394 = vmatpush.bf16.msrb.mxu2 %v1934_v44 }
 0x49f   : > { %1882 = vmatmul.msk.bf16.vlgmr.msra.gmra.mxu0 %vm923_vm2, %v1113_v45  ;;  %v1921_v45 = vld [vmem:[#allocation12 + $0x20] sm:$0xf] }
 0x4a0   : > { %1243 = vmatpush.bf16.msrb.mxu0 %v2064_v46  ;;  %v2070_v46 = vld [vmem:[#allocation12 + $0x24] sm:$0xf0] }
 0x4a1   : > { %v1922_v48 = vor.u32 %v2070_v46, %v1921_v45  ;;  %v2239_v45 = vld [vmem:[#allocation16] ss:$0 sm:$0xff] }
 0x4a3   : > { %1382 = vmatpush.bf16.msrb.mxu1 %v1922_v48 }
 0x4a4   : > { %1244 = vmatpush.bf16.msrb.mxu0 %v2063_v47  ;;  %v2069_v47 = vld [vmem:[#allocation12 + $0x24] sm:$0xf] }
 0x506   : > { %v1047_v50 = vpop.f32.mrf.mxu1 }
 0x507   : > { %v1076_v60 = vadd.f32 %v2903_v5, %v1047_v50  ;;  %v1259_v5 = vmul.f32 128.0, %v2259_v13  ;;  %v1926_v50 = vor.u32 %v2069_v47, %v1923_v49 }
 0x509   : > { %v1260_v14 = vsub.f32 1.0, %v1259_v5  ;;  %1395 = vmatpush.bf16.msrb.mxu2 %v1926_v50  ;;  %v2084_v5 = vld [vmem:[#allocation15 + $0x18] sm:$0xff] }
 0x50b   : > { %v1261_v15 = vmul.f32 %v2259_v13, %v1260_v14  ;;  %v2092_v14 = vld [vmem:[#allocation15 + $0x58] sm:$0xff] }
 0x50d   : > { %v1262_v16 = vadd.f32 %v2259_v13, %v1261_v15 }
 0x50e   : > { %v1049_v51 = vpop.f32.mrf.mxu1 }
 0x50f   : > { %v1913_v51 = vld [vmem:[#allocation12 + $0x10] sm:$0xf] }
 0x511   : > { %v1217_v52 = vpop.f32.mrf.mxu3 }
 0x512   : > { %v1221_v53 = vpack.c.bf16 %v1217_v52, %v1217_v52  ;;  %v2068_v52 = vld [vmem:[#allocation12 + $0x14] sm:$0xf0] }
 0x514   : > { %1902 = vmatmul.msk.bf16.vlgmr.msrb.gmra.mxu0 %vm903_vm0, %v1221_v53  ;;  %v2067_v53 = vld [vmem:[#allocation12 + $0x14] sm:$0xf] }
 0x519   : > { %v1219_v54 = vpop.f32.mrf.mxu3 }
 0x51a   : > { %v1914_v54 = vor.u32 %v2068_v52, %v1913_v51 }
 0x51c   : > { %v1131_v55 = vpop.f32.mrf.mxu0  ;;  %1383 = vmatpush.bf16.msrb.mxu1 %v1914_v54 }
 0x51d   : > { %v1135_v56 = vpack.c.bf16 %v1131_v55, %v1131_v55  ;;  %v1915_v55 = vld [vmem:[#allocation12 + $0x18] sm:$0xf0] }
 0x51f   : > { %1891 = vmatmul.msk.bf16.vlgmr.msra.gmra.mxu1 %vm903_vm0, %v1135_v56  ;;  %v1905_v56 = vld [vmem:[#allocation12] sm:$0xf] }
 0x524   : > { %v1133_v57 = vpop.f32.mrf.mxu0 }
 0x525   : > { %v2066_v57 = vld [vmem:[#allocation12 + $0x4] sm:$0xf0] }
 0x591   : > { %v1246_v58 = vpop.f32.mrf.mxu0 }
 0x599   : > { %v1248_v59 = vpop.f32.mrf.mxu0 }
 0x59a   : > { %v2065_v59 = vld [vmem:[#allocation12 + $0x4] sm:$0xf] }
 0x59c   : > { %v1160_v61 = vpop.f32.mrf.mxu1 }
 0x59d   : > { %v1164_v63 = vadd.f32 %v1160_v61, %v1076_v60  ;;  %v1907_v60 = vld [vmem:[#allocation12 + $0x8] sm:$0xf0]  ;;  %v1906_v61 = vor.u32 %v2066_v57, %v1905_v56 }
 0x59f   : > { %v1250_v0 = vadd.f32 %v1246_v58, %v1164_v63  ;;  %v1918_v58 = vor.u32 %v2067_v53, %v1915_v55  ;;  %v1910_v63 = vor.u32 %v2065_v59, %v1907_v60  ;;  %1384 = vmatpush.bf16.msrb.mxu1 %v1906_v61 }
 0x5a1   : > { %v1251_v2 = vadd.f32 %v1250_v0, %v2877_v62  ;;  %v2922_v62 = vsel %vm1263_vm3, %v2259_v13, %v1262_v16  ;;  %1396 = vmatpush.bf16.msrb.mxu2 %v1918_v58  ;;  %v2088_v0 = vld [vmem:[#allocation15 + $0x38] sm:$0xff] }
 0x5a2   : > { %1506 = vmatpush.bf16.msrb.mxu3 %v2088_v0 }
 0x5a3   : > { %v1255_v3 = vadd.f32 %v2236_v1, %v1251_v2  ;;  %v2096_v1 = vld [vmem:[#allocation15 + $0x78] sm:$0xff] }
 0x5a4   : > { %v1162_v4 = vpop.f32.mrf.mxu1  ;;  %1519 = vmatpush.bf16.msra.mxu0 %v2096_v1 }
 0x5a5   : > { %1256 = vadd.xlane.f32.xlu2 %v1255_v3  ;;  %1397 = vmatpush.bf16.msrb.mxu2 %v1910_v63  ;;  %v2087_v4 = vld [vmem:[#allocation15 + $0x30] sm:$0xff] }
 0x5a6   : > { %1507 = vmatpush.bf16.msrb.mxu3 %v2087_v4 }
 0x5a8   : > { %1520 = vmatpush.bf16.msra.mxu0 %v2095_v6  ;;  %v2241_v6 = vld [vmem:[#allocation19] ss:$0 sm:$0xff] }
 0x5aa   : > { %1508 = vmatpush.bf16.msrb.mxu3 %v2086_v8 }
 0x5ac   : > { %1521 = vmatpush.bf16.msra.mxu0 %v2094_v9 }
 0x5ae   : > { %1509 = vmatpush.bf16.msrb.mxu3 %v2085_v10 }
 0x5b0   : > { %1522 = vmatpush.bf16.msra.mxu0 %v2093_v11 }
 0x5b2   : > { %1510 = vmatpush.bf16.msrb.mxu3 %v2084_v5 }
 0x5b4   : > { %1523 = vmatpush.bf16.msra.mxu0 %v2092_v14 }
 0x5b8   : > { %1524 = vmatpush.bf16.msra.mxu0 %v2091_v29 }
 0x5bc   : > { %1525 = vmatpush.bf16.msra.mxu0 %v2090_v31 }
 0x5c0   : > { %1526 = vmatpush.bf16.msra.mxu0 %v2089_v32 }
 0x618   : > { %v1257_v17 = vpop.xlane.xlu2 %1256 }
 0x619   : > { %v1265_v18 = vmul.f32 %v2922_v62, %v1257_v17  ;;  %v2083_v17 = vld [vmem:[#allocation15 + $0x10] sm:$0xff] }
 0x61a   : > { %1511 = vmatpush.bf16.msrb.mxu3 %v2083_v17 }
 0x61b   : > { %v2925_v19 = vsub.f32 %v1255_v3, %v1265_v18 }
 0x61d   : > { %v1267_v20 = vmul.f32 %v2925_v19, %v2925_v19 }
 0x61e   : > { %1512 = vmatpush.bf16.msrb.mxu3 %v2082_v28 }
 0x61f   : > { %1268 = vadd.xlane.f32.xlu0 %v1267_v20 }
 0x622   : > { %1513 = vmatpush.bf16.msrb.mxu3 %v2081_v30 }
 0x692   : > { %v1269_v2 = vpop.xlane.xlu0 %1268 }
 0x693   : > { %v1270_v3 = vmul.f32 %v1269_v2, %v2922_v62 }
 0x695   : > { %v1271_v7 = vadd.f32 1e-05, %v1270_v3  ;;  %v2240_v3 = vld [vmem:[#allocation18] ss:$0 sm:$0xff] }
 0x697   : > { %2260 = vrsqrt.f32 %v1271_v7  ;;  %vm1278_vm5 = vweird.f32 %v1271_v7 }
 0x69d   : > { %v2261_v12 = vpop.eup %2260 }
 0x69e   : > { %v1273_v13 = vmul.f32 %v2261_v12, %v1271_v7  ;;  %vm1279_vm4 = vweird.f32 %v2261_v12 }
 0x69f   : > { %vm1280_vm6 = vmor %vm1278_vm5, %vm1279_vm4 }
 0x6a0   : > { %v1274_v15 = vmul.f32 %v2261_v12, %v1273_v13 }
 0x6a2   : > { %v1275_v16 = vmul.f32 0.5, %v1274_v15 }
 0x6a4   : > { %v1276_v18 = vsub.f32 1.5, %v1275_v16 }
 0x6a6   : > { %v1277_v20 = vmul.f32 %v2261_v12, %v1276_v18 }
 0x6a8   : > { %v1281_v22 = vsel %vm1280_vm6, %v2261_v12, %v1277_v20 }
 0x6a9   : > { %v1282_v23 = vmul.f32 %v1281_v22, %v2925_v19 }
 0x6ab   : > { %v1286_v25 = vmul.f32 %v2237_v21, %v1282_v23 }
 0x6ad   : > { %v1290_v26 = vadd.f32 %v2238_v24, %v1286_v25 }
 0x6af   : > { %v1291_v27 = vpack.c.bf16 %v1290_v26, %v1290_v26 }
 0x6b1   : > { %1385 = vmatmul.bf16.vlgmr.msrb.gmra.mxu1 %v1291_v27  ;;  %1398 = vmatmul.bf16.vlgmr.msrb.gmra.mxu2 %v1291_v27 }
 0x72e   : > { %v1386_v35 = vpop.f32.mrf.mxu1 }
 0x72f   : > { %v1387_v19 = vadd.f32 %v1386_v35, %v1293_v34 }
 0x731   : > { %v1403_v36 = vmax.f32 %v1387_v19, 0.0 }
 0x733   : > { %v1405_v38 = vpack.c.bf16 %v1403_v36, %v1403_v36 }
 0x734   : > { %v1399_v39 = vpop.f32.mrf.mxu2 }
 0x735   : > { %v1400_v40 = vadd.f32 %v1399_v39, %v1294_v37  ;;  %1514 = vmatmul.bf16.vlgmr.msrb.gmra.mxu3 %v1405_v38 }
 0x736   : > { %v1388_v41 = vpop.f32.mrf.mxu1 }
 0x737   : > { %v1404_v42 = vmax.f32 %v1400_v40, 0.0 }
 0x739   : > { %v1406_v43 = vpack.c.bf16 %v1404_v42, %v1404_v42 }
 0x73b   : > { %1527 = vmatmul.bf16.vlgmr.msra.gmra.mxu0 %v1406_v43 }
 0x73c   : > { %v1401_v44 = vpop.f32.mrf.mxu2 }
 0x7b8   : > { %v1515_v46 = vpop.f32.mrf.mxu3  ;;  %v1528_v47 = vpop.f32.mrf.mxu0 }
 0x7b9   : > { %v1516_v48 = vadd.f32 %v2239_v45, %v1515_v46 }
 0x7bb   : > { %v1529_v49 = vadd.f32 %v1528_v47, %v1516_v48 }
 0x7bd   : > { %v1532_v50 = vadd.f32 %v1529_v49, %v1290_v26 }
 0x7bf   : > { %1533 = vadd.xlane.f32.xlu1 %v1532_v50 }
 0x7c0   : > { %v1517_v51 = vpop.f32.mrf.mxu3  ;;  %v1530_v52 = vpop.f32.mrf.mxu0 }
 0x832   : > { %v1534_v53 = vpop.xlane.xlu1 %1533 }
 0x833   : > { %v1535_v54 = vmul.f32 %v1534_v53, %v2922_v62 }
 0x835   : > { %v1536_v55 = vsub.f32 %v1532_v50, %v1535_v54 }
 0x837   : > { %v1537_v56 = vmul.f32 %v1536_v55, %v1536_v55 }
 0x839   : > { %1538 = vadd.xlane.f32.xlu2 %v1537_v56 }
 0x8ac   : > { %v1539_v57 = vpop.xlane.xlu2 %1538 }
 0x8ad   : > { %v1540_v58 = vmul.f32 %v1539_v57, %v2922_v62 }
 0x8af   : > { %v1541_v59 = vadd.f32 1e-05, %v1540_v58 }
 0x8b1   : > { %2262 = vrsqrt.f32 %v1541_v59  ;;  %vm1548_vm8 = vweird.f32 %v1541_v59 }
 0x8b7   : > { %v2263_v60 = vpop.eup %2262 }
 0x8b8   : > { %v1543_v61 = vmul.f32 %v2263_v60, %v1541_v59  ;;  %vm1549_vm7 = vweird.f32 %v2263_v60 }
 0x8b9   : > { %vm1550_vm9 = vmor %vm1548_vm8, %vm1549_vm7 }
 0x8ba   : > { %v1544_v63 = vmul.f32 %v2263_v60, %v1543_v61 }
 0x8bc   : > { %v1545_v0 = vmul.f32 0.5, %v1544_v63 }
 0x8be   : > { %v1546_v1 = vsub.f32 1.5, %v1545_v0 }
 0x8c0   : > { %v1547_v2 = vmul.f32 %v2263_v60, %v1546_v1 }
 0x8c2   : > { %v1551_v4 = vsel %vm1550_vm9, %v2263_v60, %v1547_v2 }
 0x8c3   : > { %v1552_v7 = vmul.f32 %v1551_v4, %v1536_v55 }
 0x8c5   : > { %v1556_v8 = vmul.f32 %v2240_v3, %v1552_v7 }
 0x8c7   : > { %v1560_v62 = vadd.f32 %v2241_v6, %v1556_v8 }
 0x8c9   : > { %1561 = vst [vmem:[%s618_s15] sm:$0xff] %v1560_v62 }
 0x8ca PF: > { %s30_s25 = sadd.s32 1, %s2658_s25  }
 0x8cb   : > { %p27_p7 = scmp.ge.s32.totalorder %s30_s25, 4  }
 0x8cd   :  { %29 = sbr.rel (!%p27_p7) target bundleno = 12 (0xc), region = 151 }
 0x8d2   :  { %1581 = vsyncpa [#allocation3], 1 }
 0x8d3   :  { %1583 = vsyncpa [#allocation3 + $0x1], 1 }
 0x8d4   :  { %1584 = vsyncpa [#allocation5], 1 }
 0x8d5   :  { %1585 = vsyncpa [#allocation8], 1 }
 0x8d6   :  { %1586 = vsyncpa [#allocation11], 1 }
 0x8d7   :  { %1587 = vsyncpa [#allocation14], 1 }
 0x8d8   :  { %1588 = vsyncpa [#allocation17], 1 }
 0x8d9   :  { %1589 = vsyncpa [#allocation20], 1 }

// kernel: transformer_forward.3
= control target key start
LH: loop header
LB: loop body
LE: loop exit
PB: predicated region body
PF: predicated region fallthrough
CT: control target
= control target key end

     0   :  { %s2977_s0 = inlined_call_operand.vmem [shape: f32[2,8,128], index: 0, kind: input, shape index: {}]   ;;  %s2978_s1 = inlined_call_operand.vmem [shape: f32[8,128], index: 1, kind: input, shape index: {}]   ;;  %s2979_s2 = inlined_call_operand.hbm [shape: bf16[128,384], index: 2, kind: input, shape index: {}]   ;;  %s2980_s3 = inlined_call_operand.hbm [shape: f32[1,384], index: 3, kind: input, shape index: {}]   ;;  %s2981_s4 = inlined_call_operand.hbm [shape: bf16[128,128], index: 4, kind: input, shape index: {}]   ;;  %s2982_s5 = inlined_call_operand.hbm [shape: f32[1,128], index: 5, kind: input, shape index: {}]   ;;  %s2983_s6 = inlined_call_operand.hbm [shape: f32[1,128], index: 6, kind: input, shape index: {}]   ;;  %s2984_s7 = inlined_call_operand.hbm [shape: f32[1,128], index: 7, kind: input, shape index: {}]   ;;  %s2985_s8 = inlined_call_operand.hbm [shape: bf16[128,256], index: 8, kind: input, shape index: {}]   ;;  %s2986_s9 = inlined_call_operand.hbm [shape: f32[1,256], index: 9, kind: input, shape index: {}]   ;;  %s2987_s10 = inlined_call_operand.hbm [shape: bf16[256,128], index: 10, kind: input, shape index: {}]   ;;  %s2988_s11 = inlined_call_operand.hbm [shape: f32[1,128], index: 11, kind: input, shape index: {}]   ;;  %s2989_s12 = inlined_call_operand.hbm [shape: f32[1,128], index: 12, kind: input, shape index: {}]   ;;  %s2990_s13 = inlined_call_operand.hbm [shape: f32[1,128], index: 13, kind: input, shape index: {}]   ;;  %s2991_s14 = inlined_call_operand.vmem [shape: f32[2,8,128], index: 14, kind: output, shape index: {}]  }
   0x1   :  { %2992 = sst [smem:[#allocation28_spill]] %s2979_s2 }
   0x2   :  { %2993 = sst [smem:[#allocation29_spill]] %s2980_s3 }
   0x3   :  { %2994 = sst [smem:[#allocation30_spill]] %s2981_s4 }
   0x4   :  { %2995 = sst [smem:[#allocation31_spill]] %s2982_s5 }
   0x5   :  { %2996 = sst [smem:[#allocation32_spill]] %s2984_s7 }
   0x6   :  { %19 = vsyncpa [#allocation3], 0 }
   0x7   :  { %20 = vsyncpa [#allocation5], 0 }
   0x8   :  { %21 = vsyncpa [#allocation8], 0 }
   0x9   :  { %22 = vsyncpa [#allocation11], 0 }
   0xa   :  { %23 = vsyncpa [#allocation14], 0 }
   0xb   :  { %24 = vsyncpa [#allocation17], 0 }
   0xc   :  { %25 = vsyncpa [#allocation20], 0  ;;  %s2787_s29 = smov 0  }
   0xd LB: > { %s2997_s3 = sld [smem:[#allocation29_spill]]  ;;  %s2796_s17 = sadd.s32 4294967295, %s2688_s29   ;;  %s2688_s29 = sphi %s2787_s29, %s31_s29  }
   0xe   : > { %p1764_p0 = scmp.ge.s32.totalorder %s2688_s29, 1  ;;  %p361_p1 = scmp.lt.s32.totalorder %s2688_s29, 3 }
   0xf   : > { %p2212_p2 = scmp.eq.s32.totalorder %s2796_s17, 0  ;;  %s2690_s19 = smov [#allocation4]  }
  0x10   : > { %p2801_p3 = pnand %p1764_p0, %p361_p1  ;;  %s392_s20 = sshll.u32 %s2690_s19, 4  ;;  %s393_s20 = int_to_ptr.vmem [resolvable:$true] %s392_s20 }
  0x11   : > { %s2999_s5 = sld [smem:[#allocation31_spill]]  ;;  %s2691_s28 = smov [#allocation7]  }
  0x12   : > { %p2175_p4 = pneg %p2801_p3  ;;  %s3000_s7 = sld [smem:[#allocation32_spill]] }
  0x13   : > { %s390_s16 = sshll.u32 %s2997_s3, 4  ;;  %s418_s30 = sshll.u32 %s2691_s28, 4  ;;  %s391_s16 = int_to_ptr.hbm [resolvable:$true] %s390_s16  ;;  %s419_s30 = int_to_ptr.vmem [resolvable:$true] %s418_s30 }
  0x14   : > { %p2815_p5 = pnand %p2212_p2, %p2175_p4  ;;  %s2692_s15 = smov [#allocation10]  }
  0x15   : > { %s442_s19 = sshll.u32 %s2692_s15, 4  ;;  %s466_s24 = sshll.u32 %s2986_s9, 4  ;;  %s443_s19 = int_to_ptr.vmem [resolvable:$true] %s442_s19  ;;  %s467_s24 = int_to_ptr.hbm [resolvable:$true] %s466_s24 }
  0x16   : > { %2181 = dma.hbm_to_vmem [thread:$0]  (!%p2815_p5), %s391_s16, 48, %s393_s20, [#allocation5]  }
  0x17   : > { %s416_s23 = sshll.u32 %s2999_s5, 4  ;;  %s492_s3 = sshll.u32 %s2988_s11, 4  ;;  %s417_s23 = int_to_ptr.hbm [resolvable:$true] %s416_s23  ;;  %s493_s3 = int_to_ptr.hbm [resolvable:$true] %s492_s3 }
  0x18   : > { %s440_s26 = sshll.u32 %s3000_s7, 4  ;;  %s2693_s5 = smov [#allocation13]   ;;  %s441_s26 = int_to_ptr.hbm [resolvable:$true] %s440_s26 }
  0x19   : > { %2187 = dma.hbm_to_vmem [thread:$0]  (!%p2815_p5), %s417_s23, 16, %s419_s30, [#allocation8]  }
  0x1a   : > { %2193 = dma.hbm_to_vmem [thread:$0]  (!%p2815_p5), %s441_s26, 16, %s443_s19, [#allocation11]  }
  0x1b   : > { %s468_s7 = sshll.u32 %s2693_s5, 4  ;;  %s2694_s16 = smov [#allocation16]   ;;  %s469_s7 = int_to_ptr.vmem [resolvable:$true] %s468_s7 }
  0x1c   : > { %2199 = dma.hbm_to_vmem [thread:$0]  (!%p2815_p5), %s467_s24, 32, %s469_s7, [#allocation14]  }
  0x1d   : > { %s494_s20 = sshll.u32 %s2694_s16, 4  ;;  %s3002_s2 = sld [smem:[#allocation28_spill]]  ;;  %s495_s20 = int_to_ptr.vmem [resolvable:$true] %s494_s20 }
  0x1e   : > { %2205 = dma.hbm_to_vmem [thread:$0]  (!%p2815_p5), %s493_s3, 16, %s495_s20, [#allocation17]  }
  0x1f   : > { %s2695_s26 = smov [#allocation2]   ;;  %s3003_s4 = sld [smem:[#allocation30_spill]] }
  0x20   : > { %s377_s19 = sshll.u32 %s2695_s26, 4  ;;  %s2696_s25 = smov 192   ;;  %s378_s19 = int_to_ptr.vmem [resolvable:$true] %s377_s19 }
  0x21   : > { %s2697_s7 = smov 12   ;;  %s2698_s24 = smov [#allocation6]  }
  0x22   : > { %s403_s28 = sshll.u32 %s2698_s24, 4  ;;  %s2699_s16 = smov 64   ;;  %s404_s28 = int_to_ptr.vmem [resolvable:$true] %s403_s28 }
  0x23   : > { %s375_s15 = sshll.u32 %s3002_s2, 4  ;;  %s2700_s23 = smov 4   ;;  %s376_s15 = int_to_ptr.hbm [resolvable:$true] %s375_s15 }
  0x24   : > { %2178 = dma.hbm_to_vmem [thread:$0]  (!%p2815_p5), %s376_s15, 3072, %s378_s19, [#allocation3], %s2696_s25, %s2696_s25, %s2697_s7  }
  0x25   : > { %s401_s22 = sshll.u32 %s3003_s4, 4  ;;  %s428_s30 = sshll.u32 %s2983_s6, 4  ;;  %s402_s22 = int_to_ptr.hbm [resolvable:$true] %s401_s22  ;;  %s429_s30 = int_to_ptr.hbm [resolvable:$true] %s428_s30 }
  0x26   : > { %2184 = dma.hbm_to_vmem [thread:$0]  (!%p2815_p5), %s402_s22, 1024, %s404_s28, [#allocation5], %s2699_s16, %s2699_s16, %s2700_s23  }
  0x27   : > { %s2701_s26 = smov [#allocation9]   ;;  %s451_s15 = sshll.u32 %s2985_s8, 4  ;;  %s452_s15 = int_to_ptr.hbm [resolvable:$true] %s451_s15 }
  0x28   : > { %s430_s5 = sshll.u32 %s2701_s26, 4  ;;  %s2702_s19 = smov [#allocation12]   ;;  %s431_s5 = int_to_ptr.vmem [resolvable:$true] %s430_s5 }
  0x29   : > { %2190 = dma.hbm_to_vmem [thread:$0]  (!%p2815_p5), %s429_s30, 16, %s431_s5, [#allocation8]  }
  0x2a   : > { %s453_s25 = sshll.u32 %s2702_s19, 4  ;;  %s2703_s22 = smov 128   ;;  %s454_s25 = int_to_ptr.vmem [resolvable:$true] %s453_s25 }
  0x2b   : > { %s2704_s7 = smov 8   ;;  %s477_s3 = sshll.u32 %s2987_s10, 4  ;;  %s478_s3 = int_to_ptr.hbm [resolvable:$true] %s477_s3 }
  0x2c   : > { %2196 = dma.hbm_to_vmem [thread:$0]  (!%p2815_p5), %s452_s15, 2048, %s454_s25, [#allocation11], %s2703_s22, %s2703_s22, %s2704_s7  }
  0x2d   : > { %s2705_s2 = smov [#allocation15]   ;;  %s504_s5 = sshll.u32 %s2989_s12, 4  ;;  %s505_s5 = int_to_ptr.hbm [resolvable:$true] %s504_s5 }
  0x2e   : > { %s479_s20 = sshll.u32 %s2705_s2, 4  ;;  %s2706_s21 = smov [#allocation18]   ;;  %s480_s20 = int_to_ptr.vmem [resolvable:$true] %s479_s20 }
  0x2f   : > { %2202 = dma.hbm_to_vmem [thread:$0]  (!%p2815_p5), %s478_s3, 2048, %s480_s20, [#allocation14], %s2699_s16, %s2699_s16, %s2700_s23  }
  0x30   : > { %s506_s19 = sshll.u32 %s2706_s21, 4  ;;  %s516_s25 = sshll.u32 %s2990_s13, 4  ;;  %s507_s19 = int_to_ptr.vmem [resolvable:$true] %s506_s19  ;;  %s517_s25 = int_to_ptr.hbm [resolvable:$true] %s516_s25 }
  0x31   : > { %2208 = dma.hbm_to_vmem [thread:$0]  (!%p2815_p5), %s505_s5, 16, %s507_s19, [#allocation17]  }
  0x32   : > { %s2707_s22 = smov [#allocation19]   ;;  %538 = sbr.rel (%p2801_p3) target bundleno = 2251 (0x8cb), region = 76 }
  0x33   : > { %s518_s7 = sshll.u32 %s2707_s22, 4  ;;  %s519_s7 = int_to_ptr.vmem [resolvable:$true] %s518_s7 }
  0x34   : > { %2211 = dma.hbm_to_vmem [thread:$0]  (!%p2815_p5), %s517_s25, 16, %s519_s7, [#allocation20]  }
  0x37   : > { %2659 = dma.done.wait (%p2212_p2), [#allocation3], 3072  }
  0x38   : > { %2661 = vsyncadd (%p2212_p2), [#allocation3], 4294964224 }
  0x39   : > { %2663 = dma.done.wait (%p2212_p2), [#allocation5], 1072  }
  0x3a   : > { %2665 = vsyncadd (%p2212_p2), [#allocation5], 4294966224 }
  0x3b   : > { %2667 = dma.done.wait (%p2212_p2), [#allocation8], 32  }
  0x3c   : > { %2669 = vsyncadd (%p2212_p2), [#allocation8], 4294967264 }
  0x3d   : > { %2671 = dma.done.wait (%p2212_p2), [#allocation11], 2064  }
  0x3e   : > { %2673 = vsyncadd (%p2212_p2), [#allocation11], 4294965232 }
  0x3f   : > { %2675 = dma.done.wait (%p2212_p2), [#allocation14], 2080  }
  0x40   : > { %2677 = vsyncadd (%p2212_p2), [#allocation14], 4294965216 }
  0x41   : > { %2679 = dma.done.wait (%p2212_p2), [#allocation17], 32  }
  0x42   : > { %2681 = vsyncadd (%p2212_p2), [#allocation17], 4294967264 }
  0x43   : > { %2683 = dma.done.wait (%p2212_p2), [#allocation20], 16  }
  0x44   : > { %2685 = vsyncadd (%p2212_p2), [#allocation20], 4294967280  ;;  %v1879_v0 = vld [vmem:[#allocation2 + $0xa8] sm:$0xf]  ;;  %v2085_v1 = vld [vmem:[#allocation2 + $0xb0] sm:$0xf0] }
  0x45   : > { %v2084_v2 = vld [vmem:[#allocation2 + $0xac] sm:$0xf]  ;;  %v1880_v3 = vor.u32 %v2085_v1, %v1879_v0  ;;  %v1881_v4 = vld [vmem:[#allocation2 + $0xb4] sm:$0xf0]  ;;  %v1867_v5 = vld [vmem:[#allocation2 + $0x90] sm:$0xf] }
  0x46   : > { %v2082_v6 = vld [vmem:[#allocation2 + $0x98] sm:$0xf0]  ;;  %v1884_v7 = vor.u32 %v2084_v2, %v1881_v4  ;;  %v2081_v8 = vld [vmem:[#allocation2 + $0x94] sm:$0xf]  ;;  %v1869_v9 = vld [vmem:[#allocation2 + $0x9c] sm:$0xf0] }
  0x47   : > { %891 = vmatpush.bf16.msra.mxu0 %v1880_v3  ;;  %v1868_v10 = vor.u32 %v2082_v6, %v1867_v5  ;;  %v1872_v11 = vor.u32 %v2081_v8, %v1869_v9  ;;  %v1855_v12 = vld [vmem:[#allocation2 + $0x78] sm:$0xf]  ;;  %v2079_v13 = vld [vmem:[#allocation2 + $0x80] sm:$0xf0]  ;;  %v2078_v14 = vld [vmem:[#allocation2 + $0x7c] sm:$0xf] }
  0x48   : > { %904 = vmatpush.bf16.msra.mxu1 %v1884_v7  ;;  %v1857_v15 = vld [vmem:[#allocation2 + $0x84] sm:$0xf0]  ;;  %p638_p6 = scmp.lt.s32.totalorder %s2796_s17, 1  ;;  %v1856_v16 = vor.u32 %v2079_v13, %v1855_v12  ;;  %v1843_v18 = vld [vmem:[#allocation2 + $0x60] sm:$0xf]  ;;  %v2088_v13 = vld [vmem:[#allocation6 + $0x8] sm:$0xff] }
  0x49   : > { %v1860_v17 = vor.u32 %v2078_v14, %v1857_v15  ;;  %v2076_v19 = vld [vmem:[#allocation2 + $0x68] sm:$0xf0]  ;;  %v2075_v20 = vld [vmem:[#allocation2 + $0x64] sm:$0xf]  ;;  %v1845_v21 = vld [vmem:[#allocation2 + $0x6c] sm:$0xf0] }
  0x4a   : > { %s3005_s17 = smov (!%p638_p6, %s2796_s17), 1  ;;  %v1844_v22 = vor.u32 %v2076_v19, %v1843_v18  ;;  %v1831_v23 = vld [vmem:[#allocation2 + $0x48] sm:$0xf]  ;;  %v2073_v24 = vld [vmem:[#allocation2 + $0x50] sm:$0xf0]  ;;  %v1848_v26 = vor.u32 %v2075_v20, %v1845_v21  ;;  %v648_v55 = vld [vmem:[%s2978_s1] sm:$0xff] }
  0x4b   : > { %892 = vmatpush.bf16.msra.mxu0 %v1868_v10  ;;  %v1887_v25 = vld [vmem:[#allocation2 + $0xb0] sm:$0xf]  ;;  %v2086_v27 = vld [vmem:[#allocation2 + $0xb8] sm:$0xf0]  ;;  %v1875_v28 = vld [vmem:[#allocation2 + $0x98] sm:$0xf]  ;;  %v1832_v33 = vor.u32 %v2073_v24, %v1831_v23 }
  0x4c   : > { %905 = vmatpush.bf16.msra.mxu1 %v1872_v11  ;;  %v2083_v29 = vld [vmem:[#allocation2 + $0xa0] sm:$0xf0]  ;;  %v2072_v30 = vld [vmem:[#allocation2 + $0x4c] sm:$0xf]  ;;  %v1833_v31 = vld [vmem:[#allocation2 + $0x54] sm:$0xf0]  ;;  %v1888_v32 = vor.u32 %v2086_v27, %v1887_v25 }
  0x4d   : > { %s1791_s4 = sshll.u32 %s3005_s17, 3  ;;  %v1819_v34 = vld [vmem:[#allocation2 + $0x30] sm:$0xf]  ;;  %v2070_v35 = vld [vmem:[#allocation2 + $0x38] sm:$0xf0]  ;;  %v1876_v36 = vor.u32 %v2083_v29, %v1875_v28  ;;  %v1836_v37 = vor.u32 %v2072_v30, %v1833_v31  ;;  %vm933_vm0 = vcmask 261120  }
  0x4e   : > { %917 = vmatpush.bf16.msra.mxu2 %v1888_v32  ;;  %v2069_v38 = vld [vmem:[#allocation2 + $0x34] sm:$0xf]  ;;  %s641_s16 = scalar_lea.vmem %s2977_s0, %s1791_s4  ;;  %v1863_v39 = vld [vmem:[#allocation2 + $0x80] sm:$0xf]  ;;  %v2080_v40 = vld [vmem:[#allocation2 + $0x88] sm:$0xf0]  ;;  %v1820_v43 = vor.u32 %v2070_v35, %v1819_v34  ;;  %s645_s30 = scalar_lea.vmem %s2991_s14, %s1791_s4 }
  0x4f   : > { %893 = vmatpush.bf16.msra.mxu0 %v1856_v16  ;;  %v1821_v41 = vld [vmem:[#allocation2 + $0x3c] sm:$0xf0]  ;;  %v1807_v42 = vld [vmem:[#allocation2 + $0x18] sm:$0xf]  ;;  %v1864_v45 = vor.u32 %v2080_v40, %v1863_v39  ;;  %v2067_v47 = vld [vmem:[#allocation2 + $0x20] sm:$0xf0] }
  0x50   : > { %906 = vmatpush.bf16.msra.mxu1 %v1860_v17  ;;  %v647_v44 = vld [vmem:[%s641_s16] sm:$0xff]  ;;  %v1824_v46 = vor.u32 %v2069_v38, %v1821_v41  ;;  %v1851_v48 = vld [vmem:[#allocation2 + $0x68] sm:$0xf]  ;;  %v2077_v49 = vld [vmem:[#allocation2 + $0x70] sm:$0xf0]  ;;  %v1808_v53 = vor.u32 %v2067_v47, %v1807_v42  ;;  %s2708_s28 = smov 32  }
  0x51   : > { %v2066_v50 = vld [vmem:[#allocation2 + $0x1c] sm:$0xf]  ;;  %v1809_v51 = vld [vmem:[#allocation2 + $0x24] sm:$0xf0]  ;;  %v753_v52 = vmul.f32 11.313708, %v647_v44  ;;  %v1852_v56 = vor.u32 %v2077_v49, %v1851_v48 }
  0x52   : > { %918 = vmatpush.bf16.msra.mxu2 %v1876_v36  ;;  %v1795_v54 = vld [vmem:[#allocation2] sm:$0xf]  ;;  %v1812_v57 = vor.u32 %v2066_v50, %v1809_v51  ;;  %v2064_v58 = vld [vmem:[#allocation2 + $0x8] sm:$0xf0]  ;;  %v1839_v59 = vld [vmem:[#allocation2 + $0x50] sm:$0xf] }
  0x53   : > { %894 = vmatpush.bf16.msra.mxu0 %v1844_v22  ;;  %v2074_v60 = vld [vmem:[#allocation2 + $0x58] sm:$0xf0]  ;;  %v2063_v61 = vld [vmem:[#allocation2 + $0x4] sm:$0xf]  ;;  %v1797_v62 = vld [vmem:[#allocation2 + $0xc] sm:$0xf0]  ;;  %v2913_v63 = vadd.f32 %v753_v52, %v648_v55  ;;  %v1796_v0 = vor.u32 %v2064_v58, %v1795_v54 }
  0x54   : > { %907 = vmatpush.bf16.msra.mxu1 %v1848_v26  ;;  %v1840_v1 = vor.u32 %v2074_v60, %v1839_v59  ;;  %v1800_v2 = vor.u32 %v2063_v61, %v1797_v62  ;;  %v1827_v3 = vld [vmem:[#allocation2 + $0x38] sm:$0xf]  ;;  %v2071_v4 = vld [vmem:[#allocation2 + $0x40] sm:$0xf0]  ;;  %v1815_v7 = vld [vmem:[#allocation2 + $0x20] sm:$0xf] }
  0x55   : > { %v755_v5 = vpack.c.bf16 %v2913_v63, %v2913_v63  ;;  %v1828_v6 = vor.u32 %v2071_v4, %v1827_v3  ;;  %v2068_v8 = vld [vmem:[#allocation2 + $0x28] sm:$0xf0]  ;;  %v1803_v10 = vld [vmem:[#allocation2 + $0x8] sm:$0xf]  ;;  %v2065_v11 = vld [vmem:[#allocation2 + $0x10] sm:$0xf0] }
  0x56   : > { %919 = vmatpush.bf16.msra.mxu2 %v1864_v45  ;;  %v1816_v9 = vor.u32 %v2068_v8, %v1815_v7  ;;  %v1804_v12 = vor.u32 %v2065_v11, %v1803_v10  ;;  %v681_v14 = vld [vmem:[#allocation4] sm:$0x7]  ;;  %s2709_s3 = smov 96   ;;  %s2710_s2 = smov 64   ;;  %v2087_v30 = vld [vmem:[#allocation6] sm:$0xff]  ;;  %vm969_vm1 = vcmask 1043456  }
  0x57   : > { %895 = vmatpush.bf16.msra.mxu0 %v1832_v33  ;;  %v757_v15 = vperm.slane %v681_v14, 0  ;;  %v758_v16 = vperm.slane %v681_v14, 1  ;;  %v759_v32 = vperm.slane %v681_v14, 2  ;;  %vm953_vm2 = vcmask 64512  }
  0x58   : > { %908 = vmatpush.bf16.msra.mxu1 %v1836_v37 }
  0x5a   : > { %920 = vmatpush.bf16.msra.mxu2 %v1852_v56 }
  0x5b   : > { %896 = vmatpush.bf16.msra.mxu0 %v1820_v43 }
  0x5c   : > { %909 = vmatpush.bf16.msra.mxu1 %v1824_v46 }
  0x5e   : > { %921 = vmatpush.bf16.msra.mxu2 %v1840_v1 }
  0x5f   : > { %897 = vmatpush.bf16.msra.mxu0 %v1808_v53 }
  0x60   : > { %910 = vmatpush.bf16.msra.mxu1 %v1812_v57 }
  0x62   : > { %922 = vmatpush.bf16.msra.mxu2 %v1828_v6 }
  0x63   : > { %898 = vmatpush.bf16.msra.mxu0 %v1796_v0 }
  0x64   : > { %911 = vmatpush.bf16.msra.mxu1 %v1800_v2 }
  0x66   : > { %899 = vmatmul.bf16.vlgmr.msra.gmra.mxu0 %v755_v5  ;;  %923 = vmatpush.bf16.msra.mxu2 %v1816_v9 }
  0x67   : > { %912 = vmatmul.bf16.vlgmr.msra.gmra.mxu1 %v755_v5 }
  0x6a   : > { %924 = vmatpush.bf16.msra.mxu2 %v1804_v12 }
  0x6d   : > { %925 = vmatmul.bf16.vlgmr.msra.gmra.mxu2 %v755_v5 }
  0x6e   : > { %1102 = vmatpush.bf16.msrb.mxu2 %v2088_v13 }
  0x72   : > { %1103 = vmatpush.bf16.msrb.mxu2 %v2087_v30 }
  0xe3   : > { %v900_v17 = vpop.f32.mrf.mxu0 }
  0xe4   : > { %v913_v18 = vpop.f32.mrf.mxu1  ;;  %v901_v19 = vadd.f32 %v900_v17, %v757_v15 }
  0xe5   : > { %v914_v20 = vadd.f32 %v913_v18, %v758_v16 }
  0xe6   : > { %v930_v22 = vpack.c.bf16 %v901_v19, %v901_v19 }
  0xe7   : > { %v931_v21 = vpack.c.bf16 %v914_v20, %v914_v20 }
  0xe8   : > { %v988_v28 = vunpack.c.l.b16 %v930_v22 }
  0xe9   : > { %v993_v23 = vunpack.c.l.b16 %v931_v21  ;;  %v938_v24 = vsel %vm933_vm0, %v931_v21, 0 }
  0xea   : > { %947 = vmatpush.bf16.xpose.msra.mxu3 %v938_v24  ;;  %v989_v29 = vpack.c.b16 %v988_v28, %v988_v28 }
  0xeb   : > { %v994_v25 = vpack.c.b16 %v993_v23, %v993_v23  ;;  %v902_v26 = vpop.f32.mrf.mxu0 }
  0xec   : > { %v915_v27 = vpop.f32.mrf.mxu1 }
  0xed   : > { %1197 = vrot.lane.b32.xlu2 %v994_v25, %s2708_s28  ;;  %995 = vrot.lane.b32.xlu1 %v994_v25, %s2709_s3 }
  0xf0   : > { %v926_v31 = vpop.f32.mrf.mxu2 }
  0xf1   : > { %1889 = vmatmul.msk.bf16.vlgmr.msra.gmra.mxu3 %vm933_vm0, %v930_v22  ;;  %v927_v33 = vadd.f32 %v926_v31, %v759_v32  ;;  %v2090_v32 = vld [vmem:[#allocation6 + $0x18] sm:$0xff] }
  0xf2   : > { %1074 = vmatpush.bf16.msrb.mxu1 %v2090_v32  ;;  %v2105_v32 = vld [vmem:[#allocation12 + $0x54] sm:$0xf] }
  0xf3   : > { %v932_v35 = vpack.c.bf16 %v927_v33, %v927_v33 }
  0xf5   : > { %1111 = vrot.lane.b32.xlu2 %v994_v25, %s2710_s2  ;;  %990 = vrot.lane.b32.xlu1 %v989_v29, %s2709_s3  ;;  %v971_v36 = vsel %vm969_vm1, %v932_v35, 0  ;;  %v1029_v4 = vunpack.c.l.b16 %v932_v35  ;;  %v2089_v35 = vld [vmem:[#allocation6 + $0x10] sm:$0xff] }
  0xf6   : > { %980 = vmatpush.bf16.msrb.mxu3 %v971_v36  ;;  %1075 = vmatpush.bf16.msrb.mxu1 %v2089_v35 }
  0xf7   : > { %v1030_v5 = vpack.c.b16 %v1029_v4, %v1029_v4  ;;  %v2266_v4 = vld [vmem:[#allocation7] ss:$0 sm:$0xff] }
  0xf8   : > { %v928_v34 = vpop.f32.mrf.mxu2 }
  0xfd   : > { %1109 = vrot.lane.b32.xlu1 %v989_v29, %s2710_s2 }
 0x147   : > { %v1198_v37 = vpop.permute.xlu2 %1197 }
 0x148   : > { %v1203_v38 = vsel %vm933_vm0, %v1198_v37, 0 }
 0x149   : > { %1212 = vmatpush.bf16.xpose.msra.mxu2 %v1203_v38 }
 0x14f   : > { %v1112_v52 = vpop.permute.xlu2 %1111 }
 0x150   : > { %v1117_v54 = vsel %vm933_vm0, %v1112_v52, 0  ;;  %v2091_v52 = vld [vmem:[#allocation6 + $0x20] sm:$0xff] }
 0x15f   : > { %v996_v39 = vpop.permute.xlu1 %995 }
 0x160   : > { %v1001_v40 = vsel %vm933_vm0, %v996_v39, 0 }
 0x161   : > { %1010 = vmatpush.bf16.xpose.msra.mxu3 %v1001_v40 }
 0x167   : > { %v991_v55 = vpop.permute.xlu1 %990 }
 0x16f   : > { %v1110_v56 = vpop.permute.xlu1 %1109 }
 0x174   : > { %v949_v41 = vpop.f32.mrf.mxu3 }
 0x175   : > { %v954_v42 = vsel %vm953_vm2, %v949_v41, -inf }
 0x176   : > { %955 = vmax.xlane.f32.xlu0 %v954_v42 }
 0x17c   : > { %v951_v43 = vpop.f32.mrf.mxu3 }
 0x1e9   : > { %v956_v44 = vpop.xlane.xlu0 %955 }
 0x1ea   : > { %v957_v45 = vsub.f32 %v949_v41, %v956_v44 }
 0x1ec   : > { %v958_v46 = vmul.f32 1.442695, %v957_v45 }
 0x1ee   : > { %2272 = vpow2.f32 %v958_v46 }
 0x1f4   : > { %v2273_v47 = vpop.eup %2272 }
 0x1f5   : > { %v960_v48 = vsel %vm953_vm2, %v2273_v47, 0.0 }
 0x1f6   : > { %961 = vadd.xlane.f32.xlu0 %v960_v48 }
 0x20a   : > { %1195 = vrot.lane.b32.xlu0 %v989_v29, %s2708_s28 }
 0x269   : > { %v962_v49 = vpop.xlane.xlu0 %961 }
 0x26a   : > { %2274 = vrcp.f32 %v962_v49  ;;  %v2094_v49 = vld [vmem:[#allocation6 + $0x38] sm:$0xff] }
 0x270   : > { %v2275_v50 = vpop.eup %2274 }
 0x271   : > { %v964_v51 = vmul.f32 %v2275_v50, %v2273_v47  ;;  %v2093_v50 = vld [vmem:[#allocation6 + $0x30] sm:$0xff] }
 0x273   : > { %v965_v53 = vpack.c.bf16 %v964_v51, %v964_v51  ;;  %v2092_v51 = vld [vmem:[#allocation6 + $0x28] sm:$0xff] }
 0x274   : > { %1187 = vmatpush.bf16.msra.mxu1 %v2092_v51 }
 0x275   : > { %1890 = vmatmul.msk.bf16.vlgmr.msrb.gmra.mxu3 %vm953_vm2, %v965_v53 }
 0x276   : > { %1126 = vmatpush.bf16.xpose.msrb.mxu3 %v1117_v54 }
 0x278   : > { %1188 = vmatpush.bf16.msra.mxu1 %v2091_v52  ;;  %v1953_v52 = vld [vmem:[#allocation12 + $0x28] sm:$0xf0] }
 0x27c   : > { %v1196_v62 = vpop.permute.xlu0 %1195 }
 0x285   : > { %1891 = vmatmul.msk.bf16.vlgmr.msra.gmra.mxu3 %vm933_vm0, %v991_v55 }
 0x295   : > { %1911 = vmatmul.msk.bf16.vlgmr.msrb.gmra.mxu3 %vm933_vm0, %v1110_v56 }
 0x2f8   : > { %v982_v57 = vpop.f32.mrf.mxu3 }
 0x2f9   : > { %v986_v58 = vpack.c.bf16 %v982_v57, %v982_v57 }
 0x2fb   : > { %1910 = vmatmul.msk.bf16.vlgmr.msrb.gmra.mxu2 %vm933_vm0, %v986_v58 }
 0x300   : > { %v984_v59 = vpop.f32.mrf.mxu3 }
 0x308   : > { %v1012_v60 = vpop.f32.mrf.mxu3 }
 0x309   : > { %v1016_v61 = vsel %vm953_vm2, %v1012_v60, -inf }
 0x30a   : > { %1017 = vmax.xlane.f32.xlu2 %v1016_v61 }
 0x30b   : > { %1922 = vmatmul.msk.bf16.vlgmr.msra.gmra.mxu2 %vm933_vm0, %v1196_v62 }
 0x310   : > { %v1014_v0 = vpop.f32.mrf.mxu3 }
 0x318   : > { %v1128_v1 = vpop.f32.mrf.mxu3 }
 0x319   : > { %v1132_v2 = vsel %vm953_vm2, %v1128_v1, -inf }
 0x31a   : > { %1133 = vmax.xlane.f32.xlu0 %v1132_v2 }
 0x320   : > { %v1130_v3 = vpop.f32.mrf.mxu3 }
 0x32e   : > { %1230 = vrot.lane.b32.xlu0 %v1030_v5, %s2708_s28 }
 0x37d   : > { %v1018_v6 = vpop.xlane.xlu2 %1017 }
 0x37e   : > { %v1019_v7 = vsub.f32 %v1012_v60, %v1018_v6  ;;  %v2939_v8 = vpop.f32.mrf.mxu2 }
 0x380   : > { %v1020_v9 = vmul.f32 1.442695, %v1019_v7 }
 0x382   : > { %2276 = vpow2.f32 %v1020_v9  ;;  %v2711_v9 = vmov 128.0  }
 0x386   : > { %v1107_v10 = vpop.f32.mrf.mxu2 }
 0x387   : > { %v1991_v10 = vld [vmem:[#allocation12 + $0x70] sm:$0xf] }
 0x388   : > { %v2277_v11 = vpop.eup %2276 }
 0x389   : > { %v1022_v12 = vsel %vm953_vm2, %v2277_v11, 0.0 }
 0x38a   : > { %1023 = vadd.xlane.f32.xlu2 %v1022_v12  ;;  %v2109_v12 = vld [vmem:[#allocation12 + $0x74] sm:$0xf] }
 0x38d   : > { %v1134_v13 = vpop.xlane.xlu0 %1133 }
 0x38e   : > { %v1135_v14 = vsub.f32 %v1128_v1, %v1134_v13  ;;  %v1214_v15 = vpop.f32.mrf.mxu2 }
 0x38f   : > { %v1218_v16 = vsel %vm953_vm2, %v1214_v15, -inf }
 0x390   : > { %v1136_v17 = vmul.f32 1.442695, %v1135_v14  ;;  %1219 = vmax.xlane.f32.xlu1 %v1218_v16  ;;  %v1993_v14 = vld [vmem:[#allocation12 + $0x78] sm:$0xf0] }
 0x392   : > { %2278 = vpow2.f32 %v1136_v17 }
 0x396   : > { %v1216_v18 = vpop.f32.mrf.mxu2 }
 0x398   : > { %v2279_v19 = vpop.eup %2278 }
 0x399   : > { %v1138_v20 = vsel %vm953_vm2, %v2279_v19, 0.0 }
 0x39a   : > { %1139 = vadd.xlane.f32.xlu1 %v1138_v20 }
 0x3a0   : > { %v1231_v21 = vpop.permute.xlu0 %1230 }
 0x3a1   : > { %v1236_v22 = vsel %vm969_vm1, %v1231_v21, 0 }
 0x3a2   : > { %1031 = vrot.lane.b32.xlu2 %v1030_v5, %s2709_s3  ;;  %1245 = vmatpush.bf16.msra.mxu3 %v1236_v22 }
 0x3fd   : > { %v1024_v23 = vpop.xlane.xlu2 %1023 }
 0x3fe   : > { %2280 = vrcp.f32 %v1024_v23 }
 0x403   : > { %v1220_v24 = vpop.xlane.xlu1 %1219 }
 0x404   : > { %v2281_v25 = vpop.eup %2280  ;;  %v1221_v26 = vsub.f32 %v1214_v15, %v1220_v24  ;;  %v1996_v15 = vor.u32 %v2109_v12, %v1993_v14  ;;  %v1983_v24 = vld [vmem:[#allocation12 + $0x60] sm:$0xf]  ;;  %v2124_v12 = vld [vmem:[#allocation15 + $0x68] sm:$0xff] }
 0x405   : > { %v1026_v27 = vmul.f32 %v2281_v25, %v2277_v11  ;;  %v1032_v28 = vpop.permute.xlu2 %1031  ;;  %v2110_v11 = vld [vmem:[#allocation12 + $0x74] sm:$0xf0]  ;;  %v2108_v25 = vld [vmem:[#allocation12 + $0x64] sm:$0xf0] }
 0x406   : > { %v1222_v29 = vmul.f32 1.442695, %v1221_v26  ;;  %v1037_v30 = vsel %vm969_vm1, %v1032_v28, 0  ;;  %v1992_v13 = vor.u32 %v2110_v11, %v1991_v10  ;;  %1420 = vmatpush.bf16.msrb.mxu2 %v1996_v15  ;;  %v2107_v26 = vld [vmem:[#allocation12 + $0x64] sm:$0xf]  ;;  %v2116_v11 = vld [vmem:[#allocation15 + $0x28] sm:$0xff] }
 0x407   : > { %1046 = vmatpush.bf16.msrb.mxu0 %v1037_v30  ;;  %v1027_v31 = vpack.c.bf16 %v1026_v27, %v1026_v27  ;;  %v1984_v27 = vor.u32 %v2108_v25, %v1983_v24  ;;  %v1985_v28 = vld [vmem:[#allocation12 + $0x68] sm:$0xf0]  ;;  %v1975_v30 = vld [vmem:[#allocation12 + $0x50] sm:$0xf]  ;;  %v2123_v14 = vld [vmem:[#allocation15 + $0x60] sm:$0xff] }
 0x408   : > { %2282 = vpow2.f32 %v1222_v29  ;;  %v1988_v29 = vor.u32 %v2107_v26, %v1985_v28  ;;  %v2267_v24 = vld [vmem:[#allocation9] ss:$0 sm:$0xff] }
 0x40a   : > { %1892 = vmatmul.msk.bf16.vlgmr.msrb.gmra.mxu0 %vm953_vm2, %v1027_v31  ;;  %1421 = vmatpush.bf16.msrb.mxu2 %v1988_v29  ;;  %v2106_v31 = vld [vmem:[#allocation12 + $0x54] sm:$0xf0] }
 0x40d   : > { %v1140_v36 = vpop.xlane.xlu1 %1139 }
 0x40e   : > { %v2283_v33 = vpop.eup %2282 }
 0x40f   : > { %v1224_v34 = vsel %vm953_vm2, %v2283_v33, 0.0 }
 0x410   : > { %1225 = vadd.xlane.f32.xlu1 %v1224_v34  ;;  %v1977_v34 = vld [vmem:[#allocation12 + $0x58] sm:$0xf0] }
 0x411   : > { %v1980_v35 = vor.u32 %v2105_v32, %v1977_v34  ;;  %v2121_v32 = vld [vmem:[#allocation15 + $0x50] sm:$0xff]  ;;  %v2120_v34 = vld [vmem:[#allocation15 + $0x48] sm:$0xff] }
 0x413   : > { %1422 = vmatpush.bf16.msrb.mxu2 %v1980_v35  ;;  %v2119_v35 = vld [vmem:[#allocation15 + $0x40] sm:$0xff] }
 0x429   : > { %1144 = vrot.lane.b32.xlu1 %v1030_v5, %s2710_s2 }
 0x483   : > { %v1226_v37 = vpop.xlane.xlu1 %1225 }
 0x484   : > { %2284 = vrcp.f32 %v1226_v37  ;;  %v2104_v37 = vld [vmem:[#allocation12 + $0x44] sm:$0xf0] }
 0x485   : > { %2286 = vrcp.f32 %v1140_v36  ;;  %v1967_v36 = vld [vmem:[#allocation12 + $0x40] sm:$0xf] }
 0x486   : > { %2288 = vrcp.f32 %v2711_v9  ;;  %v2125_v9 = vld [vmem:[#allocation15 + $0x70] sm:$0xff] }
 0x487   : > { %v1048_v38 = vpop.f32.mrf.mxu0 }
 0x488   : > { %v1052_v39 = vpack.c.bf16 %v1048_v38, %v1048_v38  ;;  %v2103_v38 = vld [vmem:[#allocation12 + $0x44] sm:$0xf] }
 0x48a   : > { %v2285_v40 = vpop.eup %2284  ;;  %1901 = vmatmul.msk.bf16.vlgmr.msrb.gmra.mxu1 %vm933_vm0, %v1052_v39  ;;  %v1968_v39 = vor.u32 %v2104_v37, %v1967_v36  ;;  %v717_v36 = vld [vmem:[#allocation13] sm:$0x3] }
 0x48b   : > { %v1228_v41 = vmul.f32 %v2285_v40, %v2283_v33  ;;  %v2287_v44 = vpop.eup %2286  ;;  %1407 = vmatpush.bf16.msrb.mxu1 %v1992_v13  ;;  %v1976_v33 = vor.u32 %v2106_v31, %v1975_v30  ;;  %v1969_v40 = vld [vmem:[#allocation12 + $0x48] sm:$0xf0]  ;;  %v2115_v13 = vld [vmem:[#allocation15 + $0x20] sm:$0xff]  ;;  %v1323_v37 = vperm.slane %v717_v36, 0 }
 0x48c   : > { %v1142_v45 = vmul.f32 %v2287_v44, %v2279_v19  ;;  %v2289_v16 = vpop.eup %2288  ;;  %v2101_v44 = vld [vmem:[#allocation12 + $0x34] sm:$0xf]  ;;  %v2112_v31 = vld [vmem:[#allocation15 + $0x8] sm:$0xff] }
 0x48d   : > { %v1229_v42 = vpack.c.bf16 %v1228_v41, %v1228_v41  ;;  %vm1293_vm3 = vweird.f32 %v2289_v16  ;;  %v1972_v41 = vor.u32 %v2103_v38, %v1969_v40  ;;  %v1324_v40 = vperm.slane %v717_v36, 1 }
 0x48e   : > { %v1143_v48 = vpack.c.bf16 %v1142_v45, %v1142_v45 }
 0x48f   : > { %v1050_v43 = vpop.f32.mrf.mxu0  ;;  %1923 = vmatmul.msk.bf16.vlgmr.msra.gmra.mxu3 %vm953_vm2, %v1229_v42  ;;  %1408 = vmatpush.bf16.msrb.mxu1 %v1984_v27  ;;  %v1959_v42 = vld [vmem:[#allocation12 + $0x30] sm:$0xf]  ;;  %v2268_v27 = vld [vmem:[#allocation10] ss:$0 sm:$0xff] }
 0x490   : > { %1423 = vmatpush.bf16.msrb.mxu2 %v1972_v41  ;;  %v2102_v43 = vld [vmem:[#allocation12 + $0x34] sm:$0xf0] }
 0x491   : > { %v1960_v45 = vor.u32 %v2102_v43, %v1959_v42 }
 0x493   : > { %1409 = vmatpush.bf16.msrb.mxu1 %v1976_v33  ;;  %v2111_v33 = vld [vmem:[#allocation15] sm:$0xff] }
 0x497   : > { %1410 = vmatpush.bf16.msrb.mxu1 %v1968_v39 }
 0x49b   : > { %v1145_v46 = vpop.permute.xlu1 %1144  ;;  %1411 = vmatpush.bf16.msrb.mxu1 %v1960_v45 }
 0x49c   : > { %v1150_v47 = vsel %vm969_vm1, %v1145_v46, 0  ;;  %v1961_v46 = vld [vmem:[#allocation12 + $0x38] sm:$0xf0] }
 0x49d   : > { %1159 = vmatpush.bf16.msra.mxu0 %v1150_v47  ;;  %v1964_v47 = vor.u32 %v2101_v44, %v1961_v46 }
 0x49f   : > { %1424 = vmatpush.bf16.msrb.mxu2 %v1964_v47 }
 0x4a0   : > { %1912 = vmatmul.msk.bf16.vlgmr.msra.gmra.mxu0 %vm953_vm2, %v1143_v48  ;;  %v1951_v48 = vld [vmem:[#allocation12 + $0x20] sm:$0xf] }
 0x4a1   : > { %1273 = vmatpush.bf16.msrb.mxu0 %v2094_v49  ;;  %v2100_v49 = vld [vmem:[#allocation12 + $0x24] sm:$0xf0] }
 0x4a2   : > { %v1952_v51 = vor.u32 %v2100_v49, %v1951_v48  ;;  %v2269_v48 = vld [vmem:[#allocation16] ss:$0 sm:$0xff] }
 0x4a4   : > { %1412 = vmatpush.bf16.msrb.mxu1 %v1952_v51 }
 0x4a5   : > { %1274 = vmatpush.bf16.msrb.mxu0 %v2093_v50  ;;  %v2099_v50 = vld [vmem:[#allocation12 + $0x24] sm:$0xf] }
 0x507   : > { %v1077_v53 = vpop.f32.mrf.mxu1 }
 0x508   : > { %v1106_v0 = vadd.f32 %v2939_v8, %v1077_v53  ;;  %v1289_v8 = vmul.f32 128.0, %v2289_v16  ;;  %v1956_v53 = vor.u32 %v2099_v50, %v1953_v52 }
 0x50a   : > { %v1290_v17 = vsub.f32 1.0, %v1289_v8  ;;  %1425 = vmatpush.bf16.msrb.mxu2 %v1956_v53  ;;  %v2114_v8 = vld [vmem:[#allocation15 + $0x18] sm:$0xff] }
 0x50c   : > { %v1291_v18 = vmul.f32 %v2289_v16, %v1290_v17  ;;  %v2122_v17 = vld [vmem:[#allocation15 + $0x58] sm:$0xff] }
 0x50e   : > { %v1292_v19 = vadd.f32 %v2289_v16, %v1291_v18 }
 0x50f   : > { %v1079_v54 = vpop.f32.mrf.mxu1 }
 0x510   : > { %v1943_v54 = vld [vmem:[#allocation12 + $0x10] sm:$0xf] }
 0x512   : > { %v1247_v55 = vpop.f32.mrf.mxu3 }
 0x513   : > { %v1251_v56 = vpack.c.bf16 %v1247_v55, %v1247_v55  ;;  %v2098_v55 = vld [vmem:[#allocation12 + $0x14] sm:$0xf0] }
 0x515   : > { %1932 = vmatmul.msk.bf16.vlgmr.msrb.gmra.mxu0 %vm933_vm0, %v1251_v56  ;;  %v2097_v56 = vld [vmem:[#allocation12 + $0x14] sm:$0xf] }
 0x51a   : > { %v1249_v57 = vpop.f32.mrf.mxu3 }
 0x51b   : > { %v1944_v57 = vor.u32 %v2098_v55, %v1943_v54 }
 0x51d   : > { %v1161_v58 = vpop.f32.mrf.mxu0  ;;  %1413 = vmatpush.bf16.msrb.mxu1 %v1944_v57 }
 0x51e   : > { %v1165_v59 = vpack.c.bf16 %v1161_v58, %v1161_v58  ;;  %v1945_v58 = vld [vmem:[#allocation12 + $0x18] sm:$0xf0] }
 0x520   : > { %1921 = vmatmul.msk.bf16.vlgmr.msra.gmra.mxu1 %vm933_vm0, %v1165_v59  ;;  %v1935_v59 = vld [vmem:[#allocation12] sm:$0xf] }
 0x525   : > { %v1163_v60 = vpop.f32.mrf.mxu0 }
 0x526   : > { %v2096_v60 = vld [vmem:[#allocation12 + $0x4] sm:$0xf0] }
 0x592   : > { %v1276_v61 = vpop.f32.mrf.mxu0 }
 0x59a   : > { %v1278_v62 = vpop.f32.mrf.mxu0 }
 0x59b   : > { %v2095_v62 = vld [vmem:[#allocation12 + $0x4] sm:$0xf] }
 0x59d   : > { %v1190_v1 = vpop.f32.mrf.mxu1 }
 0x59e   : > { %v1194_v2 = vadd.f32 %v1190_v1, %v1106_v0  ;;  %v1937_v0 = vld [vmem:[#allocation12 + $0x8] sm:$0xf0]  ;;  %v1936_v1 = vor.u32 %v2096_v60, %v1935_v59 }
 0x5a0   : > { %v1280_v3 = vadd.f32 %v1276_v61, %v1194_v2  ;;  %v1948_v61 = vor.u32 %v2097_v56, %v1945_v58  ;;  %v1940_v2 = vor.u32 %v2095_v62, %v1937_v0  ;;  %1414 = vmatpush.bf16.msrb.mxu1 %v1936_v1 }
 0x5a2   : > { %v1281_v5 = vadd.f32 %v1280_v3, %v2913_v63  ;;  %v2958_v63 = vsel %vm1293_vm3, %v2289_v16, %v1292_v19  ;;  %1426 = vmatpush.bf16.msrb.mxu2 %v1948_v61  ;;  %v2118_v3 = vld [vmem:[#allocation15 + $0x38] sm:$0xff] }
 0x5a3   : > { %1536 = vmatpush.bf16.msrb.mxu3 %v2118_v3 }
 0x5a4   : > { %v1285_v6 = vadd.f32 %v2266_v4, %v1281_v5  ;;  %v2126_v4 = vld [vmem:[#allocation15 + $0x78] sm:$0xff] }
 0x5a5   : > { %v1192_v7 = vpop.f32.mrf.mxu1  ;;  %1549 = vmatpush.bf16.msra.mxu0 %v2126_v4 }
 0x5a6   : > { %1286 = vadd.xlane.f32.xlu2 %v1285_v6  ;;  %1427 = vmatpush.bf16.msrb.mxu2 %v1940_v2  ;;  %v2117_v7 = vld [vmem:[#allocation15 + $0x30] sm:$0xff] }
 0x5a7   : > { %1537 = vmatpush.bf16.msrb.mxu3 %v2117_v7 }
 0x5a9   : > { %1550 = vmatpush.bf16.msra.mxu0 %v2125_v9  ;;  %v2271_v9 = vld [vmem:[#allocation19] ss:$0 sm:$0xff] }
 0x5ab   : > { %1538 = vmatpush.bf16.msrb.mxu3 %v2116_v11 }
 0x5ad   : > { %1551 = vmatpush.bf16.msra.mxu0 %v2124_v12 }
 0x5af   : > { %1539 = vmatpush.bf16.msrb.mxu3 %v2115_v13 }
 0x5b1   : > { %1552 = vmatpush.bf16.msra.mxu0 %v2123_v14 }
 0x5b3   : > { %1540 = vmatpush.bf16.msrb.mxu3 %v2114_v8 }
 0x5b5   : > { %1553 = vmatpush.bf16.msra.mxu0 %v2122_v17 }
 0x5b9   : > { %1554 = vmatpush.bf16.msra.mxu0 %v2121_v32 }
 0x5bd   : > { %1555 = vmatpush.bf16.msra.mxu0 %v2120_v34 }
 0x5c1   : > { %1556 = vmatpush.bf16.msra.mxu0 %v2119_v35 }
 0x619   : > { %v1287_v20 = vpop.xlane.xlu2 %1286 }
 0x61a   : > { %v1295_v21 = vmul.f32 %v2958_v63, %v1287_v20  ;;  %v2113_v20 = vld [vmem:[#allocation15 + $0x10] sm:$0xff] }
 0x61b   : > { %1541 = vmatpush.bf16.msrb.mxu3 %v2113_v20 }
 0x61c   : > { %v2961_v22 = vsub.f32 %v1285_v6, %v1295_v21 }
 0x61e   : > { %v1297_v23 = vmul.f32 %v2961_v22, %v2961_v22 }
 0x61f   : > { %1542 = vmatpush.bf16.msrb.mxu3 %v2112_v31 }
 0x620   : > { %1298 = vadd.xlane.f32.xlu0 %v1297_v23 }
 0x623   : > { %1543 = vmatpush.bf16.msrb.mxu3 %v2111_v33 }
 0x693   : > { %v1299_v5 = vpop.xlane.xlu0 %1298 }
 0x694   : > { %v1300_v6 = vmul.f32 %v1299_v5, %v2958_v63 }
 0x696   : > { %v1301_v10 = vadd.f32 1e-05, %v1300_v6  ;;  %v2270_v6 = vld [vmem:[#allocation18] ss:$0 sm:$0xff] }
 0x698   : > { %2290 = vrsqrt.f32 %v1301_v10  ;;  %vm1308_vm5 = vweird.f32 %v1301_v10 }
 0x69e   : > { %v2291_v15 = vpop.eup %2290 }
 0x69f   : > { %v1303_v16 = vmul.f32 %v2291_v15, %v1301_v10  ;;  %vm1309_vm4 = vweird.f32 %v2291_v15 }
 0x6a0   : > { %vm1310_vm6 = vmor %vm1308_vm5, %vm1309_vm4 }
 0x6a1   : > { %v1304_v18 = vmul.f32 %v2291_v15, %v1303_v16 }
 0x6a3   : > { %v1305_v19 = vmul.f32 0.5, %v1304_v18 }
 0x6a5   : > { %v1306_v21 = vsub.f32 1.5, %v1305_v19 }
 0x6a7   : > { %v1307_v23 = vmul.f32 %v2291_v15, %v1306_v21 }
 0x6a9   : > { %v1311_v25 = vsel %vm1310_vm6, %v2291_v15, %v1307_v23 }
 0x6aa   : > { %v1312_v26 = vmul.f32 %v1311_v25, %v2961_v22 }
 0x6ac   : > { %v1316_v28 = vmul.f32 %v2267_v24, %v1312_v26 }
 0x6ae   : > { %v1320_v29 = vadd.f32 %v2268_v27, %v1316_v28 }
 0x6b0   : > { %v1321_v30 = vpack.c.bf16 %v1320_v29, %v1320_v29 }
 0x6b2   : > { %1415 = vmatmul.bf16.vlgmr.msrb.gmra.mxu1 %v1321_v30  ;;  %1428 = vmatmul.bf16.vlgmr.msrb.gmra.mxu2 %v1321_v30 }
 0x72f   : > { %v1416_v38 = vpop.f32.mrf.mxu1 }
 0x730   : > { %v1417_v22 = vadd.f32 %v1416_v38, %v1323_v37 }
 0x732   : > { %v1433_v39 = vmax.f32 %v1417_v22, 0.0 }
 0x734   : > { %v1435_v41 = vpack.c.bf16 %v1433_v39, %v1433_v39 }
 0x735   : > { %v1429_v42 = vpop.f32.mrf.mxu2 }
 0x736   : > { %v1430_v43 = vadd.f32 %v1429_v42, %v1324_v40  ;;  %1544 = vmatmul.bf16.vlgmr.msrb.gmra.mxu3 %v1435_v41 }
 0x737   : > { %v1418_v44 = vpop.f32.mrf.mxu1 }
 0x738   : > { %v1434_v45 = vmax.f32 %v1430_v43, 0.0 }
 0x73a   : > { %v1436_v46 = vpack.c.bf16 %v1434_v45, %v1434_v45 }
 0x73c   : > { %1557 = vmatmul.bf16.vlgmr.msra.gmra.mxu0 %v1436_v46 }
 0x73d   : > { %v1431_v47 = vpop.f32.mrf.mxu2 }
 0x7b9   : > { %v1545_v49 = vpop.f32.mrf.mxu3  ;;  %v1558_v50 = vpop.f32.mrf.mxu0 }
 0x7ba   : > { %v1546_v51 = vadd.f32 %v2269_v48, %v1545_v49 }
 0x7bc   : > { %v1559_v52 = vadd.f32 %v1558_v50, %v1546_v51 }
 0x7be   : > { %v1562_v53 = vadd.f32 %v1559_v52, %v1320_v29 }
 0x7c0   : > { %1563 = vadd.xlane.f32.xlu1 %v1562_v53 }
 0x7c1   : > { %v1547_v54 = vpop.f32.mrf.mxu3  ;;  %v1560_v55 = vpop.f32.mrf.mxu0 }
 0x833   : > { %v1564_v56 = vpop.xlane.xlu1 %1563 }
 0x834   : > { %v1565_v57 = vmul.f32 %v1564_v56, %v2958_v63 }
 0x836   : > { %v1566_v58 = vsub.f32 %v1562_v53, %v1565_v57 }
 0x838   : > { %v1567_v59 = vmul.f32 %v1566_v58, %v1566_v58 }
 0x83a   : > { %1568 = vadd.xlane.f32.xlu2 %v1567_v59 }
 0x8ad   : > { %v1569_v60 = vpop.xlane.xlu2 %1568 }
 0x8ae   : > { %v1570_v61 = vmul.f32 %v1569_v60, %v2958_v63 }
 0x8b0   : > { %v1571_v62 = vadd.f32 1e-05, %v1570_v61 }
 0x8b2   : > { %2292 = vrsqrt.f32 %v1571_v62  ;;  %vm1578_vm8 = vweird.f32 %v1571_v62 }
 0x8b8   : > { %v2293_v0 = vpop.eup %2292 }
 0x8b9   : > { %v1573_v1 = vmul.f32 %v2293_v0, %v1571_v62  ;;  %vm1579_vm7 = vweird.f32 %v2293_v0 }
 0x8ba   : > { %vm1580_vm9 = vmor %vm1578_vm8, %vm1579_vm7 }
 0x8bb   : > { %v1574_v2 = vmul.f32 %v2293_v0, %v1573_v1 }
 0x8bd   : > { %v1575_v3 = vmul.f32 0.5, %v1574_v2 }
 0x8bf   : > { %v1576_v4 = vsub.f32 1.5, %v1575_v3 }
 0x8c1   : > { %v1577_v5 = vmul.f32 %v2293_v0, %v1576_v4 }
 0x8c3   : > { %v1581_v7 = vsel %vm1580_vm9, %v2293_v0, %v1577_v5 }
 0x8c4   : > { %v1582_v10 = vmul.f32 %v1581_v7, %v1566_v58 }
 0x8c6   : > { %v1586_v11 = vmul.f32 %v2270_v6, %v1582_v10 }
 0x8c8   : > { %v1590_v63 = vadd.f32 %v2271_v9, %v1586_v11 }
 0x8ca   : > { %1591 = vst [vmem:[%s645_s30] sm:$0xff] %v1590_v63 }
 0x8cb PF: > { %s31_s29 = sadd.s32 1, %s2688_s29  }
 0x8cc   : > { %p28_p7 = scmp.ge.s32.totalorder %s31_s29, 4  }
 0x8ce   :  { %30 = sbr.rel (!%p28_p7) target bundleno = 13 (0xd), region = 155 }
 0x8d3   :  { %1611 = vsyncpa [#allocation3], 1 }
 0x8d4   :  { %1613 = vsyncpa [#allocation3 + $0x1], 1 }
 0x8d5   :  { %1614 = vsyncpa [#allocation5], 1 }
 0x8d6   :  { %1615 = vsyncpa [#allocation8], 1 }
 0x8d7   :  { %1616 = vsyncpa [#allocation11], 1 }
 0x8d8   :  { %1617 = vsyncpa [#allocation14], 1 }
 0x8d9   :  { %1618 = vsyncpa [#allocation17], 1 }
 0x8da   :  { %1619 = vsyncpa [#allocation20], 1 }

</bundles_post_ra>
